<compile_context>
chip_gen: v6e
topology: v6e:2x2x1
jax: 0.10.0
libtpu: 0.0.40
codegen_flags: <defaults>
</compile_context>

<pallas_src>
import jax
import jax.numpy as jnp
from jax.experimental import pallas as pl
from jax.experimental.pallas import tpu as pltpu

LANE_DIM = 1024            # lane-dense slab width (multiple of the 128-lane vreg)
TILE_ROWS = 512            # rows per grid step -> (512, 1024) f32 block = 2 MiB
MIN_KERNEL_ELEMS = 65536   # below this, launch overhead dominates -> plain JAX


def linreg_kernel(x_ref, w_ref, b_ref, o_ref):
    # y = w * x + b on the VPU. Weight / bias are (1, 1) scalars in SMEM.
    o_ref[...] = x_ref[...] * w_ref[0, 0] + b_ref[0, 0]


def _pick_tile_rows(rows: int) -> int:
    """Pick block rows: 2 MiB blocks when rows are plentiful, otherwise shrink
    so the row grid has >= 2 steps (lets v7x shard across both TensorCores)."""
    if rows >= 2 * TILE_ROWS:
        return TILE_ROWS
    # Aim for 2 grid steps; round block rows up to a sublane (8) multiple.
    return max(8, ((pl.cdiv(rows, 2) + 7) // 8) * 8)


def _run_slab(x2d, w2d, b2d):
    rows, lanes = x2d.shape
    tile_r = _pick_tile_rows(rows)
    n_elems = rows * lanes
    itemsize = jnp.dtype(x2d.dtype).itemsize
    return pl.pallas_call(
        linreg_kernel,
        out_shape=jax.ShapeDtypeStruct((rows, lanes), x2d.dtype),
        grid=(pl.cdiv(rows, tile_r),),
        in_specs=[
            pl.BlockSpec((tile_r, lanes), lambda i: (i, 0)),      # x tile (VMEM)
            pl.BlockSpec(memory_space=pltpu.MemorySpace.SMEM),    # weight scalar
            pl.BlockSpec(memory_space=pltpu.MemorySpace.SMEM),    # bias scalar
        ],
        out_specs=pl.BlockSpec((tile_r, lanes), lambda i: (i, 0)),
        compiler_params=pltpu.CompilerParams(
            dimension_semantics=("parallel",)),
        cost_estimate=pl.CostEstimate(
            flops=2 * n_elems,
            bytes_accessed=2 * itemsize * n_elems,
            transcendentals=0),
    )(x2d, w2d, b2d)


def _linear_regression_impl(x, weight, bias):
    """nn.Linear(1, 1) forward.

    x: (N, 1) f32; weight: (1, 1) f32; bias: (1,) f32 -> (N, 1) f32.
    """
    n = x.shape[0]
    dtype = x.dtype
    w2d = weight.reshape(1, 1).astype(dtype)
    b2d = bias.reshape(1, 1).astype(dtype)

    # Tiny batches: kernel launch + one grid step dwarfs a handful of FMAs.
    if n < MIN_KERNEL_ELEMS:
        return x * w2d[0, 0] + b2d[0, 0]

    flat = x.reshape(-1)
    aligned = (n // LANE_DIM) * LANE_DIM

    if aligned == n:
        # Common case: copy-free reshape to a lane-dense slab; no pad, no slice.
        x2d = flat.reshape(n // LANE_DIM, LANE_DIM)
        return _run_slab(x2d, w2d, b2d).reshape(n, 1)

    # Ragged tail (< LANE_DIM elements): kernel on the aligned prefix,
    # plain-JAX math on the tiny tail, then stitch. Avoids a full-array pad.
    head = _run_slab(
        flat[:aligned].reshape(aligned // LANE_DIM, LANE_DIM), w2d, b2d
    ).reshape(aligned)
    tail = flat[aligned:] * w2d[0, 0] + b2d[0, 0]
    return jnp.concatenate([head, tail]).reshape(n, 1)


# jit the wrapper so reshapes / ragged-tail stitching fuse into one executable
# instead of dispatching as separate XLA ops around the bandwidth-bound kernel.
linear_regression = jax.jit(_linear_regression_impl)


if __name__ == "__main__":
    key = jax.random.PRNGKey(0)
    kx1, kx2, kx3, kw, kb = jax.random.split(key, 5)

    # Deterministic synthetic parameters (shapes from nn.Linear(1, 1)).
    weight = jax.random.normal(kw, (1, 1), dtype=jnp.float32)
    bias = jax.random.normal(kb, (1,), dtype=jnp.float32)

    # 1) Full-tile aligned path: 2 grid steps of (512, 1024) blocks, zero
    #    wrapper-side copies (still only ~4 MiB of data).
    n_full = 2 * TILE_ROWS * LANE_DIM
    x_full = jax.random.normal(kx1, (n_full, 1), dtype=jnp.float32)
    y_full = jax.block_until_ready(linear_regression(x_full, weight, bias))
    y_full_ref = x_full @ weight.T + bias
    assert y_full.shape == (n_full, 1)
    assert jnp.allclose(y_full, y_full_ref, atol=1e-6, rtol=1e-6)

    # 2) Ragged path: kernel on the aligned prefix, plain-JAX tail.
    n_rag = 128 * LANE_DIM + 7
    x_rag = jax.random.normal(kx2, (n_rag, 1), dtype=jnp.float32)
    y_rag = jax.block_until_ready(linear_regression(x_rag, weight, bias))
    y_rag_ref = x_rag @ weight.T + bias
    assert y_rag.shape == (n_rag, 1)
    assert jnp.allclose(y_rag, y_rag_ref, atol=1e-6, rtol=1e-6)

    # 3) Tiny-batch fast path (plain JAX dispatch), same semantics.
    x_small = jax.random.normal(kx3, (8, 1), dtype=jnp.float32)
    y_small = jax.block_until_ready(linear_regression(x_small, weight, bias))
    y_small_ref = x_small @ weight.T + bias
    assert y_small.shape == (8, 1)
    assert jnp.allclose(y_small, y_small_ref, atol=1e-6, rtol=1e-6)

    print("KERNEL_OK")
</pallas_src>

<mosaic_0001>
module attributes {stable_mosaic.version = 11 : i64} {
  func.func @linreg_kernel(%arg0: i32, %arg1: memref<512x1024xf32, #tpu.memory_space<vmem>>, %arg2: memref<1x1xf32, #tpu.memory_space<smem>>, %arg3: memref<1x1xf32, #tpu.memory_space<smem>>, %arg4: memref<512x1024xf32, #tpu.memory_space<vmem>>) attributes {dimension_semantics = [#tpu.dimension_semantics<parallel>], iteration_bounds = array<i64: 2>, scalar_prefetch = 0 : i64, scratch_operands = 0 : i64, tpu.core_type = #tpu.core_type<tc>, window_params = [{transform_indices = @transform_0, window_bounds = array<i64: 512, 1024>}, {transform_indices = @transform_1, window_bounds = array<i64: 1, 1>}, {transform_indices = @transform_2, window_bounds = array<i64: 1, 1>}, {transform_indices = @transform_3, window_bounds = array<i64: 512, 1024>}]} {
    %c0 = arith.constant 0 : index
    %c0_0 = arith.constant 0 : index
    %0 = vector.load %arg1[%c0, %c0_0] : memref<512x1024xf32, #tpu.memory_space<vmem>>, vector<512x1024xf32>
    %c0_1 = arith.constant 0 : index
    %c0_2 = arith.constant 0 : index
    %1 = memref.load %arg2[%c0_1, %c0_2] : memref<1x1xf32, #tpu.memory_space<smem>>
    %2 = vector.broadcast %1 : f32 to vector<512x1024xf32>
    %3 = arith.mulf %0, %2 : vector<512x1024xf32>
    %c0_3 = arith.constant 0 : index
    %c0_4 = arith.constant 0 : index
    %4 = memref.load %arg3[%c0_3, %c0_4] : memref<1x1xf32, #tpu.memory_space<smem>>
    %5 = vector.broadcast %4 : f32 to vector<512x1024xf32>
    %6 = arith.addf %3, %5 : vector<512x1024xf32>
    %c0_5 = arith.constant 0 : index
    %c0_6 = arith.constant 0 : index
    %7 = vector.load %arg4[%c0_5, %c0_6] : memref<512x1024xf32, #tpu.memory_space<vmem>>, vector<512x1024xf32>
    tpu.vector_store %arg4[%c0_5, %c0_6], %6 {strides = array<i32>} : memref<512x1024xf32, #tpu.memory_space<vmem>>, vector<512x1024xf32>,
    return
  }
  func.func @transform_0(%arg0: i32) -> (i32, i32) {
    %c0_i32 = arith.constant 0 : i32
    %c0_i32_0 = arith.constant 0 : i32
    return %arg0, %c0_i32 : i32, i32
  }
  func.func @transform_1(%arg0: i32) -> (i32, i32) {
    %c0_i32 = arith.constant 0 : i32
    %c0_i32_0 = arith.constant 0 : i32
    %c0_i32_1 = arith.constant 0 : i32
    return %c0_i32, %c0_i32_0 : i32, i32
  }
  func.func @transform_2(%arg0: i32) -> (i32, i32) {
    %c0_i32 = arith.constant 0 : i32
    %c0_i32_0 = arith.constant 0 : i32
    %c0_i32_1 = arith.constant 0 : i32
    return %c0_i32, %c0_i32_0 : i32, i32
  }
  func.func @transform_3(%arg0: i32) -> (i32, i32) {
    %c0_i32 = arith.constant 0 : i32
    %c0_i32_0 = arith.constant 0 : i32
    return %arg0, %c0_i32 : i32, i32
  }
}

</mosaic_0001>

<bundles_post_ra>
// kernel: _linear_regression_impl.1
= control target key start
LH: loop header
LB: loop body
LE: loop exit
PB: predicated region body
PF: predicated region fallthrough
CT: control target
= control target key end

     0   :  { %s2348_s16 = smov 0   ;;  %s4421_s0 = inlined_call_operand.vmem [shape: f32[1024,1024], index: 0, kind: input, shape index: {}]   ;;  %s4422_s1 = inlined_call_operand.<no memory space> [shape: f32[1,1], index: 1, kind: input, shape index: {}]   ;;  %s4423_s2 = inlined_call_operand.<no memory space> [shape: f32[1,1], index: 2, kind: input, shape index: {}]   ;;  %s4424_s3 = inlined_call_operand.vmem [shape: f32[1024,1024], index: 3, kind: output, shape index: {}]  }
   0x1   :  { %8 = sst [smem:[#allocation2]] %s4422_s1 }
   0x2   :  { %9 = sst [smem:[#allocation3]] %s4423_s2 }
   0x3 LB: > { %s2291_s17 = sadd.s32 4294967295, %s2320_s16   ;;  %p2295_p0 = scmp.ge.s32.totalorder %s2320_s16, 1  ;;  %s2320_s16 = sphi %s2348_s16, %s15_s16  }
   0x4   : > { %p141_p1 = scmp.lt.s32.totalorder %s2320_s16, 3 }
   0x6   : > { %p142_p2 = pnand %p2295_p0, %p141_p1 }
   0x7   : > { %s2296_s1 = sshll.u32 (!%p142_p2), %s2291_s17, 6  ;;  %s693_s18 = sld [smem:[#allocation2]] (!%p142_p2) }
   0x8   : > { %145 = sbr.rel (%p142_p2) target bundleno = 328 (0x148), region = 32  ;;  %p168_p3 = scmp.lt.s32.totalorder (!%p142_p2), %s2296_s1, 127 }
   0x9   : > { %s1207_s19 = sld [smem:[#allocation3]] (!%p142_p2) }
   0xd   : > { %s4426_s1 = smov (!%p168_p3, %s2296_s1), 127  ;;  %v2361_v0 = vstv %s693_s18 }
   0xe   : > { %s2304_s2 = sshll.u32 %s4426_s1, 6 }
   0xf   : > { %s2359_s22 = scalar_lea.vmem %s4421_s0, %s2304_s2  ;;  %v2364_v2 = vstv %s1207_s19  ;;  %s2377_s25 = scalar_lea.vmem %s4424_s3, %s2304_s2 }
  0x10   : > { %v181_v1 = vld [vmem:[%s2359_s22] sm:$0xff]  ;;  %v182_v3 = vld [vmem:[%s2359_s22 + $0x8] sm:$0xff]  ;;  %v183_v4 = vld [vmem:[%s2359_s22 + $0x10] sm:$0xff] }
  0x11   : > { %v695_v5 = vmul.f32 %v2361_v0, %v181_v1  ;;  %v696_v6 = vmul.f32 %v2361_v0, %v182_v3  ;;  %v697_v7 = vmul.f32 %v2361_v0, %v183_v4  ;;  %v184_v8 = vld [vmem:[%s2359_s22 + $0x18] sm:$0xff]  ;;  %v185_v9 = vld [vmem:[%s2359_s22 + $0x20] sm:$0xff]  ;;  %v186_v10 = vld [vmem:[%s2359_s22 + $0x28] sm:$0xff] }
  0x12   : > { %v698_v11 = vmul.f32 %v2361_v0, %v184_v8  ;;  %v699_v12 = vmul.f32 %v2361_v0, %v185_v9  ;;  %v700_v13 = vmul.f32 %v2361_v0, %v186_v10  ;;  %v187_v14 = vld [vmem:[%s2359_s22 + $0x30] sm:$0xff]  ;;  %v188_v15 = vld [vmem:[%s2359_s22 + $0x38] sm:$0xff]  ;;  %v189_v16 = vld [vmem:[%s2359_s22 + $0x40] sm:$0xff] }
  0x13   : > { %v1209_v17 = vadd.f32 %v2364_v2, %v695_v5  ;;  %v1210_v18 = vadd.f32 %v2364_v2, %v696_v6  ;;  %v1211_v19 = vadd.f32 %v2364_v2, %v697_v7  ;;  %v701_v20 = vmul.f32 %v2361_v0, %v187_v14  ;;  %v190_v21 = vld [vmem:[%s2359_s22 + $0x48] sm:$0xff]  ;;  %v191_v22 = vld [vmem:[%s2359_s22 + $0x50] sm:$0xff]  ;;  %v192_v23 = vld [vmem:[%s2359_s22 + $0x58] sm:$0xff] }
  0x14   : > { %v1212_v24 = vadd.f32 %v2364_v2, %v698_v11  ;;  %v1213_v25 = vadd.f32 %v2364_v2, %v699_v12  ;;  %v1214_v26 = vadd.f32 %v2364_v2, %v700_v13  ;;  %v702_v27 = vmul.f32 %v2361_v0, %v188_v15  ;;  %v193_v28 = vld [vmem:[%s2359_s22 + $0x60] sm:$0xff]  ;;  %v194_v29 = vld [vmem:[%s2359_s22 + $0x68] sm:$0xff]  ;;  %v195_v30 = vld [vmem:[%s2359_s22 + $0x70] sm:$0xff] }
  0x15   : > { %1721 = vst [vmem:[%s2377_s25] sm:$0xff] %v1209_v17  ;;  %1722 = vst [vmem:[%s2377_s25 + $0x8] sm:$0xff] %v1210_v18  ;;  %v1215_v31 = vadd.f32 %v2364_v2, %v701_v20  ;;  %v703_v32 = vmul.f32 %v2361_v0, %v189_v16  ;;  %v704_v33 = vmul.f32 %v2361_v0, %v190_v21  ;;  %v196_v35 = vld [vmem:[%s2359_s22 + $0x78] sm:$0xff]  ;;  %v197_v40 = vld [vmem:[%s2359_s22 + $0x80] sm:$0xff] }
  0x16   : > { %1723 = vst [vmem:[%s2377_s25 + $0x10] sm:$0xff] %v1211_v19  ;;  %v705_v34 = vmul.f32 %v2361_v0, %v191_v22  ;;  %1724 = vst [vmem:[%s2377_s25 + $0x18] sm:$0xff] %v1212_v24  ;;  %v1216_v36 = vadd.f32 %v2364_v2, %v702_v27  ;;  %v706_v37 = vmul.f32 %v2361_v0, %v192_v23  ;;  %v198_v41 = vld [vmem:[%s2359_s22 + $0x88] sm:$0xff]  ;;  %v199_v42 = vld [vmem:[%s2359_s22 + $0x90] sm:$0xff] }
  0x17   : > { %1725 = vst [vmem:[%s2377_s25 + $0x20] sm:$0xff] %v1213_v25  ;;  %1726 = vst [vmem:[%s2377_s25 + $0x28] sm:$0xff] %v1214_v26  ;;  %v707_v38 = vmul.f32 %v2361_v0, %v193_v28  ;;  %v708_v39 = vmul.f32 %v2361_v0, %v194_v29  ;;  %v1217_v43 = vadd.f32 %v2364_v2, %v703_v32  ;;  %v200_v47 = vld [vmem:[%s2359_s22 + $0x98] sm:$0xff]  ;;  %v201_v48 = vld [vmem:[%s2359_s22 + $0xa0] sm:$0xff] }
  0x18   : > { %1727 = vst [vmem:[%s2377_s25 + $0x30] sm:$0xff] %v1215_v31  ;;  %v1218_v44 = vadd.f32 %v2364_v2, %v704_v33  ;;  %v1219_v45 = vadd.f32 %v2364_v2, %v705_v34  ;;  %v709_v46 = vmul.f32 %v2361_v0, %v195_v30  ;;  %v202_v49 = vld [vmem:[%s2359_s22 + $0xa8] sm:$0xff]  ;;  %1728 = vst [vmem:[%s2377_s25 + $0x38] sm:$0xff] %v1216_v36  ;;  %v203_v54 = vld [vmem:[%s2359_s22 + $0xb0] sm:$0xff] }
  0x19   : > { %v1220_v50 = vadd.f32 %v2364_v2, %v706_v37  ;;  %v1221_v51 = vadd.f32 %v2364_v2, %v707_v38  ;;  %v1222_v52 = vadd.f32 %v2364_v2, %v708_v39  ;;  %v710_v53 = vmul.f32 %v2361_v0, %v196_v35  ;;  %1729 = vst [vmem:[%s2377_s25 + $0x40] sm:$0xff] %v1217_v43  ;;  %v204_v59 = vld [vmem:[%s2359_s22 + $0xb8] sm:$0xff]  ;;  %v205_v1 = vld [vmem:[%s2359_s22 + $0xc0] sm:$0xff]  ;;  %v206_v3 = vld [vmem:[%s2359_s22 + $0xc8] sm:$0xff] }
  0x1a   : > { %1730 = vst [vmem:[%s2377_s25 + $0x48] sm:$0xff] %v1218_v44  ;;  %1731 = vst [vmem:[%s2377_s25 + $0x50] sm:$0xff] %v1219_v45  ;;  %v1223_v55 = vadd.f32 %v2364_v2, %v709_v46  ;;  %v711_v56 = vmul.f32 %v2361_v0, %v197_v40  ;;  %v712_v57 = vmul.f32 %v2361_v0, %v198_v41  ;;  %v207_v4 = vld [vmem:[%s2359_s22 + $0xd0] sm:$0xff]  ;;  %v208_v9 = vld [vmem:[%s2359_s22 + $0xd8] sm:$0xff] }
  0x1b   : > { %v713_v58 = vmul.f32 %v2361_v0, %v199_v42  ;;  %1732 = vst [vmem:[%s2377_s25 + $0x58] sm:$0xff] %v1220_v50  ;;  %1733 = vst [vmem:[%s2377_s25 + $0x60] sm:$0xff] %v1221_v51  ;;  %v1224_v60 = vadd.f32 %v2364_v2, %v710_v53  ;;  %v714_v61 = vmul.f32 %v2361_v0, %v200_v47  ;;  %v209_v10 = vld [vmem:[%s2359_s22 + $0xe0] sm:$0xff]  ;;  %v210_v11 = vld [vmem:[%s2359_s22 + $0xe8] sm:$0xff] }
  0x1c   : > { %1734 = vst [vmem:[%s2377_s25 + $0x68] sm:$0xff] %v1222_v52  ;;  %v715_v62 = vmul.f32 %v2361_v0, %v201_v48  ;;  %v716_v63 = vmul.f32 %v2361_v0, %v202_v49  ;;  %1735 = vst [vmem:[%s2377_s25 + $0x70] sm:$0xff] %v1223_v55  ;;  %v1225_v5 = vadd.f32 %v2364_v2, %v711_v56  ;;  %v211_v16 = vld [vmem:[%s2359_s22 + $0xf0] sm:$0xff]  ;;  %v212_v21 = vld [vmem:[%s2359_s22 + $0xf8] sm:$0xff] }
  0x1d   : > { %v1226_v6 = vadd.f32 %v2364_v2, %v712_v57  ;;  %v1227_v7 = vadd.f32 %v2364_v2, %v713_v58  ;;  %v717_v8 = vmul.f32 %v2361_v0, %v203_v54  ;;  %1736 = vst [vmem:[%s2377_s25 + $0x78] sm:$0xff] %v1224_v60  ;;  %v1228_v12 = vadd.f32 %v2364_v2, %v714_v61  ;;  %v213_v26 = vld [vmem:[%s2359_s22 + $0x100] sm:$0xff]  ;;  %v214_v27 = vld [vmem:[%s2359_s22 + $0x108] sm:$0xff]  ;;  %v215_v28 = vld [vmem:[%s2359_s22 + $0x110] sm:$0xff] }
  0x1e   : > { %v1229_v13 = vadd.f32 %v2364_v2, %v715_v62  ;;  %v1230_v14 = vadd.f32 %v2364_v2, %v716_v63  ;;  %v718_v15 = vmul.f32 %v2361_v0, %v204_v59  ;;  %1737 = vst [vmem:[%s2377_s25 + $0x80] sm:$0xff] %v1225_v5  ;;  %v719_v18 = vmul.f32 %v2361_v0, %v205_v1  ;;  %v216_v33 = vld [vmem:[%s2359_s22 + $0x118] sm:$0xff]  ;;  %v217_v34 = vld [vmem:[%s2359_s22 + $0x120] sm:$0xff]  ;;  %v218_v35 = vld [vmem:[%s2359_s22 + $0x128] sm:$0xff] }
  0x1f   : > { %1738 = vst [vmem:[%s2377_s25 + $0x88] sm:$0xff] %v1226_v6  ;;  %1739 = vst [vmem:[%s2377_s25 + $0x90] sm:$0xff] %v1227_v7  ;;  %v1231_v17 = vadd.f32 %v2364_v2, %v717_v8  ;;  %v720_v19 = vmul.f32 %v2361_v0, %v206_v3  ;;  %v721_v20 = vmul.f32 %v2361_v0, %v207_v4  ;;  %v219_v40 = vld [vmem:[%s2359_s22 + $0x130] sm:$0xff]  ;;  %v220_v45 = vld [vmem:[%s2359_s22 + $0x138] sm:$0xff] }
  0x20   : > { %1740 = vst [vmem:[%s2377_s25 + $0x98] sm:$0xff] %v1228_v12  ;;  %1741 = vst [vmem:[%s2377_s25 + $0xa0] sm:$0xff] %v1229_v13  ;;  %v1232_v22 = vadd.f32 %v2364_v2, %v718_v15  ;;  %v722_v23 = vmul.f32 %v2361_v0, %v208_v9  ;;  %v723_v24 = vmul.f32 %v2361_v0, %v209_v10  ;;  %v221_v50 = vld [vmem:[%s2359_s22 + $0x140] sm:$0xff]  ;;  %v222_v51 = vld [vmem:[%s2359_s22 + $0x148] sm:$0xff] }
  0x21   : > { %1742 = vst [vmem:[%s2377_s25 + $0xa8] sm:$0xff] %v1230_v14  ;;  %v724_v25 = vmul.f32 %v2361_v0, %v210_v11  ;;  %1743 = vst [vmem:[%s2377_s25 + $0xb0] sm:$0xff] %v1231_v17  ;;  %v1233_v29 = vadd.f32 %v2364_v2, %v719_v18  ;;  %v1234_v30 = vadd.f32 %v2364_v2, %v720_v19  ;;  %v223_v52 = vld [vmem:[%s2359_s22 + $0x150] sm:$0xff]  ;;  %v224_v57 = vld [vmem:[%s2359_s22 + $0x158] sm:$0xff] }
  0x22   : > { %v1235_v31 = vadd.f32 %v2364_v2, %v721_v20  ;;  %v725_v32 = vmul.f32 %v2361_v0, %v211_v16  ;;  %1744 = vst [vmem:[%s2377_s25 + $0xb8] sm:$0xff] %v1232_v22  ;;  %v1236_v36 = vadd.f32 %v2364_v2, %v722_v23  ;;  %v1237_v37 = vadd.f32 %v2364_v2, %v723_v24  ;;  %v225_v58 = vld [vmem:[%s2359_s22 + $0x160] sm:$0xff]  ;;  %v226_v59 = vld [vmem:[%s2359_s22 + $0x168] sm:$0xff]  ;;  %v227_v1 = vld [vmem:[%s2359_s22 + $0x170] sm:$0xff] }
  0x23   : > { %v1238_v38 = vadd.f32 %v2364_v2, %v724_v25  ;;  %v726_v39 = vmul.f32 %v2361_v0, %v212_v21  ;;  %1745 = vst [vmem:[%s2377_s25 + $0xc0] sm:$0xff] %v1233_v29  ;;  %1746 = vst [vmem:[%s2377_s25 + $0xc8] sm:$0xff] %v1234_v30  ;;  %v727_v42 = vmul.f32 %v2361_v0, %v213_v26  ;;  %v228_v7 = vld [vmem:[%s2359_s22 + $0x178] sm:$0xff]  ;;  %v229_v12 = vld [vmem:[%s2359_s22 + $0x180] sm:$0xff] }
  0x24   : > { %1747 = vst [vmem:[%s2377_s25 + $0xd0] sm:$0xff] %v1235_v31  ;;  %v1239_v41 = vadd.f32 %v2364_v2, %v725_v32  ;;  %v728_v43 = vmul.f32 %v2361_v0, %v214_v27  ;;  %v729_v44 = vmul.f32 %v2361_v0, %v215_v28  ;;  %1748 = vst [vmem:[%s2377_s25 + $0xd8] sm:$0xff] %v1236_v36  ;;  %v230_v13 = vld [vmem:[%s2359_s22 + $0x188] sm:$0xff]  ;;  %v231_v14 = vld [vmem:[%s2359_s22 + $0x190] sm:$0xff] }
  0x25   : > { %1749 = vst [vmem:[%s2377_s25 + $0xe0] sm:$0xff] %v1237_v37  ;;  %1750 = vst [vmem:[%s2377_s25 + $0xe8] sm:$0xff] %v1238_v38  ;;  %v1240_v46 = vadd.f32 %v2364_v2, %v726_v39  ;;  %v730_v47 = vmul.f32 %v2361_v0, %v216_v33  ;;  %v731_v48 = vmul.f32 %v2361_v0, %v217_v34  ;;  %v232_v19 = vld [vmem:[%s2359_s22 + $0x198] sm:$0xff]  ;;  %v233_v20 = vld [vmem:[%s2359_s22 + $0x1a0] sm:$0xff] }
  0x26   : > { %v732_v49 = vmul.f32 %v2361_v0, %v218_v35  ;;  %1751 = vst [vmem:[%s2377_s25 + $0xf0] sm:$0xff] %v1239_v41  ;;  %v1241_v53 = vadd.f32 %v2364_v2, %v727_v42  ;;  %v1242_v54 = vadd.f32 %v2364_v2, %v728_v43  ;;  %v1243_v55 = vadd.f32 %v2364_v2, %v729_v44  ;;  %v234_v21 = vld [vmem:[%s2359_s22 + $0x1a8] sm:$0xff]  ;;  %v235_v26 = vld [vmem:[%s2359_s22 + $0x1b0] sm:$0xff]  ;;  %v236_v31 = vld [vmem:[%s2359_s22 + $0x1b8] sm:$0xff] }
  0x27   : > { %v733_v56 = vmul.f32 %v2361_v0, %v219_v40  ;;  %1752 = vst [vmem:[%s2377_s25 + $0xf8] sm:$0xff] %v1240_v46  ;;  %v1244_v60 = vadd.f32 %v2364_v2, %v730_v47  ;;  %v1245_v61 = vadd.f32 %v2364_v2, %v731_v48  ;;  %v734_v63 = vmul.f32 %v2361_v0, %v220_v45  ;;  %v237_v36 = vld [vmem:[%s2359_s22 + $0x1c0] sm:$0xff]  ;;  %v238_v37 = vld [vmem:[%s2359_s22 + $0x1c8] sm:$0xff]  ;;  %v239_v38 = vld [vmem:[%s2359_s22 + $0x1d0] sm:$0xff] }
  0x28   : > { %v1246_v62 = vadd.f32 %v2364_v2, %v732_v49  ;;  %1753 = vst [vmem:[%s2377_s25 + $0x100] sm:$0xff] %v1241_v53  ;;  %1754 = vst [vmem:[%s2377_s25 + $0x108] sm:$0xff] %v1242_v54  ;;  %v735_v4 = vmul.f32 %v2361_v0, %v221_v50  ;;  %v736_v5 = vmul.f32 %v2361_v0, %v222_v51  ;;  %v240_v43 = vld [vmem:[%s2359_s22 + $0x1d8] sm:$0xff]  ;;  %v241_v44 = vld [vmem:[%s2359_s22 + $0x1e0] sm:$0xff] }
  0x29   : > { %1755 = vst [vmem:[%s2377_s25 + $0x110] sm:$0xff] %v1243_v55  ;;  %v1247_v3 = vadd.f32 %v2364_v2, %v733_v56  ;;  %v737_v6 = vmul.f32 %v2361_v0, %v223_v52  ;;  %1756 = vst [vmem:[%s2377_s25 + $0x118] sm:$0xff] %v1244_v60  ;;  %v1248_v8 = vadd.f32 %v2364_v2, %v734_v63  ;;  %v242_v45 = vld [vmem:[%s2359_s22 + $0x1e8] sm:$0xff]  ;;  %v243_v50 = vld [vmem:[%s2359_s22 + $0x1f0] sm:$0xff] }
  0x2a   : > { %1757 = vst [vmem:[%s2377_s25 + $0x120] sm:$0xff] %v1245_v61  ;;  %1758 = vst [vmem:[%s2377_s25 + $0x128] sm:$0xff] %v1246_v62  ;;  %v738_v9 = vmul.f32 %v2361_v0, %v224_v57  ;;  %v739_v10 = vmul.f32 %v2361_v0, %v225_v58  ;;  %v740_v11 = vmul.f32 %v2361_v0, %v226_v59  ;;  %v244_v55 = vld [vmem:[%s2359_s22 + $0x1f8] sm:$0xff]  ;;  %v245_v60 = vld [vmem:[%s2359_s22 + $0x200] sm:$0xff] }
  0x2b   : > { %1759 = vst [vmem:[%s2377_s25 + $0x130] sm:$0xff] %v1247_v3  ;;  %v1249_v15 = vadd.f32 %v2364_v2, %v735_v4  ;;  %v1250_v16 = vadd.f32 %v2364_v2, %v736_v5  ;;  %v1251_v17 = vadd.f32 %v2364_v2, %v737_v6  ;;  %v741_v18 = vmul.f32 %v2361_v0, %v227_v1  ;;  %v246_v61 = vld [vmem:[%s2359_s22 + $0x208] sm:$0xff]  ;;  %v247_v62 = vld [vmem:[%s2359_s22 + $0x210] sm:$0xff]  ;;  %v248_v5 = vld [vmem:[%s2359_s22 + $0x218] sm:$0xff] }
  0x2c   : > { %1760 = vst [vmem:[%s2377_s25 + $0x138] sm:$0xff] %v1248_v8  ;;  %v1252_v22 = vadd.f32 %v2364_v2, %v738_v9  ;;  %v1253_v23 = vadd.f32 %v2364_v2, %v739_v10  ;;  %v1254_v24 = vadd.f32 %v2364_v2, %v740_v11  ;;  %v742_v25 = vmul.f32 %v2361_v0, %v228_v7  ;;  %v249_v6 = vld [vmem:[%s2359_s22 + $0x220] sm:$0xff]  ;;  %v250_v7 = vld [vmem:[%s2359_s22 + $0x228] sm:$0xff] }
  0x2d   : > { %1761 = vst [vmem:[%s2377_s25 + $0x140] sm:$0xff] %v1249_v15  ;;  %1762 = vst [vmem:[%s2377_s25 + $0x148] sm:$0xff] %v1250_v16  ;;  %v1255_v27 = vadd.f32 %v2364_v2, %v741_v18  ;;  %v743_v28 = vmul.f32 %v2361_v0, %v229_v12  ;;  %v744_v29 = vmul.f32 %v2361_v0, %v230_v13  ;;  %v251_v12 = vld [vmem:[%s2359_s22 + $0x230] sm:$0xff] }
  0x2e   : > { %1763 = vst [vmem:[%s2377_s25 + $0x150] sm:$0xff] %v1251_v17  ;;  %v745_v30 = vmul.f32 %v2361_v0, %v231_v14  ;;  %1764 = vst [vmem:[%s2377_s25 + $0x158] sm:$0xff] %v1252_v22  ;;  %v1256_v32 = vadd.f32 %v2364_v2, %v742_v25  ;;  %v746_v33 = vmul.f32 %v2361_v0, %v232_v19  ;;  %v252_v17 = vld [vmem:[%s2359_s22 + $0x238] sm:$0xff]  ;;  %v253_v22 = vld [vmem:[%s2359_s22 + $0x240] sm:$0xff] }
  0x2f   : > { %1765 = vst [vmem:[%s2377_s25 + $0x160] sm:$0xff] %v1253_v23  ;;  %1766 = vst [vmem:[%s2377_s25 + $0x168] sm:$0xff] %v1254_v24  ;;  %v747_v34 = vmul.f32 %v2361_v0, %v233_v20  ;;  %v748_v35 = vmul.f32 %v2361_v0, %v234_v21  ;;  %v1257_v39 = vadd.f32 %v2364_v2, %v743_v28  ;;  %v254_v23 = vld [vmem:[%s2359_s22 + $0x248] sm:$0xff]  ;;  %v255_v24 = vld [vmem:[%s2359_s22 + $0x250] sm:$0xff] }
  0x30   : > { %1767 = vst [vmem:[%s2377_s25 + $0x170] sm:$0xff] %v1255_v27  ;;  %v1258_v40 = vadd.f32 %v2364_v2, %v744_v29  ;;  %v1259_v41 = vadd.f32 %v2364_v2, %v745_v30  ;;  %v749_v42 = vmul.f32 %v2361_v0, %v235_v26  ;;  %1768 = vst [vmem:[%s2377_s25 + $0x178] sm:$0xff] %v1256_v32  ;;  %v256_v29 = vld [vmem:[%s2359_s22 + $0x258] sm:$0xff]  ;;  %v257_v30 = vld [vmem:[%s2359_s22 + $0x260] sm:$0xff] }
  0x31   : > { %v1260_v46 = vadd.f32 %v2364_v2, %v746_v33  ;;  %v1261_v47 = vadd.f32 %v2364_v2, %v747_v34  ;;  %v1262_v48 = vadd.f32 %v2364_v2, %v748_v35  ;;  %v750_v49 = vmul.f32 %v2361_v0, %v236_v31  ;;  %1769 = vst [vmem:[%s2377_s25 + $0x180] sm:$0xff] %v1257_v39  ;;  %v258_v31 = vld [vmem:[%s2359_s22 + $0x268] sm:$0xff] }
  0x32   : > { %1770 = vst [vmem:[%s2377_s25 + $0x188] sm:$0xff] %v1258_v40  ;;  %1771 = vst [vmem:[%s2377_s25 + $0x190] sm:$0xff] %v1259_v41  ;;  %v1263_v51 = vadd.f32 %v2364_v2, %v749_v42  ;;  %v751_v52 = vmul.f32 %v2361_v0, %v237_v36  ;;  %v752_v53 = vmul.f32 %v2361_v0, %v238_v37  ;;  %v259_v36 = vld [vmem:[%s2359_s22 + $0x270] sm:$0xff]  ;;  %v260_v41 = vld [vmem:[%s2359_s22 + $0x278] sm:$0xff] }
  0x33   : > { %v753_v54 = vmul.f32 %v2361_v0, %v239_v38  ;;  %1772 = vst [vmem:[%s2377_s25 + $0x198] sm:$0xff] %v1260_v46  ;;  %1773 = vst [vmem:[%s2377_s25 + $0x1a0] sm:$0xff] %v1261_v47  ;;  %v1264_v56 = vadd.f32 %v2364_v2, %v750_v49  ;;  %v754_v57 = vmul.f32 %v2361_v0, %v240_v43  ;;  %v261_v46 = vld [vmem:[%s2359_s22 + $0x280] sm:$0xff]  ;;  %v262_v47 = vld [vmem:[%s2359_s22 + $0x288] sm:$0xff] }
  0x34   : > { %1774 = vst [vmem:[%s2377_s25 + $0x1a8] sm:$0xff] %v1262_v48  ;;  %v755_v58 = vmul.f32 %v2361_v0, %v241_v44  ;;  %v756_v59 = vmul.f32 %v2361_v0, %v242_v45  ;;  %1775 = vst [vmem:[%s2377_s25 + $0x1b0] sm:$0xff] %v1263_v51  ;;  %v1265_v63 = vadd.f32 %v2364_v2, %v751_v52  ;;  %v263_v48 = vld [vmem:[%s2359_s22 + $0x290] sm:$0xff] }
  0x35   : > { %v1266_v1 = vadd.f32 %v2364_v2, %v752_v53  ;;  %v1267_v3 = vadd.f32 %v2364_v2, %v753_v54  ;;  %v757_v4 = vmul.f32 %v2361_v0, %v243_v50  ;;  %1776 = vst [vmem:[%s2377_s25 + $0x1b8] sm:$0xff] %v1264_v56  ;;  %v1268_v8 = vadd.f32 %v2364_v2, %v754_v57  ;;  %v264_v53 = vld [vmem:[%s2359_s22 + $0x298] sm:$0xff]  ;;  %v265_v54 = vld [vmem:[%s2359_s22 + $0x2a0] sm:$0xff] }
  0x36   : > { %v1269_v9 = vadd.f32 %v2364_v2, %v755_v58  ;;  %v1270_v10 = vadd.f32 %v2364_v2, %v756_v59  ;;  %v758_v11 = vmul.f32 %v2361_v0, %v244_v55  ;;  %1777 = vst [vmem:[%s2377_s25 + $0x1c0] sm:$0xff] %v1265_v63  ;;  %v759_v14 = vmul.f32 %v2361_v0, %v245_v60  ;;  %v266_v55 = vld [vmem:[%s2359_s22 + $0x2a8] sm:$0xff]  ;;  %v267_v60 = vld [vmem:[%s2359_s22 + $0x2b0] sm:$0xff] }
  0x37   : > { %1778 = vst [vmem:[%s2377_s25 + $0x1c8] sm:$0xff] %v1266_v1  ;;  %1779 = vst [vmem:[%s2377_s25 + $0x1d0] sm:$0xff] %v1267_v3  ;;  %v1271_v13 = vadd.f32 %v2364_v2, %v757_v4  ;;  %v760_v15 = vmul.f32 %v2361_v0, %v246_v61  ;;  %v761_v16 = vmul.f32 %v2361_v0, %v247_v62  ;;  %v268_v3 = vld [vmem:[%s2359_s22 + $0x2b8] sm:$0xff] }
  0x38   : > { %1780 = vst [vmem:[%s2377_s25 + $0x1d8] sm:$0xff] %v1268_v8  ;;  %1781 = vst [vmem:[%s2377_s25 + $0x1e0] sm:$0xff] %v1269_v9  ;;  %v1272_v18 = vadd.f32 %v2364_v2, %v758_v11  ;;  %v762_v19 = vmul.f32 %v2361_v0, %v248_v5  ;;  %v763_v20 = vmul.f32 %v2361_v0, %v249_v6  ;;  %v269_v8 = vld [vmem:[%s2359_s22 + $0x2c0] sm:$0xff]  ;;  %v270_v9 = vld [vmem:[%s2359_s22 + $0x2c8] sm:$0xff] }
  0x39   : > { %1782 = vst [vmem:[%s2377_s25 + $0x1e8] sm:$0xff] %v1270_v10  ;;  %v764_v21 = vmul.f32 %v2361_v0, %v250_v7  ;;  %1783 = vst [vmem:[%s2377_s25 + $0x1f0] sm:$0xff] %v1271_v13  ;;  %v1273_v25 = vadd.f32 %v2364_v2, %v759_v14  ;;  %v1274_v26 = vadd.f32 %v2364_v2, %v760_v15  ;;  %v271_v10 = vld [vmem:[%s2359_s22 + $0x2d0] sm:$0xff]  ;;  %v272_v15 = vld [vmem:[%s2359_s22 + $0x2d8] sm:$0xff] }
  0x3a   : > { %v1275_v27 = vadd.f32 %v2364_v2, %v761_v16  ;;  %v765_v28 = vmul.f32 %v2361_v0, %v251_v12  ;;  %1784 = vst [vmem:[%s2377_s25 + $0x1f8] sm:$0xff] %v1272_v18  ;;  %v1276_v32 = vadd.f32 %v2364_v2, %v762_v19  ;;  %v1277_v33 = vadd.f32 %v2364_v2, %v763_v20  ;;  %v273_v16 = vld [vmem:[%s2359_s22 + $0x2e0] sm:$0xff] }
  0x3b   : > { %v1278_v34 = vadd.f32 %v2364_v2, %v764_v21  ;;  %v766_v35 = vmul.f32 %v2361_v0, %v252_v17  ;;  %1785 = vst [vmem:[%s2377_s25 + $0x200] sm:$0xff] %v1273_v25  ;;  %1786 = vst [vmem:[%s2377_s25 + $0x208] sm:$0xff] %v1274_v26  ;;  %v767_v38 = vmul.f32 %v2361_v0, %v253_v22  ;;  %v274_v17 = vld [vmem:[%s2359_s22 + $0x2e8] sm:$0xff]  ;;  %v275_v22 = vld [vmem:[%s2359_s22 + $0x2f0] sm:$0xff] }
  0x3c   : > { %1787 = vst [vmem:[%s2377_s25 + $0x210] sm:$0xff] %v1275_v27  ;;  %v1279_v37 = vadd.f32 %v2364_v2, %v765_v28  ;;  %v768_v39 = vmul.f32 %v2361_v0, %v254_v23  ;;  %v769_v40 = vmul.f32 %v2361_v0, %v255_v24  ;;  %1788 = vst [vmem:[%s2377_s25 + $0x218] sm:$0xff] %v1276_v32  ;;  %v276_v27 = vld [vmem:[%s2359_s22 + $0x2f8] sm:$0xff]  ;;  %v277_v32 = vld [vmem:[%s2359_s22 + $0x300] sm:$0xff] }
  0x3d   : > { %1789 = vst [vmem:[%s2377_s25 + $0x220] sm:$0xff] %v1277_v33  ;;  %1790 = vst [vmem:[%s2377_s25 + $0x228] sm:$0xff] %v1278_v34  ;;  %v1280_v42 = vadd.f32 %v2364_v2, %v766_v35  ;;  %v770_v43 = vmul.f32 %v2361_v0, %v256_v29  ;;  %v771_v44 = vmul.f32 %v2361_v0, %v257_v30  ;;  %v278_v33 = vld [vmem:[%s2359_s22 + $0x308] sm:$0xff]  ;;  %v279_v34 = vld [vmem:[%s2359_s22 + $0x310] sm:$0xff] }
  0x3e   : > { %v772_v45 = vmul.f32 %v2361_v0, %v258_v31  ;;  %1791 = vst [vmem:[%s2377_s25 + $0x230] sm:$0xff] %v1279_v37  ;;  %v1281_v49 = vadd.f32 %v2364_v2, %v767_v38  ;;  %v1282_v50 = vadd.f32 %v2364_v2, %v768_v39  ;;  %v1283_v51 = vadd.f32 %v2364_v2, %v769_v40  ;;  %v280_v39 = vld [vmem:[%s2359_s22 + $0x318] sm:$0xff]  ;;  %v281_v40 = vld [vmem:[%s2359_s22 + $0x320] sm:$0xff] }
  0x3f   : > { %v773_v52 = vmul.f32 %v2361_v0, %v259_v36  ;;  %1792 = vst [vmem:[%s2377_s25 + $0x238] sm:$0xff] %v1280_v42  ;;  %v1284_v56 = vadd.f32 %v2364_v2, %v770_v43  ;;  %v1285_v57 = vadd.f32 %v2364_v2, %v771_v44  ;;  %v774_v59 = vmul.f32 %v2361_v0, %v260_v41  ;;  %v282_v41 = vld [vmem:[%s2359_s22 + $0x328] sm:$0xff] }
  0x40   : > { %v1286_v58 = vadd.f32 %v2364_v2, %v772_v45  ;;  %1793 = vst [vmem:[%s2377_s25 + $0x240] sm:$0xff] %v1281_v49  ;;  %1794 = vst [vmem:[%s2377_s25 + $0x248] sm:$0xff] %v1282_v50  ;;  %v775_v62 = vmul.f32 %v2361_v0, %v261_v46  ;;  %v776_v63 = vmul.f32 %v2361_v0, %v262_v47  ;;  %v283_v46 = vld [vmem:[%s2359_s22 + $0x330] sm:$0xff] }
  0x41   : > { %1795 = vst [vmem:[%s2377_s25 + $0x250] sm:$0xff] %v1283_v51  ;;  %v1287_v61 = vadd.f32 %v2364_v2, %v773_v52  ;;  %v777_v1 = vmul.f32 %v2361_v0, %v263_v48  ;;  %1796 = vst [vmem:[%s2377_s25 + $0x258] sm:$0xff] %v1284_v56  ;;  %v1288_v4 = vadd.f32 %v2364_v2, %v774_v59  ;;  %v284_v51 = vld [vmem:[%s2359_s22 + $0x338] sm:$0xff]  ;;  %v285_v56 = vld [vmem:[%s2359_s22 + $0x340] sm:$0xff] }
  0x42   : > { %1797 = vst [vmem:[%s2377_s25 + $0x260] sm:$0xff] %v1285_v57  ;;  %1798 = vst [vmem:[%s2377_s25 + $0x268] sm:$0xff] %v1286_v58  ;;  %v778_v5 = vmul.f32 %v2361_v0, %v264_v53  ;;  %v779_v6 = vmul.f32 %v2361_v0, %v265_v54  ;;  %v780_v7 = vmul.f32 %v2361_v0, %v266_v55  ;;  %v286_v57 = vld [vmem:[%s2359_s22 + $0x348] sm:$0xff]  ;;  %v287_v58 = vld [vmem:[%s2359_s22 + $0x350] sm:$0xff] }
  0x43   : > { %1799 = vst [vmem:[%s2377_s25 + $0x270] sm:$0xff] %v1287_v61  ;;  %v1289_v11 = vadd.f32 %v2364_v2, %v775_v62  ;;  %v1290_v12 = vadd.f32 %v2364_v2, %v776_v63  ;;  %v1291_v13 = vadd.f32 %v2364_v2, %v777_v1  ;;  %v781_v14 = vmul.f32 %v2361_v0, %v267_v60  ;;  %v288_v63 = vld [vmem:[%s2359_s22 + $0x358] sm:$0xff]  ;;  %v289_v1 = vld [vmem:[%s2359_s22 + $0x360] sm:$0xff] }
  0x44   : > { %1800 = vst [vmem:[%s2377_s25 + $0x278] sm:$0xff] %v1288_v4  ;;  %v1292_v18 = vadd.f32 %v2364_v2, %v778_v5  ;;  %v1293_v19 = vadd.f32 %v2364_v2, %v779_v6  ;;  %v1294_v20 = vadd.f32 %v2364_v2, %v780_v7  ;;  %v782_v21 = vmul.f32 %v2361_v0, %v268_v3  ;;  %v290_v3 = vld [vmem:[%s2359_s22 + $0x368] sm:$0xff] }
  0x45   : > { %1801 = vst [vmem:[%s2377_s25 + $0x280] sm:$0xff] %v1289_v11  ;;  %1802 = vst [vmem:[%s2377_s25 + $0x288] sm:$0xff] %v1290_v12  ;;  %v1295_v23 = vadd.f32 %v2364_v2, %v781_v14  ;;  %v783_v24 = vmul.f32 %v2361_v0, %v269_v8  ;;  %v784_v25 = vmul.f32 %v2361_v0, %v270_v9  ;;  %v291_v8 = vld [vmem:[%s2359_s22 + $0x370] sm:$0xff] }
  0x46   : > { %1803 = vst [vmem:[%s2377_s25 + $0x290] sm:$0xff] %v1291_v13  ;;  %v785_v26 = vmul.f32 %v2361_v0, %v271_v10  ;;  %1804 = vst [vmem:[%s2377_s25 + $0x298] sm:$0xff] %v1292_v18  ;;  %v1296_v28 = vadd.f32 %v2364_v2, %v782_v21  ;;  %v786_v29 = vmul.f32 %v2361_v0, %v272_v15  ;;  %v292_v13 = vld [vmem:[%s2359_s22 + $0x378] sm:$0xff]  ;;  %v293_v18 = vld [vmem:[%s2359_s22 + $0x380] sm:$0xff] }
  0x47   : > { %1805 = vst [vmem:[%s2377_s25 + $0x2a0] sm:$0xff] %v1293_v19  ;;  %1806 = vst [vmem:[%s2377_s25 + $0x2a8] sm:$0xff] %v1294_v20  ;;  %v787_v30 = vmul.f32 %v2361_v0, %v273_v16  ;;  %v788_v31 = vmul.f32 %v2361_v0, %v274_v17  ;;  %v1297_v35 = vadd.f32 %v2364_v2, %v783_v24  ;;  %v294_v19 = vld [vmem:[%s2359_s22 + $0x388] sm:$0xff]  ;;  %v295_v20 = vld [vmem:[%s2359_s22 + $0x390] sm:$0xff] }
  0x48   : > { %1807 = vst [vmem:[%s2377_s25 + $0x2b0] sm:$0xff] %v1295_v23  ;;  %v1298_v36 = vadd.f32 %v2364_v2, %v784_v25  ;;  %v1299_v37 = vadd.f32 %v2364_v2, %v785_v26  ;;  %v789_v38 = vmul.f32 %v2361_v0, %v275_v22  ;;  %1808 = vst [vmem:[%s2377_s25 + $0x2b8] sm:$0xff] %v1296_v28  ;;  %v296_v25 = vld [vmem:[%s2359_s22 + $0x398] sm:$0xff]  ;;  %v297_v26 = vld [vmem:[%s2359_s22 + $0x3a0] sm:$0xff] }
  0x49   : > { %v1300_v42 = vadd.f32 %v2364_v2, %v786_v29  ;;  %v1301_v43 = vadd.f32 %v2364_v2, %v787_v30  ;;  %v1302_v44 = vadd.f32 %v2364_v2, %v788_v31  ;;  %v790_v45 = vmul.f32 %v2361_v0, %v276_v27  ;;  %1809 = vst [vmem:[%s2377_s25 + $0x2c0] sm:$0xff] %v1297_v35  ;;  %v298_v27 = vld [vmem:[%s2359_s22 + $0x3a8] sm:$0xff] }
  0x4a   : > { %1810 = vst [vmem:[%s2377_s25 + $0x2c8] sm:$0xff] %v1298_v36  ;;  %1811 = vst [vmem:[%s2377_s25 + $0x2d0] sm:$0xff] %v1299_v37  ;;  %v1303_v47 = vadd.f32 %v2364_v2, %v789_v38  ;;  %v791_v48 = vmul.f32 %v2361_v0, %v277_v32  ;;  %v792_v49 = vmul.f32 %v2361_v0, %v278_v33  ;;  %v299_v32 = vld [vmem:[%s2359_s22 + $0x3b0] sm:$0xff]  ;;  %v300_v37 = vld [vmem:[%s2359_s22 + $0x3b8] sm:$0xff] }
  0x4b   : > { %v793_v50 = vmul.f32 %v2361_v0, %v279_v34  ;;  %1812 = vst [vmem:[%s2377_s25 + $0x2d8] sm:$0xff] %v1300_v42  ;;  %1813 = vst [vmem:[%s2377_s25 + $0x2e0] sm:$0xff] %v1301_v43  ;;  %v1304_v52 = vadd.f32 %v2364_v2, %v790_v45  ;;  %v794_v53 = vmul.f32 %v2361_v0, %v280_v39  ;;  %v301_v42 = vld [vmem:[%s2359_s22 + $0x3c0] sm:$0xff]  ;;  %v302_v43 = vld [vmem:[%s2359_s22 + $0x3c8] sm:$0xff] }
  0x4c   : > { %1814 = vst [vmem:[%s2377_s25 + $0x2e8] sm:$0xff] %v1302_v44  ;;  %v795_v54 = vmul.f32 %v2361_v0, %v281_v40  ;;  %v796_v55 = vmul.f32 %v2361_v0, %v282_v41  ;;  %1815 = vst [vmem:[%s2377_s25 + $0x2f0] sm:$0xff] %v1303_v47  ;;  %v1305_v59 = vadd.f32 %v2364_v2, %v791_v48  ;;  %v303_v44 = vld [vmem:[%s2359_s22 + $0x3d0] sm:$0xff] }
  0x4d   : > { %v1306_v60 = vadd.f32 %v2364_v2, %v792_v49  ;;  %v1307_v61 = vadd.f32 %v2364_v2, %v793_v50  ;;  %v797_v62 = vmul.f32 %v2361_v0, %v283_v46  ;;  %1816 = vst [vmem:[%s2377_s25 + $0x2f8] sm:$0xff] %v1304_v52  ;;  %v1308_v4 = vadd.f32 %v2364_v2, %v794_v53  ;;  %v304_v49 = vld [vmem:[%s2359_s22 + $0x3d8] sm:$0xff]  ;;  %v305_v50 = vld [vmem:[%s2359_s22 + $0x3e0] sm:$0xff] }
  0x4e   : > { %v1309_v5 = vadd.f32 %v2364_v2, %v795_v54  ;;  %v1310_v6 = vadd.f32 %v2364_v2, %v796_v55  ;;  %v798_v7 = vmul.f32 %v2361_v0, %v284_v51  ;;  %1817 = vst [vmem:[%s2377_s25 + $0x300] sm:$0xff] %v1305_v59  ;;  %v799_v10 = vmul.f32 %v2361_v0, %v285_v56  ;;  %v306_v51 = vld [vmem:[%s2359_s22 + $0x3e8] sm:$0xff]  ;;  %v307_v56 = vld [vmem:[%s2359_s22 + $0x3f0] sm:$0xff] }
  0x4f   : > { %1818 = vst [vmem:[%s2377_s25 + $0x308] sm:$0xff] %v1306_v60  ;;  %1819 = vst [vmem:[%s2377_s25 + $0x310] sm:$0xff] %v1307_v61  ;;  %v1311_v9 = vadd.f32 %v2364_v2, %v797_v62  ;;  %v800_v11 = vmul.f32 %v2361_v0, %v286_v57  ;;  %v801_v12 = vmul.f32 %v2361_v0, %v287_v58  ;;  %v308_v61 = vld [vmem:[%s2359_s22 + $0x3f8] sm:$0xff] }
  0x50   : > { %1820 = vst [vmem:[%s2377_s25 + $0x318] sm:$0xff] %v1308_v4  ;;  %1821 = vst [vmem:[%s2377_s25 + $0x320] sm:$0xff] %v1309_v5  ;;  %v1312_v14 = vadd.f32 %v2364_v2, %v798_v7  ;;  %v802_v15 = vmul.f32 %v2361_v0, %v288_v63  ;;  %v803_v16 = vmul.f32 %v2361_v0, %v289_v1  ;;  %v309_v4 = vld [vmem:[%s2359_s22 + $0x400] sm:$0xff]  ;;  %v310_v5 = vld [vmem:[%s2359_s22 + $0x408] sm:$0xff] }
  0x51   : > { %1822 = vst [vmem:[%s2377_s25 + $0x328] sm:$0xff] %v1310_v6  ;;  %v804_v17 = vmul.f32 %v2361_v0, %v290_v3  ;;  %1823 = vst [vmem:[%s2377_s25 + $0x330] sm:$0xff] %v1311_v9  ;;  %v1313_v21 = vadd.f32 %v2364_v2, %v799_v10  ;;  %v1314_v22 = vadd.f32 %v2364_v2, %v800_v11  ;;  %v311_v6 = vld [vmem:[%s2359_s22 + $0x410] sm:$0xff]  ;;  %v312_v11 = vld [vmem:[%s2359_s22 + $0x418] sm:$0xff] }
  0x52   : > { %v1315_v23 = vadd.f32 %v2364_v2, %v801_v12  ;;  %v805_v24 = vmul.f32 %v2361_v0, %v291_v8  ;;  %1824 = vst [vmem:[%s2377_s25 + $0x338] sm:$0xff] %v1312_v14  ;;  %v1316_v28 = vadd.f32 %v2364_v2, %v802_v15  ;;  %v1317_v29 = vadd.f32 %v2364_v2, %v803_v16  ;;  %v313_v12 = vld [vmem:[%s2359_s22 + $0x420] sm:$0xff] }
  0x53   : > { %v1318_v30 = vadd.f32 %v2364_v2, %v804_v17  ;;  %v806_v31 = vmul.f32 %v2361_v0, %v292_v13  ;;  %1825 = vst [vmem:[%s2377_s25 + $0x340] sm:$0xff] %v1313_v21  ;;  %1826 = vst [vmem:[%s2377_s25 + $0x348] sm:$0xff] %v1314_v22  ;;  %v807_v34 = vmul.f32 %v2361_v0, %v293_v18  ;;  %v314_v13 = vld [vmem:[%s2359_s22 + $0x428] sm:$0xff]  ;;  %v315_v18 = vld [vmem:[%s2359_s22 + $0x430] sm:$0xff] }
  0x54   : > { %1827 = vst [vmem:[%s2377_s25 + $0x350] sm:$0xff] %v1315_v23  ;;  %v1319_v33 = vadd.f32 %v2364_v2, %v805_v24  ;;  %v808_v35 = vmul.f32 %v2361_v0, %v294_v19  ;;  %v809_v36 = vmul.f32 %v2361_v0, %v295_v20  ;;  %1828 = vst [vmem:[%s2377_s25 + $0x358] sm:$0xff] %v1316_v28  ;;  %v316_v23 = vld [vmem:[%s2359_s22 + $0x438] sm:$0xff]  ;;  %v317_v28 = vld [vmem:[%s2359_s22 + $0x440] sm:$0xff] }
  0x55   : > { %1829 = vst [vmem:[%s2377_s25 + $0x360] sm:$0xff] %v1317_v29  ;;  %1830 = vst [vmem:[%s2377_s25 + $0x368] sm:$0xff] %v1318_v30  ;;  %v1320_v38 = vadd.f32 %v2364_v2, %v806_v31  ;;  %v810_v39 = vmul.f32 %v2361_v0, %v296_v25  ;;  %v811_v40 = vmul.f32 %v2361_v0, %v297_v26  ;;  %v318_v29 = vld [vmem:[%s2359_s22 + $0x448] sm:$0xff]  ;;  %v319_v30 = vld [vmem:[%s2359_s22 + $0x450] sm:$0xff] }
  0x56   : > { %v812_v41 = vmul.f32 %v2361_v0, %v298_v27  ;;  %1831 = vst [vmem:[%s2377_s25 + $0x370] sm:$0xff] %v1319_v33  ;;  %v1321_v45 = vadd.f32 %v2364_v2, %v807_v34  ;;  %v1322_v46 = vadd.f32 %v2364_v2, %v808_v35  ;;  %v1323_v47 = vadd.f32 %v2364_v2, %v809_v36  ;;  %v320_v35 = vld [vmem:[%s2359_s22 + $0x458] sm:$0xff]  ;;  %v321_v36 = vld [vmem:[%s2359_s22 + $0x460] sm:$0xff] }
  0x57   : > { %v813_v48 = vmul.f32 %v2361_v0, %v299_v32  ;;  %1832 = vst [vmem:[%s2377_s25 + $0x378] sm:$0xff] %v1320_v38  ;;  %v1324_v52 = vadd.f32 %v2364_v2, %v810_v39  ;;  %v1325_v53 = vadd.f32 %v2364_v2, %v811_v40  ;;  %v814_v55 = vmul.f32 %v2361_v0, %v300_v37  ;;  %v322_v37 = vld [vmem:[%s2359_s22 + $0x468] sm:$0xff] }
  0x58   : > { %v1326_v54 = vadd.f32 %v2364_v2, %v812_v41  ;;  %1833 = vst [vmem:[%s2377_s25 + $0x380] sm:$0xff] %v1321_v45  ;;  %1834 = vst [vmem:[%s2377_s25 + $0x388] sm:$0xff] %v1322_v46  ;;  %v815_v58 = vmul.f32 %v2361_v0, %v301_v42  ;;  %v816_v59 = vmul.f32 %v2361_v0, %v302_v43  ;;  %v323_v42 = vld [vmem:[%s2359_s22 + $0x470] sm:$0xff] }
  0x59   : > { %1835 = vst [vmem:[%s2377_s25 + $0x390] sm:$0xff] %v1323_v47  ;;  %v1327_v57 = vadd.f32 %v2364_v2, %v813_v48  ;;  %v817_v60 = vmul.f32 %v2361_v0, %v303_v44  ;;  %1836 = vst [vmem:[%s2377_s25 + $0x398] sm:$0xff] %v1324_v52  ;;  %v1328_v62 = vadd.f32 %v2364_v2, %v814_v55  ;;  %v324_v47 = vld [vmem:[%s2359_s22 + $0x478] sm:$0xff]  ;;  %v325_v52 = vld [vmem:[%s2359_s22 + $0x480] sm:$0xff] }
  0x5a   : > { %1837 = vst [vmem:[%s2377_s25 + $0x3a0] sm:$0xff] %v1325_v53  ;;  %1838 = vst [vmem:[%s2377_s25 + $0x3a8] sm:$0xff] %v1326_v54  ;;  %v818_v63 = vmul.f32 %v2361_v0, %v304_v49  ;;  %v819_v1 = vmul.f32 %v2361_v0, %v305_v50  ;;  %v820_v3 = vmul.f32 %v2361_v0, %v306_v51  ;;  %v326_v53 = vld [vmem:[%s2359_s22 + $0x488] sm:$0xff]  ;;  %v327_v54 = vld [vmem:[%s2359_s22 + $0x490] sm:$0xff] }
  0x5b   : > { %1839 = vst [vmem:[%s2377_s25 + $0x3b0] sm:$0xff] %v1327_v57  ;;  %v1329_v7 = vadd.f32 %v2364_v2, %v815_v58  ;;  %v1330_v8 = vadd.f32 %v2364_v2, %v816_v59  ;;  %v1331_v9 = vadd.f32 %v2364_v2, %v817_v60  ;;  %v821_v10 = vmul.f32 %v2361_v0, %v307_v56  ;;  %v328_v59 = vld [vmem:[%s2359_s22 + $0x498] sm:$0xff]  ;;  %v329_v60 = vld [vmem:[%s2359_s22 + $0x4a0] sm:$0xff] }
  0x5c   : > { %1840 = vst [vmem:[%s2377_s25 + $0x3b8] sm:$0xff] %v1328_v62  ;;  %v1332_v14 = vadd.f32 %v2364_v2, %v818_v63  ;;  %v1333_v15 = vadd.f32 %v2364_v2, %v819_v1  ;;  %v1334_v16 = vadd.f32 %v2364_v2, %v820_v3  ;;  %v822_v17 = vmul.f32 %v2361_v0, %v308_v61  ;;  %v330_v61 = vld [vmem:[%s2359_s22 + $0x4a8] sm:$0xff] }
  0x5d   : > { %1841 = vst [vmem:[%s2377_s25 + $0x3c0] sm:$0xff] %v1329_v7  ;;  %1842 = vst [vmem:[%s2377_s25 + $0x3c8] sm:$0xff] %v1330_v8  ;;  %v1335_v19 = vadd.f32 %v2364_v2, %v821_v10  ;;  %v823_v20 = vmul.f32 %v2361_v0, %v309_v4  ;;  %v824_v21 = vmul.f32 %v2361_v0, %v310_v5  ;;  %v331_v4 = vld [vmem:[%s2359_s22 + $0x4b0] sm:$0xff] }
  0x5e   : > { %1843 = vst [vmem:[%s2377_s25 + $0x3d0] sm:$0xff] %v1331_v9  ;;  %v825_v22 = vmul.f32 %v2361_v0, %v311_v6  ;;  %1844 = vst [vmem:[%s2377_s25 + $0x3d8] sm:$0xff] %v1332_v14  ;;  %v1336_v24 = vadd.f32 %v2364_v2, %v822_v17  ;;  %v826_v25 = vmul.f32 %v2361_v0, %v312_v11  ;;  %v332_v9 = vld [vmem:[%s2359_s22 + $0x4b8] sm:$0xff]  ;;  %v333_v14 = vld [vmem:[%s2359_s22 + $0x4c0] sm:$0xff] }
  0x5f   : > { %1845 = vst [vmem:[%s2377_s25 + $0x3e0] sm:$0xff] %v1333_v15  ;;  %1846 = vst [vmem:[%s2377_s25 + $0x3e8] sm:$0xff] %v1334_v16  ;;  %v827_v26 = vmul.f32 %v2361_v0, %v313_v12  ;;  %v828_v27 = vmul.f32 %v2361_v0, %v314_v13  ;;  %v1337_v31 = vadd.f32 %v2364_v2, %v823_v20  ;;  %v334_v15 = vld [vmem:[%s2359_s22 + $0x4c8] sm:$0xff]  ;;  %v335_v16 = vld [vmem:[%s2359_s22 + $0x4d0] sm:$0xff] }
  0x60   : > { %1847 = vst [vmem:[%s2377_s25 + $0x3f0] sm:$0xff] %v1335_v19  ;;  %v1338_v32 = vadd.f32 %v2364_v2, %v824_v21  ;;  %v1339_v33 = vadd.f32 %v2364_v2, %v825_v22  ;;  %v829_v34 = vmul.f32 %v2361_v0, %v315_v18  ;;  %1848 = vst [vmem:[%s2377_s25 + $0x3f8] sm:$0xff] %v1336_v24  ;;  %v336_v21 = vld [vmem:[%s2359_s22 + $0x4d8] sm:$0xff]  ;;  %v337_v22 = vld [vmem:[%s2359_s22 + $0x4e0] sm:$0xff] }
  0x61   : > { %v1340_v38 = vadd.f32 %v2364_v2, %v826_v25  ;;  %v1341_v39 = vadd.f32 %v2364_v2, %v827_v26  ;;  %v1342_v40 = vadd.f32 %v2364_v2, %v828_v27  ;;  %v830_v41 = vmul.f32 %v2361_v0, %v316_v23  ;;  %1849 = vst [vmem:[%s2377_s25 + $0x400] sm:$0xff] %v1337_v31  ;;  %v338_v23 = vld [vmem:[%s2359_s22 + $0x4e8] sm:$0xff] }
  0x62   : > { %1850 = vst [vmem:[%s2377_s25 + $0x408] sm:$0xff] %v1338_v32  ;;  %1851 = vst [vmem:[%s2377_s25 + $0x410] sm:$0xff] %v1339_v33  ;;  %v1343_v43 = vadd.f32 %v2364_v2, %v829_v34  ;;  %v831_v44 = vmul.f32 %v2361_v0, %v317_v28  ;;  %v832_v45 = vmul.f32 %v2361_v0, %v318_v29  ;;  %v339_v28 = vld [vmem:[%s2359_s22 + $0x4f0] sm:$0xff]  ;;  %v340_v33 = vld [vmem:[%s2359_s22 + $0x4f8] sm:$0xff] }
  0x63   : > { %v833_v46 = vmul.f32 %v2361_v0, %v319_v30  ;;  %1852 = vst [vmem:[%s2377_s25 + $0x418] sm:$0xff] %v1340_v38  ;;  %1853 = vst [vmem:[%s2377_s25 + $0x420] sm:$0xff] %v1341_v39  ;;  %v1344_v48 = vadd.f32 %v2364_v2, %v830_v41  ;;  %v834_v49 = vmul.f32 %v2361_v0, %v320_v35  ;;  %v341_v38 = vld [vmem:[%s2359_s22 + $0x500] sm:$0xff]  ;;  %v342_v39 = vld [vmem:[%s2359_s22 + $0x508] sm:$0xff] }
  0x64   : > { %1854 = vst [vmem:[%s2377_s25 + $0x428] sm:$0xff] %v1342_v40  ;;  %v835_v50 = vmul.f32 %v2361_v0, %v321_v36  ;;  %v836_v51 = vmul.f32 %v2361_v0, %v322_v37  ;;  %1855 = vst [vmem:[%s2377_s25 + $0x430] sm:$0xff] %v1343_v43  ;;  %v1345_v55 = vadd.f32 %v2364_v2, %v831_v44  ;;  %v343_v40 = vld [vmem:[%s2359_s22 + $0x510] sm:$0xff] }
  0x65   : > { %v1346_v56 = vadd.f32 %v2364_v2, %v832_v45  ;;  %v1347_v57 = vadd.f32 %v2364_v2, %v833_v46  ;;  %v837_v58 = vmul.f32 %v2361_v0, %v323_v42  ;;  %1856 = vst [vmem:[%s2377_s25 + $0x438] sm:$0xff] %v1344_v48  ;;  %v1348_v62 = vadd.f32 %v2364_v2, %v834_v49  ;;  %v344_v45 = vld [vmem:[%s2359_s22 + $0x518] sm:$0xff]  ;;  %v345_v46 = vld [vmem:[%s2359_s22 + $0x520] sm:$0xff] }
  0x66   : > { %v1349_v63 = vadd.f32 %v2364_v2, %v835_v50  ;;  %v1350_v1 = vadd.f32 %v2364_v2, %v836_v51  ;;  %v838_v3 = vmul.f32 %v2361_v0, %v324_v47  ;;  %1857 = vst [vmem:[%s2377_s25 + $0x440] sm:$0xff] %v1345_v55  ;;  %v839_v6 = vmul.f32 %v2361_v0, %v325_v52  ;;  %v346_v47 = vld [vmem:[%s2359_s22 + $0x528] sm:$0xff]  ;;  %v347_v52 = vld [vmem:[%s2359_s22 + $0x530] sm:$0xff] }
  0x67   : > { %1858 = vst [vmem:[%s2377_s25 + $0x448] sm:$0xff] %v1346_v56  ;;  %1859 = vst [vmem:[%s2377_s25 + $0x450] sm:$0xff] %v1347_v57  ;;  %v1351_v5 = vadd.f32 %v2364_v2, %v837_v58  ;;  %v840_v7 = vmul.f32 %v2361_v0, %v326_v53  ;;  %v841_v8 = vmul.f32 %v2361_v0, %v327_v54  ;;  %v348_v57 = vld [vmem:[%s2359_s22 + $0x538] sm:$0xff] }
  0x68   : > { %1860 = vst [vmem:[%s2377_s25 + $0x458] sm:$0xff] %v1348_v62  ;;  %1861 = vst [vmem:[%s2377_s25 + $0x460] sm:$0xff] %v1349_v63  ;;  %v1352_v10 = vadd.f32 %v2364_v2, %v838_v3  ;;  %v842_v11 = vmul.f32 %v2361_v0, %v328_v59  ;;  %v843_v12 = vmul.f32 %v2361_v0, %v329_v60  ;;  %v349_v62 = vld [vmem:[%s2359_s22 + $0x540] sm:$0xff]  ;;  %v350_v63 = vld [vmem:[%s2359_s22 + $0x548] sm:$0xff] }
  0x69   : > { %1862 = vst [vmem:[%s2377_s25 + $0x468] sm:$0xff] %v1350_v1  ;;  %v844_v13 = vmul.f32 %v2361_v0, %v330_v61  ;;  %1863 = vst [vmem:[%s2377_s25 + $0x470] sm:$0xff] %v1351_v5  ;;  %v1353_v17 = vadd.f32 %v2364_v2, %v839_v6  ;;  %v1354_v18 = vadd.f32 %v2364_v2, %v840_v7  ;;  %v351_v1 = vld [vmem:[%s2359_s22 + $0x550] sm:$0xff]  ;;  %v352_v7 = vld [vmem:[%s2359_s22 + $0x558] sm:$0xff] }
  0x6a   : > { %v1355_v19 = vadd.f32 %v2364_v2, %v841_v8  ;;  %v845_v20 = vmul.f32 %v2361_v0, %v331_v4  ;;  %1864 = vst [vmem:[%s2377_s25 + $0x478] sm:$0xff] %v1352_v10  ;;  %v1356_v24 = vadd.f32 %v2364_v2, %v842_v11  ;;  %v1357_v25 = vadd.f32 %v2364_v2, %v843_v12  ;;  %v353_v8 = vld [vmem:[%s2359_s22 + $0x560] sm:$0xff] }
  0x6b   : > { %v1358_v26 = vadd.f32 %v2364_v2, %v844_v13  ;;  %v846_v27 = vmul.f32 %v2361_v0, %v332_v9  ;;  %1865 = vst [vmem:[%s2377_s25 + $0x480] sm:$0xff] %v1353_v17  ;;  %1866 = vst [vmem:[%s2377_s25 + $0x488] sm:$0xff] %v1354_v18  ;;  %v847_v30 = vmul.f32 %v2361_v0, %v333_v14  ;;  %v354_v9 = vld [vmem:[%s2359_s22 + $0x568] sm:$0xff]  ;;  %v355_v14 = vld [vmem:[%s2359_s22 + $0x570] sm:$0xff] }
  0x6c   : > { %1867 = vst [vmem:[%s2377_s25 + $0x490] sm:$0xff] %v1355_v19  ;;  %v1359_v29 = vadd.f32 %v2364_v2, %v845_v20  ;;  %v848_v31 = vmul.f32 %v2361_v0, %v334_v15  ;;  %v849_v32 = vmul.f32 %v2361_v0, %v335_v16  ;;  %1868 = vst [vmem:[%s2377_s25 + $0x498] sm:$0xff] %v1356_v24  ;;  %v356_v19 = vld [vmem:[%s2359_s22 + $0x578] sm:$0xff]  ;;  %v357_v24 = vld [vmem:[%s2359_s22 + $0x580] sm:$0xff] }
  0x6d   : > { %1869 = vst [vmem:[%s2377_s25 + $0x4a0] sm:$0xff] %v1357_v25  ;;  %1870 = vst [vmem:[%s2377_s25 + $0x4a8] sm:$0xff] %v1358_v26  ;;  %v1360_v34 = vadd.f32 %v2364_v2, %v846_v27  ;;  %v850_v35 = vmul.f32 %v2361_v0, %v336_v21  ;;  %v851_v36 = vmul.f32 %v2361_v0, %v337_v22  ;;  %v358_v25 = vld [vmem:[%s2359_s22 + $0x588] sm:$0xff]  ;;  %v359_v26 = vld [vmem:[%s2359_s22 + $0x590] sm:$0xff] }
  0x6e   : > { %v852_v37 = vmul.f32 %v2361_v0, %v338_v23  ;;  %1871 = vst [vmem:[%s2377_s25 + $0x4b0] sm:$0xff] %v1359_v29  ;;  %v1361_v41 = vadd.f32 %v2364_v2, %v847_v30  ;;  %v1362_v42 = vadd.f32 %v2364_v2, %v848_v31  ;;  %v1363_v43 = vadd.f32 %v2364_v2, %v849_v32  ;;  %v360_v31 = vld [vmem:[%s2359_s22 + $0x598] sm:$0xff]  ;;  %v361_v32 = vld [vmem:[%s2359_s22 + $0x5a0] sm:$0xff] }
  0x6f   : > { %v853_v44 = vmul.f32 %v2361_v0, %v339_v28  ;;  %1872 = vst [vmem:[%s2377_s25 + $0x4b8] sm:$0xff] %v1360_v34  ;;  %v1364_v48 = vadd.f32 %v2364_v2, %v850_v35  ;;  %v1365_v49 = vadd.f32 %v2364_v2, %v851_v36  ;;  %v854_v51 = vmul.f32 %v2361_v0, %v340_v33  ;;  %v362_v33 = vld [vmem:[%s2359_s22 + $0x5a8] sm:$0xff] }
  0x70   : > { %v1366_v50 = vadd.f32 %v2364_v2, %v852_v37  ;;  %1873 = vst [vmem:[%s2377_s25 + $0x4c0] sm:$0xff] %v1361_v41  ;;  %1874 = vst [vmem:[%s2377_s25 + $0x4c8] sm:$0xff] %v1362_v42  ;;  %v855_v54 = vmul.f32 %v2361_v0, %v341_v38  ;;  %v856_v55 = vmul.f32 %v2361_v0, %v342_v39  ;;  %v363_v38 = vld [vmem:[%s2359_s22 + $0x5b0] sm:$0xff] }
  0x71   : > { %1875 = vst [vmem:[%s2377_s25 + $0x4d0] sm:$0xff] %v1363_v43  ;;  %v1367_v53 = vadd.f32 %v2364_v2, %v853_v44  ;;  %v857_v56 = vmul.f32 %v2361_v0, %v343_v40  ;;  %1876 = vst [vmem:[%s2377_s25 + $0x4d8] sm:$0xff] %v1364_v48  ;;  %v1368_v58 = vadd.f32 %v2364_v2, %v854_v51  ;;  %v364_v43 = vld [vmem:[%s2359_s22 + $0x5b8] sm:$0xff]  ;;  %v365_v48 = vld [vmem:[%s2359_s22 + $0x5c0] sm:$0xff] }
  0x72   : > { %1877 = vst [vmem:[%s2377_s25 + $0x4e0] sm:$0xff] %v1365_v49  ;;  %1878 = vst [vmem:[%s2377_s25 + $0x4e8] sm:$0xff] %v1366_v50  ;;  %v858_v59 = vmul.f32 %v2361_v0, %v344_v45  ;;  %v859_v60 = vmul.f32 %v2361_v0, %v345_v46  ;;  %v860_v61 = vmul.f32 %v2361_v0, %v346_v47  ;;  %v366_v49 = vld [vmem:[%s2359_s22 + $0x5c8] sm:$0xff]  ;;  %v367_v50 = vld [vmem:[%s2359_s22 + $0x5d0] sm:$0xff] }
  0x73   : > { %1879 = vst [vmem:[%s2377_s25 + $0x4f0] sm:$0xff] %v1367_v53  ;;  %v1369_v3 = vadd.f32 %v2364_v2, %v855_v54  ;;  %v1370_v4 = vadd.f32 %v2364_v2, %v856_v55  ;;  %v1371_v5 = vadd.f32 %v2364_v2, %v857_v56  ;;  %v861_v6 = vmul.f32 %v2361_v0, %v347_v52  ;;  %v368_v55 = vld [vmem:[%s2359_s22 + $0x5d8] sm:$0xff]  ;;  %v369_v56 = vld [vmem:[%s2359_s22 + $0x5e0] sm:$0xff] }
  0x74   : > { %1880 = vst [vmem:[%s2377_s25 + $0x4f8] sm:$0xff] %v1368_v58  ;;  %v1372_v10 = vadd.f32 %v2364_v2, %v858_v59  ;;  %v1373_v11 = vadd.f32 %v2364_v2, %v859_v60  ;;  %v1374_v12 = vadd.f32 %v2364_v2, %v860_v61  ;;  %v862_v13 = vmul.f32 %v2361_v0, %v348_v57  ;;  %v370_v57 = vld [vmem:[%s2359_s22 + $0x5e8] sm:$0xff] }
  0x75   : > { %1881 = vst [vmem:[%s2377_s25 + $0x500] sm:$0xff] %v1369_v3  ;;  %1882 = vst [vmem:[%s2377_s25 + $0x508] sm:$0xff] %v1370_v4  ;;  %v1375_v15 = vadd.f32 %v2364_v2, %v861_v6  ;;  %v863_v16 = vmul.f32 %v2361_v0, %v349_v62  ;;  %v864_v17 = vmul.f32 %v2361_v0, %v350_v63  ;;  %v371_v62 = vld [vmem:[%s2359_s22 + $0x5f0] sm:$0xff] }
  0x76   : > { %1883 = vst [vmem:[%s2377_s25 + $0x510] sm:$0xff] %v1371_v5  ;;  %v865_v18 = vmul.f32 %v2361_v0, %v351_v1  ;;  %1884 = vst [vmem:[%s2377_s25 + $0x518] sm:$0xff] %v1372_v10  ;;  %v1376_v20 = vadd.f32 %v2364_v2, %v862_v13  ;;  %v866_v21 = vmul.f32 %v2361_v0, %v352_v7  ;;  %v372_v5 = vld [vmem:[%s2359_s22 + $0x5f8] sm:$0xff]  ;;  %v373_v10 = vld [vmem:[%s2359_s22 + $0x600] sm:$0xff] }
  0x77   : > { %1885 = vst [vmem:[%s2377_s25 + $0x520] sm:$0xff] %v1373_v11  ;;  %1886 = vst [vmem:[%s2377_s25 + $0x528] sm:$0xff] %v1374_v12  ;;  %v867_v22 = vmul.f32 %v2361_v0, %v353_v8  ;;  %v868_v23 = vmul.f32 %v2361_v0, %v354_v9  ;;  %v1377_v27 = vadd.f32 %v2364_v2, %v863_v16  ;;  %v374_v11 = vld [vmem:[%s2359_s22 + $0x608] sm:$0xff]  ;;  %v375_v12 = vld [vmem:[%s2359_s22 + $0x610] sm:$0xff] }
  0x78   : > { %1887 = vst [vmem:[%s2377_s25 + $0x530] sm:$0xff] %v1375_v15  ;;  %v1378_v28 = vadd.f32 %v2364_v2, %v864_v17  ;;  %v1379_v29 = vadd.f32 %v2364_v2, %v865_v18  ;;  %v869_v30 = vmul.f32 %v2361_v0, %v355_v14  ;;  %1888 = vst [vmem:[%s2377_s25 + $0x538] sm:$0xff] %v1376_v20  ;;  %v376_v17 = vld [vmem:[%s2359_s22 + $0x618] sm:$0xff]  ;;  %v377_v18 = vld [vmem:[%s2359_s22 + $0x620] sm:$0xff] }
  0x79   : > { %v1380_v34 = vadd.f32 %v2364_v2, %v866_v21  ;;  %v1381_v35 = vadd.f32 %v2364_v2, %v867_v22  ;;  %v1382_v36 = vadd.f32 %v2364_v2, %v868_v23  ;;  %v870_v37 = vmul.f32 %v2361_v0, %v356_v19  ;;  %1889 = vst [vmem:[%s2377_s25 + $0x540] sm:$0xff] %v1377_v27  ;;  %v378_v19 = vld [vmem:[%s2359_s22 + $0x628] sm:$0xff] }
  0x7a   : > { %1890 = vst [vmem:[%s2377_s25 + $0x548] sm:$0xff] %v1378_v28  ;;  %1891 = vst [vmem:[%s2377_s25 + $0x550] sm:$0xff] %v1379_v29  ;;  %v1383_v39 = vadd.f32 %v2364_v2, %v869_v30  ;;  %v871_v40 = vmul.f32 %v2361_v0, %v357_v24  ;;  %v872_v41 = vmul.f32 %v2361_v0, %v358_v25  ;;  %v379_v24 = vld [vmem:[%s2359_s22 + $0x630] sm:$0xff]  ;;  %v380_v29 = vld [vmem:[%s2359_s22 + $0x638] sm:$0xff] }
  0x7b   : > { %v873_v42 = vmul.f32 %v2361_v0, %v359_v26  ;;  %1892 = vst [vmem:[%s2377_s25 + $0x558] sm:$0xff] %v1380_v34  ;;  %1893 = vst [vmem:[%s2377_s25 + $0x560] sm:$0xff] %v1381_v35  ;;  %v1384_v44 = vadd.f32 %v2364_v2, %v870_v37  ;;  %v874_v45 = vmul.f32 %v2361_v0, %v360_v31  ;;  %v381_v34 = vld [vmem:[%s2359_s22 + $0x640] sm:$0xff]  ;;  %v382_v35 = vld [vmem:[%s2359_s22 + $0x648] sm:$0xff] }
  0x7c   : > { %1894 = vst [vmem:[%s2377_s25 + $0x568] sm:$0xff] %v1382_v36  ;;  %v875_v46 = vmul.f32 %v2361_v0, %v361_v32  ;;  %v876_v47 = vmul.f32 %v2361_v0, %v362_v33  ;;  %1895 = vst [vmem:[%s2377_s25 + $0x570] sm:$0xff] %v1383_v39  ;;  %v1385_v51 = vadd.f32 %v2364_v2, %v871_v40  ;;  %v383_v36 = vld [vmem:[%s2359_s22 + $0x650] sm:$0xff] }
  0x7d   : > { %v1386_v52 = vadd.f32 %v2364_v2, %v872_v41  ;;  %v1387_v53 = vadd.f32 %v2364_v2, %v873_v42  ;;  %v877_v54 = vmul.f32 %v2361_v0, %v363_v38  ;;  %1896 = vst [vmem:[%s2377_s25 + $0x578] sm:$0xff] %v1384_v44  ;;  %v1388_v58 = vadd.f32 %v2364_v2, %v874_v45  ;;  %v384_v41 = vld [vmem:[%s2359_s22 + $0x658] sm:$0xff]  ;;  %v385_v42 = vld [vmem:[%s2359_s22 + $0x660] sm:$0xff] }
  0x7e   : > { %v1389_v59 = vadd.f32 %v2364_v2, %v875_v46  ;;  %v1390_v60 = vadd.f32 %v2364_v2, %v876_v47  ;;  %v878_v61 = vmul.f32 %v2361_v0, %v364_v43  ;;  %1897 = vst [vmem:[%s2377_s25 + $0x580] sm:$0xff] %v1385_v51  ;;  %v879_v1 = vmul.f32 %v2361_v0, %v365_v48  ;;  %v386_v43 = vld [vmem:[%s2359_s22 + $0x668] sm:$0xff]  ;;  %v387_v48 = vld [vmem:[%s2359_s22 + $0x670] sm:$0xff] }
  0x7f   : > { %1898 = vst [vmem:[%s2377_s25 + $0x588] sm:$0xff] %v1386_v52  ;;  %1899 = vst [vmem:[%s2377_s25 + $0x590] sm:$0xff] %v1387_v53  ;;  %v1391_v63 = vadd.f32 %v2364_v2, %v877_v54  ;;  %v880_v3 = vmul.f32 %v2361_v0, %v366_v49  ;;  %v881_v4 = vmul.f32 %v2361_v0, %v367_v50  ;;  %v388_v53 = vld [vmem:[%s2359_s22 + $0x678] sm:$0xff] }
  0x80   : > { %1900 = vst [vmem:[%s2377_s25 + $0x598] sm:$0xff] %v1388_v58  ;;  %1901 = vst [vmem:[%s2377_s25 + $0x5a0] sm:$0xff] %v1389_v59  ;;  %v1392_v6 = vadd.f32 %v2364_v2, %v878_v61  ;;  %v882_v7 = vmul.f32 %v2361_v0, %v368_v55  ;;  %v883_v8 = vmul.f32 %v2361_v0, %v369_v56  ;;  %v389_v58 = vld [vmem:[%s2359_s22 + $0x680] sm:$0xff]  ;;  %v390_v59 = vld [vmem:[%s2359_s22 + $0x688] sm:$0xff] }
  0x81   : > { %1902 = vst [vmem:[%s2377_s25 + $0x5a8] sm:$0xff] %v1390_v60  ;;  %v884_v9 = vmul.f32 %v2361_v0, %v370_v57  ;;  %1903 = vst [vmem:[%s2377_s25 + $0x5b0] sm:$0xff] %v1391_v63  ;;  %v1393_v13 = vadd.f32 %v2364_v2, %v879_v1  ;;  %v1394_v14 = vadd.f32 %v2364_v2, %v880_v3  ;;  %v391_v60 = vld [vmem:[%s2359_s22 + $0x690] sm:$0xff]  ;;  %v392_v3 = vld [vmem:[%s2359_s22 + $0x698] sm:$0xff] }
  0x82   : > { %v1395_v15 = vadd.f32 %v2364_v2, %v881_v4  ;;  %v885_v16 = vmul.f32 %v2361_v0, %v371_v62  ;;  %1904 = vst [vmem:[%s2377_s25 + $0x5b8] sm:$0xff] %v1392_v6  ;;  %v1396_v20 = vadd.f32 %v2364_v2, %v882_v7  ;;  %v1397_v21 = vadd.f32 %v2364_v2, %v883_v8  ;;  %v393_v4 = vld [vmem:[%s2359_s22 + $0x6a0] sm:$0xff] }
  0x83   : > { %v1398_v22 = vadd.f32 %v2364_v2, %v884_v9  ;;  %v886_v23 = vmul.f32 %v2361_v0, %v372_v5  ;;  %1905 = vst [vmem:[%s2377_s25 + $0x5c0] sm:$0xff] %v1393_v13  ;;  %1906 = vst [vmem:[%s2377_s25 + $0x5c8] sm:$0xff] %v1394_v14  ;;  %v887_v26 = vmul.f32 %v2361_v0, %v373_v10  ;;  %v394_v5 = vld [vmem:[%s2359_s22 + $0x6a8] sm:$0xff]  ;;  %v395_v10 = vld [vmem:[%s2359_s22 + $0x6b0] sm:$0xff] }
  0x84   : > { %1907 = vst [vmem:[%s2377_s25 + $0x5d0] sm:$0xff] %v1395_v15  ;;  %v1399_v25 = vadd.f32 %v2364_v2, %v885_v16  ;;  %v888_v27 = vmul.f32 %v2361_v0, %v374_v11  ;;  %v889_v28 = vmul.f32 %v2361_v0, %v375_v12  ;;  %1908 = vst [vmem:[%s2377_s25 + $0x5d8] sm:$0xff] %v1396_v20  ;;  %v396_v15 = vld [vmem:[%s2359_s22 + $0x6b8] sm:$0xff]  ;;  %v397_v20 = vld [vmem:[%s2359_s22 + $0x6c0] sm:$0xff] }
  0x85   : > { %1909 = vst [vmem:[%s2377_s25 + $0x5e0] sm:$0xff] %v1397_v21  ;;  %1910 = vst [vmem:[%s2377_s25 + $0x5e8] sm:$0xff] %v1398_v22  ;;  %v1400_v30 = vadd.f32 %v2364_v2, %v886_v23  ;;  %v890_v31 = vmul.f32 %v2361_v0, %v376_v17  ;;  %v891_v32 = vmul.f32 %v2361_v0, %v377_v18  ;;  %v398_v21 = vld [vmem:[%s2359_s22 + $0x6c8] sm:$0xff]  ;;  %v399_v22 = vld [vmem:[%s2359_s22 + $0x6d0] sm:$0xff] }
  0x86   : > { %v892_v33 = vmul.f32 %v2361_v0, %v378_v19  ;;  %1911 = vst [vmem:[%s2377_s25 + $0x5f0] sm:$0xff] %v1399_v25  ;;  %v1401_v37 = vadd.f32 %v2364_v2, %v887_v26  ;;  %v1402_v38 = vadd.f32 %v2364_v2, %v888_v27  ;;  %v1403_v39 = vadd.f32 %v2364_v2, %v889_v28  ;;  %v400_v27 = vld [vmem:[%s2359_s22 + $0x6d8] sm:$0xff]  ;;  %v401_v28 = vld [vmem:[%s2359_s22 + $0x6e0] sm:$0xff] }
  0x87   : > { %v893_v40 = vmul.f32 %v2361_v0, %v379_v24  ;;  %1912 = vst [vmem:[%s2377_s25 + $0x5f8] sm:$0xff] %v1400_v30  ;;  %v1404_v44 = vadd.f32 %v2364_v2, %v890_v31  ;;  %v1405_v45 = vadd.f32 %v2364_v2, %v891_v32  ;;  %v894_v47 = vmul.f32 %v2361_v0, %v380_v29  ;;  %v402_v29 = vld [vmem:[%s2359_s22 + $0x6e8] sm:$0xff] }
  0x88   : > { %v1406_v46 = vadd.f32 %v2364_v2, %v892_v33  ;;  %1913 = vst [vmem:[%s2377_s25 + $0x600] sm:$0xff] %v1401_v37  ;;  %1914 = vst [vmem:[%s2377_s25 + $0x608] sm:$0xff] %v1402_v38  ;;  %v895_v50 = vmul.f32 %v2361_v0, %v381_v34  ;;  %v896_v51 = vmul.f32 %v2361_v0, %v382_v35  ;;  %v403_v34 = vld [vmem:[%s2359_s22 + $0x6f0] sm:$0xff] }
  0x89   : > { %1915 = vst [vmem:[%s2377_s25 + $0x610] sm:$0xff] %v1403_v39  ;;  %v1407_v49 = vadd.f32 %v2364_v2, %v893_v40  ;;  %v897_v52 = vmul.f32 %v2361_v0, %v383_v36  ;;  %1916 = vst [vmem:[%s2377_s25 + $0x618] sm:$0xff] %v1404_v44  ;;  %v1408_v54 = vadd.f32 %v2364_v2, %v894_v47  ;;  %v404_v39 = vld [vmem:[%s2359_s22 + $0x6f8] sm:$0xff]  ;;  %v405_v44 = vld [vmem:[%s2359_s22 + $0x700] sm:$0xff] }
  0x8a   : > { %1917 = vst [vmem:[%s2377_s25 + $0x620] sm:$0xff] %v1405_v45  ;;  %1918 = vst [vmem:[%s2377_s25 + $0x628] sm:$0xff] %v1406_v46  ;;  %v898_v55 = vmul.f32 %v2361_v0, %v384_v41  ;;  %v899_v56 = vmul.f32 %v2361_v0, %v385_v42  ;;  %v900_v57 = vmul.f32 %v2361_v0, %v386_v43  ;;  %v406_v45 = vld [vmem:[%s2359_s22 + $0x708] sm:$0xff]  ;;  %v407_v46 = vld [vmem:[%s2359_s22 + $0x710] sm:$0xff] }
  0x8b   : > { %1919 = vst [vmem:[%s2377_s25 + $0x630] sm:$0xff] %v1407_v49  ;;  %v1409_v61 = vadd.f32 %v2364_v2, %v895_v50  ;;  %v1410_v62 = vadd.f32 %v2364_v2, %v896_v51  ;;  %v1411_v63 = vadd.f32 %v2364_v2, %v897_v52  ;;  %v901_v1 = vmul.f32 %v2361_v0, %v387_v48  ;;  %v408_v51 = vld [vmem:[%s2359_s22 + $0x718] sm:$0xff]  ;;  %v409_v52 = vld [vmem:[%s2359_s22 + $0x720] sm:$0xff] }
  0x8c   : > { %1920 = vst [vmem:[%s2377_s25 + $0x638] sm:$0xff] %v1408_v54  ;;  %v1412_v6 = vadd.f32 %v2364_v2, %v898_v55  ;;  %v1413_v7 = vadd.f32 %v2364_v2, %v899_v56  ;;  %v1414_v8 = vadd.f32 %v2364_v2, %v900_v57  ;;  %v902_v9 = vmul.f32 %v2361_v0, %v388_v53  ;;  %v410_v53 = vld [vmem:[%s2359_s22 + $0x728] sm:$0xff] }
  0x8d   : > { %1921 = vst [vmem:[%s2377_s25 + $0x640] sm:$0xff] %v1409_v61  ;;  %1922 = vst [vmem:[%s2377_s25 + $0x648] sm:$0xff] %v1410_v62  ;;  %v1415_v11 = vadd.f32 %v2364_v2, %v901_v1  ;;  %v903_v12 = vmul.f32 %v2361_v0, %v389_v58  ;;  %v904_v13 = vmul.f32 %v2361_v0, %v390_v59  ;;  %v411_v58 = vld [vmem:[%s2359_s22 + $0x730] sm:$0xff] }
  0x8e   : > { %1923 = vst [vmem:[%s2377_s25 + $0x650] sm:$0xff] %v1411_v63  ;;  %v905_v14 = vmul.f32 %v2361_v0, %v391_v60  ;;  %1924 = vst [vmem:[%s2377_s25 + $0x658] sm:$0xff] %v1412_v6  ;;  %v1416_v16 = vadd.f32 %v2364_v2, %v902_v9  ;;  %v906_v17 = vmul.f32 %v2361_v0, %v392_v3  ;;  %v412_v63 = vld [vmem:[%s2359_s22 + $0x738] sm:$0xff]  ;;  %v413_v6 = vld [vmem:[%s2359_s22 + $0x740] sm:$0xff] }
  0x8f   : > { %1925 = vst [vmem:[%s2377_s25 + $0x660] sm:$0xff] %v1413_v7  ;;  %1926 = vst [vmem:[%s2377_s25 + $0x668] sm:$0xff] %v1414_v8  ;;  %v907_v18 = vmul.f32 %v2361_v0, %v393_v4  ;;  %v908_v19 = vmul.f32 %v2361_v0, %v394_v5  ;;  %v1417_v23 = vadd.f32 %v2364_v2, %v903_v12  ;;  %v414_v7 = vld [vmem:[%s2359_s22 + $0x748] sm:$0xff]  ;;  %v415_v8 = vld [vmem:[%s2359_s22 + $0x750] sm:$0xff] }
  0x90   : > { %1927 = vst [vmem:[%s2377_s25 + $0x670] sm:$0xff] %v1415_v11  ;;  %v1418_v24 = vadd.f32 %v2364_v2, %v904_v13  ;;  %v1419_v25 = vadd.f32 %v2364_v2, %v905_v14  ;;  %v909_v26 = vmul.f32 %v2361_v0, %v395_v10  ;;  %1928 = vst [vmem:[%s2377_s25 + $0x678] sm:$0xff] %v1416_v16  ;;  %v416_v13 = vld [vmem:[%s2359_s22 + $0x758] sm:$0xff]  ;;  %v417_v14 = vld [vmem:[%s2359_s22 + $0x760] sm:$0xff] }
  0x91   : > { %v1420_v30 = vadd.f32 %v2364_v2, %v906_v17  ;;  %v1421_v31 = vadd.f32 %v2364_v2, %v907_v18  ;;  %v1422_v32 = vadd.f32 %v2364_v2, %v908_v19  ;;  %v910_v33 = vmul.f32 %v2361_v0, %v396_v15  ;;  %1929 = vst [vmem:[%s2377_s25 + $0x680] sm:$0xff] %v1417_v23  ;;  %v418_v15 = vld [vmem:[%s2359_s22 + $0x768] sm:$0xff] }
  0x92   : > { %1930 = vst [vmem:[%s2377_s25 + $0x688] sm:$0xff] %v1418_v24  ;;  %1931 = vst [vmem:[%s2377_s25 + $0x690] sm:$0xff] %v1419_v25  ;;  %v1423_v35 = vadd.f32 %v2364_v2, %v909_v26  ;;  %v911_v36 = vmul.f32 %v2361_v0, %v397_v20  ;;  %v912_v37 = vmul.f32 %v2361_v0, %v398_v21  ;;  %v419_v20 = vld [vmem:[%s2359_s22 + $0x770] sm:$0xff]  ;;  %v420_v25 = vld [vmem:[%s2359_s22 + $0x778] sm:$0xff] }
  0x93   : > { %v913_v38 = vmul.f32 %v2361_v0, %v399_v22  ;;  %1932 = vst [vmem:[%s2377_s25 + $0x698] sm:$0xff] %v1420_v30  ;;  %1933 = vst [vmem:[%s2377_s25 + $0x6a0] sm:$0xff] %v1421_v31  ;;  %v1424_v40 = vadd.f32 %v2364_v2, %v910_v33  ;;  %v914_v41 = vmul.f32 %v2361_v0, %v400_v27  ;;  %v421_v30 = vld [vmem:[%s2359_s22 + $0x780] sm:$0xff]  ;;  %v422_v31 = vld [vmem:[%s2359_s22 + $0x788] sm:$0xff] }
  0x94   : > { %1934 = vst [vmem:[%s2377_s25 + $0x6a8] sm:$0xff] %v1422_v32  ;;  %v915_v42 = vmul.f32 %v2361_v0, %v401_v28  ;;  %v916_v43 = vmul.f32 %v2361_v0, %v402_v29  ;;  %1935 = vst [vmem:[%s2377_s25 + $0x6b0] sm:$0xff] %v1423_v35  ;;  %v1425_v47 = vadd.f32 %v2364_v2, %v911_v36  ;;  %v423_v32 = vld [vmem:[%s2359_s22 + $0x790] sm:$0xff] }
  0x95   : > { %v1426_v48 = vadd.f32 %v2364_v2, %v912_v37  ;;  %v1427_v49 = vadd.f32 %v2364_v2, %v913_v38  ;;  %v917_v50 = vmul.f32 %v2361_v0, %v403_v34  ;;  %1936 = vst [vmem:[%s2377_s25 + $0x6b8] sm:$0xff] %v1424_v40  ;;  %v1428_v54 = vadd.f32 %v2364_v2, %v914_v41  ;;  %v424_v37 = vld [vmem:[%s2359_s22 + $0x798] sm:$0xff]  ;;  %v425_v38 = vld [vmem:[%s2359_s22 + $0x7a0] sm:$0xff] }
  0x96   : > { %v1429_v55 = vadd.f32 %v2364_v2, %v915_v42  ;;  %v1430_v56 = vadd.f32 %v2364_v2, %v916_v43  ;;  %v918_v57 = vmul.f32 %v2361_v0, %v404_v39  ;;  %1937 = vst [vmem:[%s2377_s25 + $0x6c0] sm:$0xff] %v1425_v47  ;;  %v919_v60 = vmul.f32 %v2361_v0, %v405_v44  ;;  %v426_v39 = vld [vmem:[%s2359_s22 + $0x7a8] sm:$0xff]  ;;  %v427_v44 = vld [vmem:[%s2359_s22 + $0x7b0] sm:$0xff] }
  0x97   : > { %1938 = vst [vmem:[%s2377_s25 + $0x6c8] sm:$0xff] %v1426_v48  ;;  %1939 = vst [vmem:[%s2377_s25 + $0x6d0] sm:$0xff] %v1427_v49  ;;  %v1431_v59 = vadd.f32 %v2364_v2, %v917_v50  ;;  %v920_v61 = vmul.f32 %v2361_v0, %v406_v45  ;;  %v921_v62 = vmul.f32 %v2361_v0, %v407_v46  ;;  %v428_v49 = vld [vmem:[%s2359_s22 + $0x7b8] sm:$0xff] }
  0x98   : > { %1940 = vst [vmem:[%s2377_s25 + $0x6d8] sm:$0xff] %v1428_v54  ;;  %1941 = vst [vmem:[%s2377_s25 + $0x6e0] sm:$0xff] %v1429_v55  ;;  %v1432_v1 = vadd.f32 %v2364_v2, %v918_v57  ;;  %v922_v3 = vmul.f32 %v2361_v0, %v408_v51  ;;  %v923_v4 = vmul.f32 %v2361_v0, %v409_v52  ;;  %v429_v54 = vld [vmem:[%s2359_s22 + $0x7c0] sm:$0xff]  ;;  %v430_v55 = vld [vmem:[%s2359_s22 + $0x7c8] sm:$0xff] }
  0x99   : > { %1942 = vst [vmem:[%s2377_s25 + $0x6e8] sm:$0xff] %v1430_v56  ;;  %v924_v5 = vmul.f32 %v2361_v0, %v410_v53  ;;  %1943 = vst [vmem:[%s2377_s25 + $0x6f0] sm:$0xff] %v1431_v59  ;;  %v1433_v9 = vadd.f32 %v2364_v2, %v919_v60  ;;  %v1434_v10 = vadd.f32 %v2364_v2, %v920_v61  ;;  %v431_v56 = vld [vmem:[%s2359_s22 + $0x7d0] sm:$0xff]  ;;  %v432_v61 = vld [vmem:[%s2359_s22 + $0x7d8] sm:$0xff] }
  0x9a   : > { %v1435_v11 = vadd.f32 %v2364_v2, %v921_v62  ;;  %v925_v12 = vmul.f32 %v2361_v0, %v411_v58  ;;  %1944 = vst [vmem:[%s2377_s25 + $0x6f8] sm:$0xff] %v1432_v1  ;;  %v1436_v16 = vadd.f32 %v2364_v2, %v922_v3  ;;  %v1437_v17 = vadd.f32 %v2364_v2, %v923_v4  ;;  %v433_v62 = vld [vmem:[%s2359_s22 + $0x7e0] sm:$0xff] }
  0x9b   : > { %v1438_v18 = vadd.f32 %v2364_v2, %v924_v5  ;;  %v926_v19 = vmul.f32 %v2361_v0, %v412_v63  ;;  %1945 = vst [vmem:[%s2377_s25 + $0x700] sm:$0xff] %v1433_v9  ;;  %1946 = vst [vmem:[%s2377_s25 + $0x708] sm:$0xff] %v1434_v10  ;;  %v927_v22 = vmul.f32 %v2361_v0, %v413_v6  ;;  %v434_v63 = vld [vmem:[%s2359_s22 + $0x7e8] sm:$0xff]  ;;  %v435_v6 = vld [vmem:[%s2359_s22 + $0x7f0] sm:$0xff] }
  0x9c   : > { %1947 = vst [vmem:[%s2377_s25 + $0x710] sm:$0xff] %v1435_v11  ;;  %v1439_v21 = vadd.f32 %v2364_v2, %v925_v12  ;;  %v928_v23 = vmul.f32 %v2361_v0, %v414_v7  ;;  %v929_v24 = vmul.f32 %v2361_v0, %v415_v8  ;;  %1948 = vst [vmem:[%s2377_s25 + $0x718] sm:$0xff] %v1436_v16  ;;  %v436_v11 = vld [vmem:[%s2359_s22 + $0x7f8] sm:$0xff]  ;;  %v437_v16 = vld [vmem:[%s2359_s22 + $0x800] sm:$0xff] }
  0x9d   : > { %1949 = vst [vmem:[%s2377_s25 + $0x720] sm:$0xff] %v1437_v17  ;;  %1950 = vst [vmem:[%s2377_s25 + $0x728] sm:$0xff] %v1438_v18  ;;  %v1440_v26 = vadd.f32 %v2364_v2, %v926_v19  ;;  %v930_v27 = vmul.f32 %v2361_v0, %v416_v13  ;;  %v931_v28 = vmul.f32 %v2361_v0, %v417_v14  ;;  %v438_v17 = vld [vmem:[%s2359_s22 + $0x808] sm:$0xff]  ;;  %v439_v18 = vld [vmem:[%s2359_s22 + $0x810] sm:$0xff] }
  0x9e   : > { %v932_v29 = vmul.f32 %v2361_v0, %v418_v15  ;;  %1951 = vst [vmem:[%s2377_s25 + $0x730] sm:$0xff] %v1439_v21  ;;  %v1441_v33 = vadd.f32 %v2364_v2, %v927_v22  ;;  %v1442_v34 = vadd.f32 %v2364_v2, %v928_v23  ;;  %v1443_v35 = vadd.f32 %v2364_v2, %v929_v24  ;;  %v440_v23 = vld [vmem:[%s2359_s22 + $0x818] sm:$0xff]  ;;  %v441_v24 = vld [vmem:[%s2359_s22 + $0x820] sm:$0xff] }
  0x9f   : > { %v933_v36 = vmul.f32 %v2361_v0, %v419_v20  ;;  %1952 = vst [vmem:[%s2377_s25 + $0x738] sm:$0xff] %v1440_v26  ;;  %v1444_v40 = vadd.f32 %v2364_v2, %v930_v27  ;;  %v1445_v41 = vadd.f32 %v2364_v2, %v931_v28  ;;  %v934_v43 = vmul.f32 %v2361_v0, %v420_v25  ;;  %v442_v25 = vld [vmem:[%s2359_s22 + $0x828] sm:$0xff] }
  0xa0   : > { %v1446_v42 = vadd.f32 %v2364_v2, %v932_v29  ;;  %1953 = vst [vmem:[%s2377_s25 + $0x740] sm:$0xff] %v1441_v33  ;;  %1954 = vst [vmem:[%s2377_s25 + $0x748] sm:$0xff] %v1442_v34  ;;  %v935_v46 = vmul.f32 %v2361_v0, %v421_v30  ;;  %v936_v47 = vmul.f32 %v2361_v0, %v422_v31  ;;  %v443_v30 = vld [vmem:[%s2359_s22 + $0x830] sm:$0xff] }
  0xa1   : > { %1955 = vst [vmem:[%s2377_s25 + $0x750] sm:$0xff] %v1443_v35  ;;  %v1447_v45 = vadd.f32 %v2364_v2, %v933_v36  ;;  %v937_v48 = vmul.f32 %v2361_v0, %v423_v32  ;;  %1956 = vst [vmem:[%s2377_s25 + $0x758] sm:$0xff] %v1444_v40  ;;  %v1448_v50 = vadd.f32 %v2364_v2, %v934_v43  ;;  %v444_v35 = vld [vmem:[%s2359_s22 + $0x838] sm:$0xff]  ;;  %v445_v40 = vld [vmem:[%s2359_s22 + $0x840] sm:$0xff] }
  0xa2   : > { %1957 = vst [vmem:[%s2377_s25 + $0x760] sm:$0xff] %v1445_v41  ;;  %1958 = vst [vmem:[%s2377_s25 + $0x768] sm:$0xff] %v1446_v42  ;;  %v938_v51 = vmul.f32 %v2361_v0, %v424_v37  ;;  %v939_v52 = vmul.f32 %v2361_v0, %v425_v38  ;;  %v940_v53 = vmul.f32 %v2361_v0, %v426_v39  ;;  %v446_v41 = vld [vmem:[%s2359_s22 + $0x848] sm:$0xff]  ;;  %v447_v42 = vld [vmem:[%s2359_s22 + $0x850] sm:$0xff] }
  0xa3   : > { %1959 = vst [vmem:[%s2377_s25 + $0x770] sm:$0xff] %v1447_v45  ;;  %v1449_v57 = vadd.f32 %v2364_v2, %v935_v46  ;;  %v1450_v58 = vadd.f32 %v2364_v2, %v936_v47  ;;  %v1451_v59 = vadd.f32 %v2364_v2, %v937_v48  ;;  %v941_v60 = vmul.f32 %v2361_v0, %v427_v44  ;;  %v448_v47 = vld [vmem:[%s2359_s22 + $0x858] sm:$0xff]  ;;  %v449_v48 = vld [vmem:[%s2359_s22 + $0x860] sm:$0xff] }
  0xa4   : > { %1960 = vst [vmem:[%s2377_s25 + $0x778] sm:$0xff] %v1448_v50  ;;  %v1452_v1 = vadd.f32 %v2364_v2, %v938_v51  ;;  %v1453_v3 = vadd.f32 %v2364_v2, %v939_v52  ;;  %v1454_v4 = vadd.f32 %v2364_v2, %v940_v53  ;;  %v942_v5 = vmul.f32 %v2361_v0, %v428_v49  ;;  %v450_v49 = vld [vmem:[%s2359_s22 + $0x868] sm:$0xff] }
  0xa5   : > { %1961 = vst [vmem:[%s2377_s25 + $0x780] sm:$0xff] %v1449_v57  ;;  %1962 = vst [vmem:[%s2377_s25 + $0x788] sm:$0xff] %v1450_v58  ;;  %v1455_v7 = vadd.f32 %v2364_v2, %v941_v60  ;;  %v943_v8 = vmul.f32 %v2361_v0, %v429_v54  ;;  %v944_v9 = vmul.f32 %v2361_v0, %v430_v55  ;;  %v451_v54 = vld [vmem:[%s2359_s22 + $0x870] sm:$0xff] }
  0xa6   : > { %1963 = vst [vmem:[%s2377_s25 + $0x790] sm:$0xff] %v1451_v59  ;;  %v945_v10 = vmul.f32 %v2361_v0, %v431_v56  ;;  %1964 = vst [vmem:[%s2377_s25 + $0x798] sm:$0xff] %v1452_v1  ;;  %v1456_v12 = vadd.f32 %v2364_v2, %v942_v5  ;;  %v946_v13 = vmul.f32 %v2361_v0, %v432_v61  ;;  %v452_v59 = vld [vmem:[%s2359_s22 + $0x878] sm:$0xff]  ;;  %v453_v1 = vld [vmem:[%s2359_s22 + $0x880] sm:$0xff] }
  0xa7   : > { %1965 = vst [vmem:[%s2377_s25 + $0x7a0] sm:$0xff] %v1453_v3  ;;  %1966 = vst [vmem:[%s2377_s25 + $0x7a8] sm:$0xff] %v1454_v4  ;;  %v947_v14 = vmul.f32 %v2361_v0, %v433_v62  ;;  %v948_v15 = vmul.f32 %v2361_v0, %v434_v63  ;;  %v1457_v19 = vadd.f32 %v2364_v2, %v943_v8  ;;  %v454_v3 = vld [vmem:[%s2359_s22 + $0x888] sm:$0xff]  ;;  %v455_v4 = vld [vmem:[%s2359_s22 + $0x890] sm:$0xff] }
  0xa8   : > { %1967 = vst [vmem:[%s2377_s25 + $0x7b0] sm:$0xff] %v1455_v7  ;;  %v1458_v20 = vadd.f32 %v2364_v2, %v944_v9  ;;  %v1459_v21 = vadd.f32 %v2364_v2, %v945_v10  ;;  %v949_v22 = vmul.f32 %v2361_v0, %v435_v6  ;;  %1968 = vst [vmem:[%s2377_s25 + $0x7b8] sm:$0xff] %v1456_v12  ;;  %v456_v9 = vld [vmem:[%s2359_s22 + $0x898] sm:$0xff]  ;;  %v457_v10 = vld [vmem:[%s2359_s22 + $0x8a0] sm:$0xff] }
  0xa9   : > { %v1460_v26 = vadd.f32 %v2364_v2, %v946_v13  ;;  %v1461_v27 = vadd.f32 %v2364_v2, %v947_v14  ;;  %v1462_v28 = vadd.f32 %v2364_v2, %v948_v15  ;;  %v950_v29 = vmul.f32 %v2361_v0, %v436_v11  ;;  %1969 = vst [vmem:[%s2377_s25 + $0x7c0] sm:$0xff] %v1457_v19  ;;  %v458_v11 = vld [vmem:[%s2359_s22 + $0x8a8] sm:$0xff] }
  0xaa   : > { %1970 = vst [vmem:[%s2377_s25 + $0x7c8] sm:$0xff] %v1458_v20  ;;  %1971 = vst [vmem:[%s2377_s25 + $0x7d0] sm:$0xff] %v1459_v21  ;;  %v1463_v31 = vadd.f32 %v2364_v2, %v949_v22  ;;  %v951_v32 = vmul.f32 %v2361_v0, %v437_v16  ;;  %v952_v33 = vmul.f32 %v2361_v0, %v438_v17  ;;  %v459_v16 = vld [vmem:[%s2359_s22 + $0x8b0] sm:$0xff]  ;;  %v460_v21 = vld [vmem:[%s2359_s22 + $0x8b8] sm:$0xff] }
  0xab   : > { %v953_v34 = vmul.f32 %v2361_v0, %v439_v18  ;;  %1972 = vst [vmem:[%s2377_s25 + $0x7d8] sm:$0xff] %v1460_v26  ;;  %1973 = vst [vmem:[%s2377_s25 + $0x7e0] sm:$0xff] %v1461_v27  ;;  %v1464_v36 = vadd.f32 %v2364_v2, %v950_v29  ;;  %v954_v37 = vmul.f32 %v2361_v0, %v440_v23  ;;  %v461_v26 = vld [vmem:[%s2359_s22 + $0x8c0] sm:$0xff]  ;;  %v462_v27 = vld [vmem:[%s2359_s22 + $0x8c8] sm:$0xff] }
  0xac   : > { %1974 = vst [vmem:[%s2377_s25 + $0x7e8] sm:$0xff] %v1462_v28  ;;  %v955_v38 = vmul.f32 %v2361_v0, %v441_v24  ;;  %v956_v39 = vmul.f32 %v2361_v0, %v442_v25  ;;  %1975 = vst [vmem:[%s2377_s25 + $0x7f0] sm:$0xff] %v1463_v31  ;;  %v1465_v43 = vadd.f32 %v2364_v2, %v951_v32  ;;  %v463_v28 = vld [vmem:[%s2359_s22 + $0x8d0] sm:$0xff] }
  0xad   : > { %v1466_v44 = vadd.f32 %v2364_v2, %v952_v33  ;;  %v1467_v45 = vadd.f32 %v2364_v2, %v953_v34  ;;  %v957_v46 = vmul.f32 %v2361_v0, %v443_v30  ;;  %1976 = vst [vmem:[%s2377_s25 + $0x7f8] sm:$0xff] %v1464_v36  ;;  %v1468_v50 = vadd.f32 %v2364_v2, %v954_v37  ;;  %v464_v33 = vld [vmem:[%s2359_s22 + $0x8d8] sm:$0xff]  ;;  %v465_v34 = vld [vmem:[%s2359_s22 + $0x8e0] sm:$0xff] }
  0xae   : > { %v1469_v51 = vadd.f32 %v2364_v2, %v955_v38  ;;  %v1470_v52 = vadd.f32 %v2364_v2, %v956_v39  ;;  %v958_v53 = vmul.f32 %v2361_v0, %v444_v35  ;;  %1977 = vst [vmem:[%s2377_s25 + $0x800] sm:$0xff] %v1465_v43  ;;  %v959_v56 = vmul.f32 %v2361_v0, %v445_v40  ;;  %v466_v35 = vld [vmem:[%s2359_s22 + $0x8e8] sm:$0xff]  ;;  %v467_v40 = vld [vmem:[%s2359_s22 + $0x8f0] sm:$0xff] }
  0xaf   : > { %1978 = vst [vmem:[%s2377_s25 + $0x808] sm:$0xff] %v1466_v44  ;;  %1979 = vst [vmem:[%s2377_s25 + $0x810] sm:$0xff] %v1467_v45  ;;  %v1471_v55 = vadd.f32 %v2364_v2, %v957_v46  ;;  %v960_v57 = vmul.f32 %v2361_v0, %v446_v41  ;;  %v961_v58 = vmul.f32 %v2361_v0, %v447_v42  ;;  %v468_v45 = vld [vmem:[%s2359_s22 + $0x8f8] sm:$0xff] }
  0xb0   : > { %1980 = vst [vmem:[%s2377_s25 + $0x818] sm:$0xff] %v1468_v50  ;;  %1981 = vst [vmem:[%s2377_s25 + $0x820] sm:$0xff] %v1469_v51  ;;  %v1472_v60 = vadd.f32 %v2364_v2, %v958_v53  ;;  %v962_v61 = vmul.f32 %v2361_v0, %v448_v47  ;;  %v963_v62 = vmul.f32 %v2361_v0, %v449_v48  ;;  %v469_v50 = vld [vmem:[%s2359_s22 + $0x900] sm:$0xff]  ;;  %v470_v51 = vld [vmem:[%s2359_s22 + $0x908] sm:$0xff] }
  0xb1   : > { %1982 = vst [vmem:[%s2377_s25 + $0x828] sm:$0xff] %v1470_v52  ;;  %v964_v63 = vmul.f32 %v2361_v0, %v450_v49  ;;  %1983 = vst [vmem:[%s2377_s25 + $0x830] sm:$0xff] %v1471_v55  ;;  %v1473_v5 = vadd.f32 %v2364_v2, %v959_v56  ;;  %v1474_v6 = vadd.f32 %v2364_v2, %v960_v57  ;;  %v471_v52 = vld [vmem:[%s2359_s22 + $0x910] sm:$0xff]  ;;  %v472_v57 = vld [vmem:[%s2359_s22 + $0x918] sm:$0xff] }
  0xb2   : > { %v1475_v7 = vadd.f32 %v2364_v2, %v961_v58  ;;  %v965_v8 = vmul.f32 %v2361_v0, %v451_v54  ;;  %1984 = vst [vmem:[%s2377_s25 + $0x838] sm:$0xff] %v1472_v60  ;;  %v1476_v12 = vadd.f32 %v2364_v2, %v962_v61  ;;  %v1477_v13 = vadd.f32 %v2364_v2, %v963_v62  ;;  %v473_v58 = vld [vmem:[%s2359_s22 + $0x920] sm:$0xff] }
  0xb3   : > { %v1478_v14 = vadd.f32 %v2364_v2, %v964_v63  ;;  %v966_v15 = vmul.f32 %v2361_v0, %v452_v59  ;;  %1985 = vst [vmem:[%s2377_s25 + $0x840] sm:$0xff] %v1473_v5  ;;  %1986 = vst [vmem:[%s2377_s25 + $0x848] sm:$0xff] %v1474_v6  ;;  %v967_v18 = vmul.f32 %v2361_v0, %v453_v1  ;;  %v474_v59 = vld [vmem:[%s2359_s22 + $0x928] sm:$0xff]  ;;  %v475_v1 = vld [vmem:[%s2359_s22 + $0x930] sm:$0xff] }
  0xb4   : > { %1987 = vst [vmem:[%s2377_s25 + $0x850] sm:$0xff] %v1475_v7  ;;  %v1479_v17 = vadd.f32 %v2364_v2, %v965_v8  ;;  %v968_v19 = vmul.f32 %v2361_v0, %v454_v3  ;;  %v969_v20 = vmul.f32 %v2361_v0, %v455_v4  ;;  %1988 = vst [vmem:[%s2377_s25 + $0x858] sm:$0xff] %v1476_v12  ;;  %v476_v7 = vld [vmem:[%s2359_s22 + $0x938] sm:$0xff]  ;;  %v477_v12 = vld [vmem:[%s2359_s22 + $0x940] sm:$0xff] }
  0xb5   : > { %1989 = vst [vmem:[%s2377_s25 + $0x860] sm:$0xff] %v1477_v13  ;;  %1990 = vst [vmem:[%s2377_s25 + $0x868] sm:$0xff] %v1478_v14  ;;  %v1480_v22 = vadd.f32 %v2364_v2, %v966_v15  ;;  %v970_v23 = vmul.f32 %v2361_v0, %v456_v9  ;;  %v971_v24 = vmul.f32 %v2361_v0, %v457_v10  ;;  %v478_v13 = vld [vmem:[%s2359_s22 + $0x948] sm:$0xff]  ;;  %v479_v14 = vld [vmem:[%s2359_s22 + $0x950] sm:$0xff] }
  0xb6   : > { %v972_v25 = vmul.f32 %v2361_v0, %v458_v11  ;;  %1991 = vst [vmem:[%s2377_s25 + $0x870] sm:$0xff] %v1479_v17  ;;  %v1481_v29 = vadd.f32 %v2364_v2, %v967_v18  ;;  %v1482_v30 = vadd.f32 %v2364_v2, %v968_v19  ;;  %v1483_v31 = vadd.f32 %v2364_v2, %v969_v20  ;;  %v480_v19 = vld [vmem:[%s2359_s22 + $0x958] sm:$0xff]  ;;  %v481_v20 = vld [vmem:[%s2359_s22 + $0x960] sm:$0xff] }
  0xb7   : > { %v973_v32 = vmul.f32 %v2361_v0, %v459_v16  ;;  %1992 = vst [vmem:[%s2377_s25 + $0x878] sm:$0xff] %v1480_v22  ;;  %v1484_v36 = vadd.f32 %v2364_v2, %v970_v23  ;;  %v1485_v37 = vadd.f32 %v2364_v2, %v971_v24  ;;  %v974_v39 = vmul.f32 %v2361_v0, %v460_v21  ;;  %v482_v21 = vld [vmem:[%s2359_s22 + $0x968] sm:$0xff] }
  0xb8   : > { %v1486_v38 = vadd.f32 %v2364_v2, %v972_v25  ;;  %1993 = vst [vmem:[%s2377_s25 + $0x880] sm:$0xff] %v1481_v29  ;;  %1994 = vst [vmem:[%s2377_s25 + $0x888] sm:$0xff] %v1482_v30  ;;  %v975_v42 = vmul.f32 %v2361_v0, %v461_v26  ;;  %v976_v43 = vmul.f32 %v2361_v0, %v462_v27  ;;  %v483_v26 = vld [vmem:[%s2359_s22 + $0x970] sm:$0xff] }
  0xb9   : > { %1995 = vst [vmem:[%s2377_s25 + $0x890] sm:$0xff] %v1483_v31  ;;  %v1487_v41 = vadd.f32 %v2364_v2, %v973_v32  ;;  %v977_v44 = vmul.f32 %v2361_v0, %v463_v28  ;;  %1996 = vst [vmem:[%s2377_s25 + $0x898] sm:$0xff] %v1484_v36  ;;  %v1488_v46 = vadd.f32 %v2364_v2, %v974_v39  ;;  %v484_v31 = vld [vmem:[%s2359_s22 + $0x978] sm:$0xff]  ;;  %v485_v36 = vld [vmem:[%s2359_s22 + $0x980] sm:$0xff] }
  0xba   : > { %1997 = vst [vmem:[%s2377_s25 + $0x8a0] sm:$0xff] %v1485_v37  ;;  %1998 = vst [vmem:[%s2377_s25 + $0x8a8] sm:$0xff] %v1486_v38  ;;  %v978_v47 = vmul.f32 %v2361_v0, %v464_v33  ;;  %v979_v48 = vmul.f32 %v2361_v0, %v465_v34  ;;  %v980_v49 = vmul.f32 %v2361_v0, %v466_v35  ;;  %v486_v37 = vld [vmem:[%s2359_s22 + $0x988] sm:$0xff]  ;;  %v487_v38 = vld [vmem:[%s2359_s22 + $0x990] sm:$0xff] }
  0xbb   : > { %1999 = vst [vmem:[%s2377_s25 + $0x8b0] sm:$0xff] %v1487_v41  ;;  %v1489_v53 = vadd.f32 %v2364_v2, %v975_v42  ;;  %v1490_v54 = vadd.f32 %v2364_v2, %v976_v43  ;;  %v1491_v55 = vadd.f32 %v2364_v2, %v977_v44  ;;  %v981_v56 = vmul.f32 %v2361_v0, %v467_v40  ;;  %v488_v43 = vld [vmem:[%s2359_s22 + $0x998] sm:$0xff]  ;;  %v489_v44 = vld [vmem:[%s2359_s22 + $0x9a0] sm:$0xff] }
  0xbc   : > { %2000 = vst [vmem:[%s2377_s25 + $0x8b8] sm:$0xff] %v1488_v46  ;;  %v1492_v60 = vadd.f32 %v2364_v2, %v978_v47  ;;  %v1493_v61 = vadd.f32 %v2364_v2, %v979_v48  ;;  %v1494_v62 = vadd.f32 %v2364_v2, %v980_v49  ;;  %v982_v63 = vmul.f32 %v2361_v0, %v468_v45  ;;  %v490_v45 = vld [vmem:[%s2359_s22 + $0x9a8] sm:$0xff] }
  0xbd   : > { %2001 = vst [vmem:[%s2377_s25 + $0x8c0] sm:$0xff] %v1489_v53  ;;  %2002 = vst [vmem:[%s2377_s25 + $0x8c8] sm:$0xff] %v1490_v54  ;;  %v1495_v3 = vadd.f32 %v2364_v2, %v981_v56  ;;  %v983_v4 = vmul.f32 %v2361_v0, %v469_v50  ;;  %v984_v5 = vmul.f32 %v2361_v0, %v470_v51  ;;  %v491_v50 = vld [vmem:[%s2359_s22 + $0x9b0] sm:$0xff] }
  0xbe   : > { %2003 = vst [vmem:[%s2377_s25 + $0x8d0] sm:$0xff] %v1491_v55  ;;  %v985_v6 = vmul.f32 %v2361_v0, %v471_v52  ;;  %2004 = vst [vmem:[%s2377_s25 + $0x8d8] sm:$0xff] %v1492_v60  ;;  %v1496_v8 = vadd.f32 %v2364_v2, %v982_v63  ;;  %v986_v9 = vmul.f32 %v2361_v0, %v472_v57  ;;  %v492_v55 = vld [vmem:[%s2359_s22 + $0x9b8] sm:$0xff]  ;;  %v493_v60 = vld [vmem:[%s2359_s22 + $0x9c0] sm:$0xff] }
  0xbf   : > { %2005 = vst [vmem:[%s2377_s25 + $0x8e0] sm:$0xff] %v1493_v61  ;;  %2006 = vst [vmem:[%s2377_s25 + $0x8e8] sm:$0xff] %v1494_v62  ;;  %v987_v10 = vmul.f32 %v2361_v0, %v473_v58  ;;  %v988_v11 = vmul.f32 %v2361_v0, %v474_v59  ;;  %v1497_v15 = vadd.f32 %v2364_v2, %v983_v4  ;;  %v494_v61 = vld [vmem:[%s2359_s22 + $0x9c8] sm:$0xff]  ;;  %v495_v62 = vld [vmem:[%s2359_s22 + $0x9d0] sm:$0xff] }
  0xc0   : > { %2007 = vst [vmem:[%s2377_s25 + $0x8f0] sm:$0xff] %v1495_v3  ;;  %v1498_v16 = vadd.f32 %v2364_v2, %v984_v5  ;;  %v1499_v17 = vadd.f32 %v2364_v2, %v985_v6  ;;  %v989_v18 = vmul.f32 %v2361_v0, %v475_v1  ;;  %2008 = vst [vmem:[%s2377_s25 + $0x8f8] sm:$0xff] %v1496_v8  ;;  %v496_v5 = vld [vmem:[%s2359_s22 + $0x9d8] sm:$0xff]  ;;  %v497_v6 = vld [vmem:[%s2359_s22 + $0x9e0] sm:$0xff] }
  0xc1   : > { %v1500_v22 = vadd.f32 %v2364_v2, %v986_v9  ;;  %v1501_v23 = vadd.f32 %v2364_v2, %v987_v10  ;;  %v1502_v24 = vadd.f32 %v2364_v2, %v988_v11  ;;  %v990_v25 = vmul.f32 %v2361_v0, %v476_v7  ;;  %2009 = vst [vmem:[%s2377_s25 + $0x900] sm:$0xff] %v1497_v15  ;;  %v498_v7 = vld [vmem:[%s2359_s22 + $0x9e8] sm:$0xff] }
  0xc2   : > { %2010 = vst [vmem:[%s2377_s25 + $0x908] sm:$0xff] %v1498_v16  ;;  %2011 = vst [vmem:[%s2377_s25 + $0x910] sm:$0xff] %v1499_v17  ;;  %v1503_v27 = vadd.f32 %v2364_v2, %v989_v18  ;;  %v991_v28 = vmul.f32 %v2361_v0, %v477_v12  ;;  %v992_v29 = vmul.f32 %v2361_v0, %v478_v13  ;;  %v499_v12 = vld [vmem:[%s2359_s22 + $0x9f0] sm:$0xff]  ;;  %v500_v17 = vld [vmem:[%s2359_s22 + $0x9f8] sm:$0xff] }
  0xc3   : > { %v993_v30 = vmul.f32 %v2361_v0, %v479_v14  ;;  %2012 = vst [vmem:[%s2377_s25 + $0x918] sm:$0xff] %v1500_v22  ;;  %2013 = vst [vmem:[%s2377_s25 + $0x920] sm:$0xff] %v1501_v23  ;;  %v1504_v32 = vadd.f32 %v2364_v2, %v990_v25  ;;  %v994_v33 = vmul.f32 %v2361_v0, %v480_v19  ;;  %v501_v22 = vld [vmem:[%s2359_s22 + $0xa00] sm:$0xff]  ;;  %v502_v23 = vld [vmem:[%s2359_s22 + $0xa08] sm:$0xff] }
  0xc4   : > { %2014 = vst [vmem:[%s2377_s25 + $0x928] sm:$0xff] %v1502_v24  ;;  %v995_v34 = vmul.f32 %v2361_v0, %v481_v20  ;;  %v996_v35 = vmul.f32 %v2361_v0, %v482_v21  ;;  %2015 = vst [vmem:[%s2377_s25 + $0x930] sm:$0xff] %v1503_v27  ;;  %v1505_v39 = vadd.f32 %v2364_v2, %v991_v28  ;;  %v503_v24 = vld [vmem:[%s2359_s22 + $0xa10] sm:$0xff] }
  0xc5   : > { %v1506_v40 = vadd.f32 %v2364_v2, %v992_v29  ;;  %v1507_v41 = vadd.f32 %v2364_v2, %v993_v30  ;;  %v997_v42 = vmul.f32 %v2361_v0, %v483_v26  ;;  %2016 = vst [vmem:[%s2377_s25 + $0x938] sm:$0xff] %v1504_v32  ;;  %v1508_v46 = vadd.f32 %v2364_v2, %v994_v33  ;;  %v504_v29 = vld [vmem:[%s2359_s22 + $0xa18] sm:$0xff]  ;;  %v505_v30 = vld [vmem:[%s2359_s22 + $0xa20] sm:$0xff] }
  0xc6   : > { %v1509_v47 = vadd.f32 %v2364_v2, %v995_v34  ;;  %v1510_v48 = vadd.f32 %v2364_v2, %v996_v35  ;;  %v998_v49 = vmul.f32 %v2361_v0, %v484_v31  ;;  %2017 = vst [vmem:[%s2377_s25 + $0x940] sm:$0xff] %v1505_v39  ;;  %v999_v52 = vmul.f32 %v2361_v0, %v485_v36  ;;  %v506_v31 = vld [vmem:[%s2359_s22 + $0xa28] sm:$0xff]  ;;  %v507_v36 = vld [vmem:[%s2359_s22 + $0xa30] sm:$0xff] }
  0xc7   : > { %2018 = vst [vmem:[%s2377_s25 + $0x948] sm:$0xff] %v1506_v40  ;;  %2019 = vst [vmem:[%s2377_s25 + $0x950] sm:$0xff] %v1507_v41  ;;  %v1511_v51 = vadd.f32 %v2364_v2, %v997_v42  ;;  %v1000_v53 = vmul.f32 %v2361_v0, %v486_v37  ;;  %v1001_v54 = vmul.f32 %v2361_v0, %v487_v38  ;;  %v508_v41 = vld [vmem:[%s2359_s22 + $0xa38] sm:$0xff] }
  0xc8   : > { %2020 = vst [vmem:[%s2377_s25 + $0x958] sm:$0xff] %v1508_v46  ;;  %2021 = vst [vmem:[%s2377_s25 + $0x960] sm:$0xff] %v1509_v47  ;;  %v1512_v56 = vadd.f32 %v2364_v2, %v998_v49  ;;  %v1002_v57 = vmul.f32 %v2361_v0, %v488_v43  ;;  %v1003_v58 = vmul.f32 %v2361_v0, %v489_v44  ;;  %v509_v46 = vld [vmem:[%s2359_s22 + $0xa40] sm:$0xff]  ;;  %v510_v47 = vld [vmem:[%s2359_s22 + $0xa48] sm:$0xff] }
  0xc9   : > { %2022 = vst [vmem:[%s2377_s25 + $0x968] sm:$0xff] %v1510_v48  ;;  %v1004_v59 = vmul.f32 %v2361_v0, %v490_v45  ;;  %2023 = vst [vmem:[%s2377_s25 + $0x970] sm:$0xff] %v1511_v51  ;;  %v1513_v63 = vadd.f32 %v2364_v2, %v999_v52  ;;  %v1514_v1 = vadd.f32 %v2364_v2, %v1000_v53  ;;  %v511_v48 = vld [vmem:[%s2359_s22 + $0xa50] sm:$0xff]  ;;  %v512_v53 = vld [vmem:[%s2359_s22 + $0xa58] sm:$0xff] }
  0xca   : > { %v1515_v3 = vadd.f32 %v2364_v2, %v1001_v54  ;;  %v1005_v4 = vmul.f32 %v2361_v0, %v491_v50  ;;  %2024 = vst [vmem:[%s2377_s25 + $0x978] sm:$0xff] %v1512_v56  ;;  %v1516_v8 = vadd.f32 %v2364_v2, %v1002_v57  ;;  %v1517_v9 = vadd.f32 %v2364_v2, %v1003_v58  ;;  %v513_v54 = vld [vmem:[%s2359_s22 + $0xa60] sm:$0xff] }
  0xcb   : > { %v1518_v10 = vadd.f32 %v2364_v2, %v1004_v59  ;;  %v1006_v11 = vmul.f32 %v2361_v0, %v492_v55  ;;  %2025 = vst [vmem:[%s2377_s25 + $0x980] sm:$0xff] %v1513_v63  ;;  %2026 = vst [vmem:[%s2377_s25 + $0x988] sm:$0xff] %v1514_v1  ;;  %v1007_v14 = vmul.f32 %v2361_v0, %v493_v60  ;;  %v514_v55 = vld [vmem:[%s2359_s22 + $0xa68] sm:$0xff]  ;;  %v515_v60 = vld [vmem:[%s2359_s22 + $0xa70] sm:$0xff] }
  0xcc   : > { %2027 = vst [vmem:[%s2377_s25 + $0x990] sm:$0xff] %v1515_v3  ;;  %v1519_v13 = vadd.f32 %v2364_v2, %v1005_v4  ;;  %v1008_v15 = vmul.f32 %v2361_v0, %v494_v61  ;;  %v1009_v16 = vmul.f32 %v2361_v0, %v495_v62  ;;  %2028 = vst [vmem:[%s2377_s25 + $0x998] sm:$0xff] %v1516_v8  ;;  %v516_v3 = vld [vmem:[%s2359_s22 + $0xa78] sm:$0xff]  ;;  %v517_v8 = vld [vmem:[%s2359_s22 + $0xa80] sm:$0xff] }
  0xcd   : > { %2029 = vst [vmem:[%s2377_s25 + $0x9a0] sm:$0xff] %v1517_v9  ;;  %2030 = vst [vmem:[%s2377_s25 + $0x9a8] sm:$0xff] %v1518_v10  ;;  %v1520_v18 = vadd.f32 %v2364_v2, %v1006_v11  ;;  %v1010_v19 = vmul.f32 %v2361_v0, %v496_v5  ;;  %v1011_v20 = vmul.f32 %v2361_v0, %v497_v6  ;;  %v518_v9 = vld [vmem:[%s2359_s22 + $0xa88] sm:$0xff]  ;;  %v519_v10 = vld [vmem:[%s2359_s22 + $0xa90] sm:$0xff] }
  0xce   : > { %v1012_v21 = vmul.f32 %v2361_v0, %v498_v7  ;;  %2031 = vst [vmem:[%s2377_s25 + $0x9b0] sm:$0xff] %v1519_v13  ;;  %v1521_v25 = vadd.f32 %v2364_v2, %v1007_v14  ;;  %v1522_v26 = vadd.f32 %v2364_v2, %v1008_v15  ;;  %v1523_v27 = vadd.f32 %v2364_v2, %v1009_v16  ;;  %v520_v15 = vld [vmem:[%s2359_s22 + $0xa98] sm:$0xff]  ;;  %v521_v16 = vld [vmem:[%s2359_s22 + $0xaa0] sm:$0xff] }
  0xcf   : > { %v1013_v28 = vmul.f32 %v2361_v0, %v499_v12  ;;  %2032 = vst [vmem:[%s2377_s25 + $0x9b8] sm:$0xff] %v1520_v18  ;;  %v1524_v32 = vadd.f32 %v2364_v2, %v1010_v19  ;;  %v1525_v33 = vadd.f32 %v2364_v2, %v1011_v20  ;;  %v1014_v35 = vmul.f32 %v2361_v0, %v500_v17  ;;  %v522_v17 = vld [vmem:[%s2359_s22 + $0xaa8] sm:$0xff] }
  0xd0   : > { %v1526_v34 = vadd.f32 %v2364_v2, %v1012_v21  ;;  %2033 = vst [vmem:[%s2377_s25 + $0x9c0] sm:$0xff] %v1521_v25  ;;  %2034 = vst [vmem:[%s2377_s25 + $0x9c8] sm:$0xff] %v1522_v26  ;;  %v1015_v38 = vmul.f32 %v2361_v0, %v501_v22  ;;  %v1016_v39 = vmul.f32 %v2361_v0, %v502_v23  ;;  %v523_v22 = vld [vmem:[%s2359_s22 + $0xab0] sm:$0xff] }
  0xd1   : > { %2035 = vst [vmem:[%s2377_s25 + $0x9d0] sm:$0xff] %v1523_v27  ;;  %v1527_v37 = vadd.f32 %v2364_v2, %v1013_v28  ;;  %v1017_v40 = vmul.f32 %v2361_v0, %v503_v24  ;;  %2036 = vst [vmem:[%s2377_s25 + $0x9d8] sm:$0xff] %v1524_v32  ;;  %v1528_v42 = vadd.f32 %v2364_v2, %v1014_v35  ;;  %v524_v27 = vld [vmem:[%s2359_s22 + $0xab8] sm:$0xff]  ;;  %v525_v32 = vld [vmem:[%s2359_s22 + $0xac0] sm:$0xff] }
  0xd2   : > { %2037 = vst [vmem:[%s2377_s25 + $0x9e0] sm:$0xff] %v1525_v33  ;;  %2038 = vst [vmem:[%s2377_s25 + $0x9e8] sm:$0xff] %v1526_v34  ;;  %v1018_v43 = vmul.f32 %v2361_v0, %v504_v29  ;;  %v1019_v44 = vmul.f32 %v2361_v0, %v505_v30  ;;  %v1020_v45 = vmul.f32 %v2361_v0, %v506_v31  ;;  %v526_v33 = vld [vmem:[%s2359_s22 + $0xac8] sm:$0xff]  ;;  %v527_v34 = vld [vmem:[%s2359_s22 + $0xad0] sm:$0xff] }
  0xd3   : > { %2039 = vst [vmem:[%s2377_s25 + $0x9f0] sm:$0xff] %v1527_v37  ;;  %v1529_v49 = vadd.f32 %v2364_v2, %v1015_v38  ;;  %v1530_v50 = vadd.f32 %v2364_v2, %v1016_v39  ;;  %v1531_v51 = vadd.f32 %v2364_v2, %v1017_v40  ;;  %v1021_v52 = vmul.f32 %v2361_v0, %v507_v36  ;;  %v528_v39 = vld [vmem:[%s2359_s22 + $0xad8] sm:$0xff]  ;;  %v529_v40 = vld [vmem:[%s2359_s22 + $0xae0] sm:$0xff] }
  0xd4   : > { %2040 = vst [vmem:[%s2377_s25 + $0x9f8] sm:$0xff] %v1528_v42  ;;  %v1532_v56 = vadd.f32 %v2364_v2, %v1018_v43  ;;  %v1533_v57 = vadd.f32 %v2364_v2, %v1019_v44  ;;  %v1534_v58 = vadd.f32 %v2364_v2, %v1020_v45  ;;  %v1022_v59 = vmul.f32 %v2361_v0, %v508_v41  ;;  %v530_v41 = vld [vmem:[%s2359_s22 + $0xae8] sm:$0xff] }
  0xd5   : > { %2041 = vst [vmem:[%s2377_s25 + $0xa00] sm:$0xff] %v1529_v49  ;;  %2042 = vst [vmem:[%s2377_s25 + $0xa08] sm:$0xff] %v1530_v50  ;;  %v1535_v61 = vadd.f32 %v2364_v2, %v1021_v52  ;;  %v1023_v62 = vmul.f32 %v2361_v0, %v509_v46  ;;  %v1024_v63 = vmul.f32 %v2361_v0, %v510_v47  ;;  %v531_v46 = vld [vmem:[%s2359_s22 + $0xaf0] sm:$0xff] }
  0xd6   : > { %2043 = vst [vmem:[%s2377_s25 + $0xa10] sm:$0xff] %v1531_v51  ;;  %v1025_v1 = vmul.f32 %v2361_v0, %v511_v48  ;;  %2044 = vst [vmem:[%s2377_s25 + $0xa18] sm:$0xff] %v1532_v56  ;;  %v1536_v4 = vadd.f32 %v2364_v2, %v1022_v59  ;;  %v1026_v5 = vmul.f32 %v2361_v0, %v512_v53  ;;  %v532_v51 = vld [vmem:[%s2359_s22 + $0xaf8] sm:$0xff]  ;;  %v533_v56 = vld [vmem:[%s2359_s22 + $0xb00] sm:$0xff] }
  0xd7   : > { %2045 = vst [vmem:[%s2377_s25 + $0xa20] sm:$0xff] %v1533_v57  ;;  %2046 = vst [vmem:[%s2377_s25 + $0xa28] sm:$0xff] %v1534_v58  ;;  %v1027_v6 = vmul.f32 %v2361_v0, %v513_v54  ;;  %v1028_v7 = vmul.f32 %v2361_v0, %v514_v55  ;;  %v1537_v11 = vadd.f32 %v2364_v2, %v1023_v62  ;;  %v534_v57 = vld [vmem:[%s2359_s22 + $0xb08] sm:$0xff]  ;;  %v535_v58 = vld [vmem:[%s2359_s22 + $0xb10] sm:$0xff] }
  0xd8   : > { %2047 = vst [vmem:[%s2377_s25 + $0xa30] sm:$0xff] %v1535_v61  ;;  %v1538_v12 = vadd.f32 %v2364_v2, %v1024_v63  ;;  %v1539_v13 = vadd.f32 %v2364_v2, %v1025_v1  ;;  %v1029_v14 = vmul.f32 %v2361_v0, %v515_v60  ;;  %2048 = vst [vmem:[%s2377_s25 + $0xa38] sm:$0xff] %v1536_v4  ;;  %v536_v63 = vld [vmem:[%s2359_s22 + $0xb18] sm:$0xff]  ;;  %v537_v1 = vld [vmem:[%s2359_s22 + $0xb20] sm:$0xff] }
  0xd9   : > { %v1540_v18 = vadd.f32 %v2364_v2, %v1026_v5  ;;  %v1541_v19 = vadd.f32 %v2364_v2, %v1027_v6  ;;  %v1542_v20 = vadd.f32 %v2364_v2, %v1028_v7  ;;  %v1030_v21 = vmul.f32 %v2361_v0, %v516_v3  ;;  %2049 = vst [vmem:[%s2377_s25 + $0xa40] sm:$0xff] %v1537_v11  ;;  %v538_v3 = vld [vmem:[%s2359_s22 + $0xb28] sm:$0xff] }
  0xda   : > { %2050 = vst [vmem:[%s2377_s25 + $0xa48] sm:$0xff] %v1538_v12  ;;  %2051 = vst [vmem:[%s2377_s25 + $0xa50] sm:$0xff] %v1539_v13  ;;  %v1543_v23 = vadd.f32 %v2364_v2, %v1029_v14  ;;  %v1031_v24 = vmul.f32 %v2361_v0, %v517_v8  ;;  %v1032_v25 = vmul.f32 %v2361_v0, %v518_v9  ;;  %v539_v8 = vld [vmem:[%s2359_s22 + $0xb30] sm:$0xff]  ;;  %v540_v13 = vld [vmem:[%s2359_s22 + $0xb38] sm:$0xff] }
  0xdb   : > { %v1033_v26 = vmul.f32 %v2361_v0, %v519_v10  ;;  %2052 = vst [vmem:[%s2377_s25 + $0xa58] sm:$0xff] %v1540_v18  ;;  %2053 = vst [vmem:[%s2377_s25 + $0xa60] sm:$0xff] %v1541_v19  ;;  %v1544_v28 = vadd.f32 %v2364_v2, %v1030_v21  ;;  %v1034_v29 = vmul.f32 %v2361_v0, %v520_v15  ;;  %v541_v18 = vld [vmem:[%s2359_s22 + $0xb40] sm:$0xff]  ;;  %v542_v19 = vld [vmem:[%s2359_s22 + $0xb48] sm:$0xff] }
  0xdc   : > { %2054 = vst [vmem:[%s2377_s25 + $0xa68] sm:$0xff] %v1542_v20  ;;  %v1035_v30 = vmul.f32 %v2361_v0, %v521_v16  ;;  %v1036_v31 = vmul.f32 %v2361_v0, %v522_v17  ;;  %2055 = vst [vmem:[%s2377_s25 + $0xa70] sm:$0xff] %v1543_v23  ;;  %v1545_v35 = vadd.f32 %v2364_v2, %v1031_v24  ;;  %v543_v20 = vld [vmem:[%s2359_s22 + $0xb50] sm:$0xff] }
  0xdd   : > { %v1546_v36 = vadd.f32 %v2364_v2, %v1032_v25  ;;  %v1547_v37 = vadd.f32 %v2364_v2, %v1033_v26  ;;  %v1037_v38 = vmul.f32 %v2361_v0, %v523_v22  ;;  %2056 = vst [vmem:[%s2377_s25 + $0xa78] sm:$0xff] %v1544_v28  ;;  %v1548_v42 = vadd.f32 %v2364_v2, %v1034_v29  ;;  %v544_v25 = vld [vmem:[%s2359_s22 + $0xb58] sm:$0xff]  ;;  %v545_v26 = vld [vmem:[%s2359_s22 + $0xb60] sm:$0xff] }
  0xde   : > { %v1549_v43 = vadd.f32 %v2364_v2, %v1035_v30  ;;  %v1550_v44 = vadd.f32 %v2364_v2, %v1036_v31  ;;  %v1038_v45 = vmul.f32 %v2361_v0, %v524_v27  ;;  %2057 = vst [vmem:[%s2377_s25 + $0xa80] sm:$0xff] %v1545_v35  ;;  %v1039_v48 = vmul.f32 %v2361_v0, %v525_v32  ;;  %v546_v27 = vld [vmem:[%s2359_s22 + $0xb68] sm:$0xff]  ;;  %v547_v32 = vld [vmem:[%s2359_s22 + $0xb70] sm:$0xff] }
  0xdf   : > { %2058 = vst [vmem:[%s2377_s25 + $0xa88] sm:$0xff] %v1546_v36  ;;  %2059 = vst [vmem:[%s2377_s25 + $0xa90] sm:$0xff] %v1547_v37  ;;  %v1551_v47 = vadd.f32 %v2364_v2, %v1037_v38  ;;  %v1040_v49 = vmul.f32 %v2361_v0, %v526_v33  ;;  %v1041_v50 = vmul.f32 %v2361_v0, %v527_v34  ;;  %v548_v37 = vld [vmem:[%s2359_s22 + $0xb78] sm:$0xff] }
  0xe0   : > { %2060 = vst [vmem:[%s2377_s25 + $0xa98] sm:$0xff] %v1548_v42  ;;  %2061 = vst [vmem:[%s2377_s25 + $0xaa0] sm:$0xff] %v1549_v43  ;;  %v1552_v52 = vadd.f32 %v2364_v2, %v1038_v45  ;;  %v1042_v53 = vmul.f32 %v2361_v0, %v528_v39  ;;  %v1043_v54 = vmul.f32 %v2361_v0, %v529_v40  ;;  %v549_v42 = vld [vmem:[%s2359_s22 + $0xb80] sm:$0xff]  ;;  %v550_v43 = vld [vmem:[%s2359_s22 + $0xb88] sm:$0xff] }
  0xe1   : > { %2062 = vst [vmem:[%s2377_s25 + $0xaa8] sm:$0xff] %v1550_v44  ;;  %v1044_v55 = vmul.f32 %v2361_v0, %v530_v41  ;;  %2063 = vst [vmem:[%s2377_s25 + $0xab0] sm:$0xff] %v1551_v47  ;;  %v1553_v59 = vadd.f32 %v2364_v2, %v1039_v48  ;;  %v1554_v60 = vadd.f32 %v2364_v2, %v1040_v49  ;;  %v551_v44 = vld [vmem:[%s2359_s22 + $0xb90] sm:$0xff]  ;;  %v552_v49 = vld [vmem:[%s2359_s22 + $0xb98] sm:$0xff] }
  0xe2   : > { %v1555_v61 = vadd.f32 %v2364_v2, %v1041_v50  ;;  %v1045_v62 = vmul.f32 %v2361_v0, %v531_v46  ;;  %2064 = vst [vmem:[%s2377_s25 + $0xab8] sm:$0xff] %v1552_v52  ;;  %v1556_v4 = vadd.f32 %v2364_v2, %v1042_v53  ;;  %v1557_v5 = vadd.f32 %v2364_v2, %v1043_v54  ;;  %v553_v50 = vld [vmem:[%s2359_s22 + $0xba0] sm:$0xff] }
  0xe3   : > { %v1558_v6 = vadd.f32 %v2364_v2, %v1044_v55  ;;  %v1046_v7 = vmul.f32 %v2361_v0, %v532_v51  ;;  %2065 = vst [vmem:[%s2377_s25 + $0xac0] sm:$0xff] %v1553_v59  ;;  %2066 = vst [vmem:[%s2377_s25 + $0xac8] sm:$0xff] %v1554_v60  ;;  %v1047_v10 = vmul.f32 %v2361_v0, %v533_v56  ;;  %v554_v51 = vld [vmem:[%s2359_s22 + $0xba8] sm:$0xff]  ;;  %v555_v56 = vld [vmem:[%s2359_s22 + $0xbb0] sm:$0xff] }
  0xe4   : > { %2067 = vst [vmem:[%s2377_s25 + $0xad0] sm:$0xff] %v1555_v61  ;;  %v1559_v9 = vadd.f32 %v2364_v2, %v1045_v62  ;;  %v1048_v11 = vmul.f32 %v2361_v0, %v534_v57  ;;  %v1049_v12 = vmul.f32 %v2361_v0, %v535_v58  ;;  %2068 = vst [vmem:[%s2377_s25 + $0xad8] sm:$0xff] %v1556_v4  ;;  %v556_v61 = vld [vmem:[%s2359_s22 + $0xbb8] sm:$0xff]  ;;  %v557_v4 = vld [vmem:[%s2359_s22 + $0xbc0] sm:$0xff] }
  0xe5   : > { %2069 = vst [vmem:[%s2377_s25 + $0xae0] sm:$0xff] %v1557_v5  ;;  %2070 = vst [vmem:[%s2377_s25 + $0xae8] sm:$0xff] %v1558_v6  ;;  %v1560_v14 = vadd.f32 %v2364_v2, %v1046_v7  ;;  %v1050_v15 = vmul.f32 %v2361_v0, %v536_v63  ;;  %v1051_v16 = vmul.f32 %v2361_v0, %v537_v1  ;;  %v558_v5 = vld [vmem:[%s2359_s22 + $0xbc8] sm:$0xff]  ;;  %v559_v6 = vld [vmem:[%s2359_s22 + $0xbd0] sm:$0xff] }
  0xe6   : > { %v1052_v17 = vmul.f32 %v2361_v0, %v538_v3  ;;  %2071 = vst [vmem:[%s2377_s25 + $0xaf0] sm:$0xff] %v1559_v9  ;;  %v1561_v21 = vadd.f32 %v2364_v2, %v1047_v10  ;;  %v1562_v22 = vadd.f32 %v2364_v2, %v1048_v11  ;;  %v1563_v23 = vadd.f32 %v2364_v2, %v1049_v12  ;;  %v560_v11 = vld [vmem:[%s2359_s22 + $0xbd8] sm:$0xff]  ;;  %v561_v12 = vld [vmem:[%s2359_s22 + $0xbe0] sm:$0xff] }
  0xe7   : > { %v1053_v24 = vmul.f32 %v2361_v0, %v539_v8  ;;  %2072 = vst [vmem:[%s2377_s25 + $0xaf8] sm:$0xff] %v1560_v14  ;;  %v1564_v28 = vadd.f32 %v2364_v2, %v1050_v15  ;;  %v1565_v29 = vadd.f32 %v2364_v2, %v1051_v16  ;;  %v1054_v31 = vmul.f32 %v2361_v0, %v540_v13  ;;  %v562_v13 = vld [vmem:[%s2359_s22 + $0xbe8] sm:$0xff] }
  0xe8   : > { %v1566_v30 = vadd.f32 %v2364_v2, %v1052_v17  ;;  %2073 = vst [vmem:[%s2377_s25 + $0xb00] sm:$0xff] %v1561_v21  ;;  %2074 = vst [vmem:[%s2377_s25 + $0xb08] sm:$0xff] %v1562_v22  ;;  %v1055_v34 = vmul.f32 %v2361_v0, %v541_v18  ;;  %v1056_v35 = vmul.f32 %v2361_v0, %v542_v19  ;;  %v563_v18 = vld [vmem:[%s2359_s22 + $0xbf0] sm:$0xff] }
  0xe9   : > { %2075 = vst [vmem:[%s2377_s25 + $0xb10] sm:$0xff] %v1563_v23  ;;  %v1567_v33 = vadd.f32 %v2364_v2, %v1053_v24  ;;  %v1057_v36 = vmul.f32 %v2361_v0, %v543_v20  ;;  %2076 = vst [vmem:[%s2377_s25 + $0xb18] sm:$0xff] %v1564_v28  ;;  %v1568_v38 = vadd.f32 %v2364_v2, %v1054_v31  ;;  %v564_v23 = vld [vmem:[%s2359_s22 + $0xbf8] sm:$0xff]  ;;  %v565_v28 = vld [vmem:[%s2359_s22 + $0xc00] sm:$0xff] }
  0xea   : > { %2077 = vst [vmem:[%s2377_s25 + $0xb20] sm:$0xff] %v1565_v29  ;;  %2078 = vst [vmem:[%s2377_s25 + $0xb28] sm:$0xff] %v1566_v30  ;;  %v1058_v39 = vmul.f32 %v2361_v0, %v544_v25  ;;  %v1059_v40 = vmul.f32 %v2361_v0, %v545_v26  ;;  %v1060_v41 = vmul.f32 %v2361_v0, %v546_v27  ;;  %v566_v29 = vld [vmem:[%s2359_s22 + $0xc08] sm:$0xff]  ;;  %v567_v30 = vld [vmem:[%s2359_s22 + $0xc10] sm:$0xff] }
  0xeb   : > { %2079 = vst [vmem:[%s2377_s25 + $0xb30] sm:$0xff] %v1567_v33  ;;  %v1569_v45 = vadd.f32 %v2364_v2, %v1055_v34  ;;  %v1570_v46 = vadd.f32 %v2364_v2, %v1056_v35  ;;  %v1571_v47 = vadd.f32 %v2364_v2, %v1057_v36  ;;  %v1061_v48 = vmul.f32 %v2361_v0, %v547_v32  ;;  %v568_v35 = vld [vmem:[%s2359_s22 + $0xc18] sm:$0xff]  ;;  %v569_v36 = vld [vmem:[%s2359_s22 + $0xc20] sm:$0xff] }
  0xec   : > { %2080 = vst [vmem:[%s2377_s25 + $0xb38] sm:$0xff] %v1568_v38  ;;  %v1572_v52 = vadd.f32 %v2364_v2, %v1058_v39  ;;  %v1573_v53 = vadd.f32 %v2364_v2, %v1059_v40  ;;  %v1574_v54 = vadd.f32 %v2364_v2, %v1060_v41  ;;  %v1062_v55 = vmul.f32 %v2361_v0, %v548_v37  ;;  %v570_v37 = vld [vmem:[%s2359_s22 + $0xc28] sm:$0xff] }
  0xed   : > { %2081 = vst [vmem:[%s2377_s25 + $0xb40] sm:$0xff] %v1569_v45  ;;  %2082 = vst [vmem:[%s2377_s25 + $0xb48] sm:$0xff] %v1570_v46  ;;  %v1575_v57 = vadd.f32 %v2364_v2, %v1061_v48  ;;  %v1063_v58 = vmul.f32 %v2361_v0, %v549_v42  ;;  %v1064_v59 = vmul.f32 %v2361_v0, %v550_v43  ;;  %v571_v42 = vld [vmem:[%s2359_s22 + $0xc30] sm:$0xff] }
  0xee   : > { %2083 = vst [vmem:[%s2377_s25 + $0xb50] sm:$0xff] %v1571_v47  ;;  %v1065_v60 = vmul.f32 %v2361_v0, %v551_v44  ;;  %2084 = vst [vmem:[%s2377_s25 + $0xb58] sm:$0xff] %v1572_v52  ;;  %v1576_v62 = vadd.f32 %v2364_v2, %v1062_v55  ;;  %v1066_v63 = vmul.f32 %v2361_v0, %v552_v49  ;;  %v572_v47 = vld [vmem:[%s2359_s22 + $0xc38] sm:$0xff]  ;;  %v573_v52 = vld [vmem:[%s2359_s22 + $0xc40] sm:$0xff] }
  0xef   : > { %2085 = vst [vmem:[%s2377_s25 + $0xb60] sm:$0xff] %v1573_v53  ;;  %2086 = vst [vmem:[%s2377_s25 + $0xb68] sm:$0xff] %v1574_v54  ;;  %v1067_v1 = vmul.f32 %v2361_v0, %v553_v50  ;;  %v1068_v3 = vmul.f32 %v2361_v0, %v554_v51  ;;  %v1577_v7 = vadd.f32 %v2364_v2, %v1063_v58  ;;  %v574_v53 = vld [vmem:[%s2359_s22 + $0xc48] sm:$0xff]  ;;  %v575_v54 = vld [vmem:[%s2359_s22 + $0xc50] sm:$0xff] }
  0xf0   : > { %2087 = vst [vmem:[%s2377_s25 + $0xb70] sm:$0xff] %v1575_v57  ;;  %v1578_v8 = vadd.f32 %v2364_v2, %v1064_v59  ;;  %v1579_v9 = vadd.f32 %v2364_v2, %v1065_v60  ;;  %v1069_v10 = vmul.f32 %v2361_v0, %v555_v56  ;;  %2088 = vst [vmem:[%s2377_s25 + $0xb78] sm:$0xff] %v1576_v62  ;;  %v576_v59 = vld [vmem:[%s2359_s22 + $0xc58] sm:$0xff]  ;;  %v577_v60 = vld [vmem:[%s2359_s22 + $0xc60] sm:$0xff] }
  0xf1   : > { %v1580_v14 = vadd.f32 %v2364_v2, %v1066_v63  ;;  %v1581_v15 = vadd.f32 %v2364_v2, %v1067_v1  ;;  %v1582_v16 = vadd.f32 %v2364_v2, %v1068_v3  ;;  %v1070_v17 = vmul.f32 %v2361_v0, %v556_v61  ;;  %2089 = vst [vmem:[%s2377_s25 + $0xb80] sm:$0xff] %v1577_v7  ;;  %v578_v61 = vld [vmem:[%s2359_s22 + $0xc68] sm:$0xff] }
  0xf2   : > { %2090 = vst [vmem:[%s2377_s25 + $0xb88] sm:$0xff] %v1578_v8  ;;  %2091 = vst [vmem:[%s2377_s25 + $0xb90] sm:$0xff] %v1579_v9  ;;  %v1583_v19 = vadd.f32 %v2364_v2, %v1069_v10  ;;  %v1071_v20 = vmul.f32 %v2361_v0, %v557_v4  ;;  %v1072_v21 = vmul.f32 %v2361_v0, %v558_v5  ;;  %v579_v4 = vld [vmem:[%s2359_s22 + $0xc70] sm:$0xff]  ;;  %v580_v9 = vld [vmem:[%s2359_s22 + $0xc78] sm:$0xff] }
  0xf3   : > { %v1073_v22 = vmul.f32 %v2361_v0, %v559_v6  ;;  %2092 = vst [vmem:[%s2377_s25 + $0xb98] sm:$0xff] %v1580_v14  ;;  %2093 = vst [vmem:[%s2377_s25 + $0xba0] sm:$0xff] %v1581_v15  ;;  %v1584_v24 = vadd.f32 %v2364_v2, %v1070_v17  ;;  %v1074_v25 = vmul.f32 %v2361_v0, %v560_v11  ;;  %v581_v14 = vld [vmem:[%s2359_s22 + $0xc80] sm:$0xff]  ;;  %v582_v15 = vld [vmem:[%s2359_s22 + $0xc88] sm:$0xff] }
  0xf4   : > { %2094 = vst [vmem:[%s2377_s25 + $0xba8] sm:$0xff] %v1582_v16  ;;  %v1075_v26 = vmul.f32 %v2361_v0, %v561_v12  ;;  %v1076_v27 = vmul.f32 %v2361_v0, %v562_v13  ;;  %2095 = vst [vmem:[%s2377_s25 + $0xbb0] sm:$0xff] %v1583_v19  ;;  %v1585_v31 = vadd.f32 %v2364_v2, %v1071_v20  ;;  %v583_v16 = vld [vmem:[%s2359_s22 + $0xc90] sm:$0xff] }
  0xf5   : > { %v1586_v32 = vadd.f32 %v2364_v2, %v1072_v21  ;;  %v1587_v33 = vadd.f32 %v2364_v2, %v1073_v22  ;;  %v1077_v34 = vmul.f32 %v2361_v0, %v563_v18  ;;  %2096 = vst [vmem:[%s2377_s25 + $0xbb8] sm:$0xff] %v1584_v24  ;;  %v1588_v38 = vadd.f32 %v2364_v2, %v1074_v25  ;;  %v584_v21 = vld [vmem:[%s2359_s22 + $0xc98] sm:$0xff]  ;;  %v585_v22 = vld [vmem:[%s2359_s22 + $0xca0] sm:$0xff] }
  0xf6   : > { %v1589_v39 = vadd.f32 %v2364_v2, %v1075_v26  ;;  %v1590_v40 = vadd.f32 %v2364_v2, %v1076_v27  ;;  %v1078_v41 = vmul.f32 %v2361_v0, %v564_v23  ;;  %2097 = vst [vmem:[%s2377_s25 + $0xbc0] sm:$0xff] %v1585_v31  ;;  %v1079_v44 = vmul.f32 %v2361_v0, %v565_v28  ;;  %v586_v23 = vld [vmem:[%s2359_s22 + $0xca8] sm:$0xff]  ;;  %v587_v28 = vld [vmem:[%s2359_s22 + $0xcb0] sm:$0xff] }
  0xf7   : > { %2098 = vst [vmem:[%s2377_s25 + $0xbc8] sm:$0xff] %v1586_v32  ;;  %2099 = vst [vmem:[%s2377_s25 + $0xbd0] sm:$0xff] %v1587_v33  ;;  %v1591_v43 = vadd.f32 %v2364_v2, %v1077_v34  ;;  %v1080_v45 = vmul.f32 %v2361_v0, %v566_v29  ;;  %v1081_v46 = vmul.f32 %v2361_v0, %v567_v30  ;;  %v588_v33 = vld [vmem:[%s2359_s22 + $0xcb8] sm:$0xff] }
  0xf8   : > { %2100 = vst [vmem:[%s2377_s25 + $0xbd8] sm:$0xff] %v1588_v38  ;;  %2101 = vst [vmem:[%s2377_s25 + $0xbe0] sm:$0xff] %v1589_v39  ;;  %v1592_v48 = vadd.f32 %v2364_v2, %v1078_v41  ;;  %v1082_v49 = vmul.f32 %v2361_v0, %v568_v35  ;;  %v1083_v50 = vmul.f32 %v2361_v0, %v569_v36  ;;  %v589_v38 = vld [vmem:[%s2359_s22 + $0xcc0] sm:$0xff]  ;;  %v590_v39 = vld [vmem:[%s2359_s22 + $0xcc8] sm:$0xff] }
  0xf9   : > { %2102 = vst [vmem:[%s2377_s25 + $0xbe8] sm:$0xff] %v1590_v40  ;;  %v1084_v51 = vmul.f32 %v2361_v0, %v570_v37  ;;  %2103 = vst [vmem:[%s2377_s25 + $0xbf0] sm:$0xff] %v1591_v43  ;;  %v1593_v55 = vadd.f32 %v2364_v2, %v1079_v44  ;;  %v1594_v56 = vadd.f32 %v2364_v2, %v1080_v45  ;;  %v591_v40 = vld [vmem:[%s2359_s22 + $0xcd0] sm:$0xff]  ;;  %v592_v45 = vld [vmem:[%s2359_s22 + $0xcd8] sm:$0xff] }
  0xfa   : > { %v1595_v57 = vadd.f32 %v2364_v2, %v1081_v46  ;;  %v1085_v58 = vmul.f32 %v2361_v0, %v571_v42  ;;  %2104 = vst [vmem:[%s2377_s25 + $0xbf8] sm:$0xff] %v1592_v48  ;;  %v1596_v62 = vadd.f32 %v2364_v2, %v1082_v49  ;;  %v1597_v63 = vadd.f32 %v2364_v2, %v1083_v50  ;;  %v593_v46 = vld [vmem:[%s2359_s22 + $0xce0] sm:$0xff] }
  0xfb   : > { %v1598_v1 = vadd.f32 %v2364_v2, %v1084_v51  ;;  %v1086_v3 = vmul.f32 %v2361_v0, %v572_v47  ;;  %2105 = vst [vmem:[%s2377_s25 + $0xc00] sm:$0xff] %v1593_v55  ;;  %2106 = vst [vmem:[%s2377_s25 + $0xc08] sm:$0xff] %v1594_v56  ;;  %v1087_v6 = vmul.f32 %v2361_v0, %v573_v52  ;;  %v594_v47 = vld [vmem:[%s2359_s22 + $0xce8] sm:$0xff]  ;;  %v595_v52 = vld [vmem:[%s2359_s22 + $0xcf0] sm:$0xff] }
  0xfc   : > { %2107 = vst [vmem:[%s2377_s25 + $0xc10] sm:$0xff] %v1595_v57  ;;  %v1599_v5 = vadd.f32 %v2364_v2, %v1085_v58  ;;  %v1088_v7 = vmul.f32 %v2361_v0, %v574_v53  ;;  %v1089_v8 = vmul.f32 %v2361_v0, %v575_v54  ;;  %2108 = vst [vmem:[%s2377_s25 + $0xc18] sm:$0xff] %v1596_v62  ;;  %v596_v57 = vld [vmem:[%s2359_s22 + $0xcf8] sm:$0xff]  ;;  %v597_v62 = vld [vmem:[%s2359_s22 + $0xd00] sm:$0xff] }
  0xfd   : > { %2109 = vst [vmem:[%s2377_s25 + $0xc20] sm:$0xff] %v1597_v63  ;;  %2110 = vst [vmem:[%s2377_s25 + $0xc28] sm:$0xff] %v1598_v1  ;;  %v1600_v10 = vadd.f32 %v2364_v2, %v1086_v3  ;;  %v1090_v11 = vmul.f32 %v2361_v0, %v576_v59  ;;  %v1091_v12 = vmul.f32 %v2361_v0, %v577_v60  ;;  %v598_v63 = vld [vmem:[%s2359_s22 + $0xd08] sm:$0xff]  ;;  %v599_v1 = vld [vmem:[%s2359_s22 + $0xd10] sm:$0xff] }
  0xfe   : > { %v1092_v13 = vmul.f32 %v2361_v0, %v578_v61  ;;  %2111 = vst [vmem:[%s2377_s25 + $0xc30] sm:$0xff] %v1599_v5  ;;  %v1601_v17 = vadd.f32 %v2364_v2, %v1087_v6  ;;  %v1602_v18 = vadd.f32 %v2364_v2, %v1088_v7  ;;  %v1603_v19 = vadd.f32 %v2364_v2, %v1089_v8  ;;  %v600_v7 = vld [vmem:[%s2359_s22 + $0xd18] sm:$0xff]  ;;  %v601_v8 = vld [vmem:[%s2359_s22 + $0xd20] sm:$0xff] }
  0xff   : > { %v1093_v20 = vmul.f32 %v2361_v0, %v579_v4  ;;  %2112 = vst [vmem:[%s2377_s25 + $0xc38] sm:$0xff] %v1600_v10  ;;  %v1604_v24 = vadd.f32 %v2364_v2, %v1090_v11  ;;  %v1605_v25 = vadd.f32 %v2364_v2, %v1091_v12  ;;  %v1094_v27 = vmul.f32 %v2361_v0, %v580_v9  ;;  %v602_v9 = vld [vmem:[%s2359_s22 + $0xd28] sm:$0xff] }
 0x100   : > { %v1606_v26 = vadd.f32 %v2364_v2, %v1092_v13  ;;  %2113 = vst [vmem:[%s2377_s25 + $0xc40] sm:$0xff] %v1601_v17  ;;  %2114 = vst [vmem:[%s2377_s25 + $0xc48] sm:$0xff] %v1602_v18  ;;  %v1095_v30 = vmul.f32 %v2361_v0, %v581_v14  ;;  %v1096_v31 = vmul.f32 %v2361_v0, %v582_v15  ;;  %v603_v14 = vld [vmem:[%s2359_s22 + $0xd30] sm:$0xff] }
 0x101   : > { %2115 = vst [vmem:[%s2377_s25 + $0xc50] sm:$0xff] %v1603_v19  ;;  %v1607_v29 = vadd.f32 %v2364_v2, %v1093_v20  ;;  %v1097_v32 = vmul.f32 %v2361_v0, %v583_v16  ;;  %2116 = vst [vmem:[%s2377_s25 + $0xc58] sm:$0xff] %v1604_v24  ;;  %v1608_v34 = vadd.f32 %v2364_v2, %v1094_v27  ;;  %v604_v19 = vld [vmem:[%s2359_s22 + $0xd38] sm:$0xff]  ;;  %v605_v24 = vld [vmem:[%s2359_s22 + $0xd40] sm:$0xff] }
 0x102   : > { %2117 = vst [vmem:[%s2377_s25 + $0xc60] sm:$0xff] %v1605_v25  ;;  %2118 = vst [vmem:[%s2377_s25 + $0xc68] sm:$0xff] %v1606_v26  ;;  %v1098_v35 = vmul.f32 %v2361_v0, %v584_v21  ;;  %v1099_v36 = vmul.f32 %v2361_v0, %v585_v22  ;;  %v1100_v37 = vmul.f32 %v2361_v0, %v586_v23  ;;  %v606_v25 = vld [vmem:[%s2359_s22 + $0xd48] sm:$0xff]  ;;  %v607_v26 = vld [vmem:[%s2359_s22 + $0xd50] sm:$0xff] }
 0x103   : > { %2119 = vst [vmem:[%s2377_s25 + $0xc70] sm:$0xff] %v1607_v29  ;;  %v1609_v41 = vadd.f32 %v2364_v2, %v1095_v30  ;;  %v1610_v42 = vadd.f32 %v2364_v2, %v1096_v31  ;;  %v1611_v43 = vadd.f32 %v2364_v2, %v1097_v32  ;;  %v1101_v44 = vmul.f32 %v2361_v0, %v587_v28  ;;  %v608_v31 = vld [vmem:[%s2359_s22 + $0xd58] sm:$0xff]  ;;  %v609_v32 = vld [vmem:[%s2359_s22 + $0xd60] sm:$0xff] }
 0x104   : > { %2120 = vst [vmem:[%s2377_s25 + $0xc78] sm:$0xff] %v1608_v34  ;;  %v1612_v48 = vadd.f32 %v2364_v2, %v1098_v35  ;;  %v1613_v49 = vadd.f32 %v2364_v2, %v1099_v36  ;;  %v1614_v50 = vadd.f32 %v2364_v2, %v1100_v37  ;;  %v1102_v51 = vmul.f32 %v2361_v0, %v588_v33  ;;  %v610_v33 = vld [vmem:[%s2359_s22 + $0xd68] sm:$0xff] }
 0x105   : > { %2121 = vst [vmem:[%s2377_s25 + $0xc80] sm:$0xff] %v1609_v41  ;;  %2122 = vst [vmem:[%s2377_s25 + $0xc88] sm:$0xff] %v1610_v42  ;;  %v1615_v53 = vadd.f32 %v2364_v2, %v1101_v44  ;;  %v1103_v54 = vmul.f32 %v2361_v0, %v589_v38  ;;  %v1104_v55 = vmul.f32 %v2361_v0, %v590_v39  ;;  %v611_v38 = vld [vmem:[%s2359_s22 + $0xd70] sm:$0xff] }
 0x106   : > { %2123 = vst [vmem:[%s2377_s25 + $0xc90] sm:$0xff] %v1611_v43  ;;  %v1105_v56 = vmul.f32 %v2361_v0, %v591_v40  ;;  %2124 = vst [vmem:[%s2377_s25 + $0xc98] sm:$0xff] %v1612_v48  ;;  %v1616_v58 = vadd.f32 %v2364_v2, %v1102_v51  ;;  %v1106_v59 = vmul.f32 %v2361_v0, %v592_v45  ;;  %v612_v43 = vld [vmem:[%s2359_s22 + $0xd78] sm:$0xff]  ;;  %v613_v48 = vld [vmem:[%s2359_s22 + $0xd80] sm:$0xff] }
 0x107   : > { %2125 = vst [vmem:[%s2377_s25 + $0xca0] sm:$0xff] %v1613_v49  ;;  %2126 = vst [vmem:[%s2377_s25 + $0xca8] sm:$0xff] %v1614_v50  ;;  %v1107_v60 = vmul.f32 %v2361_v0, %v593_v46  ;;  %v1108_v61 = vmul.f32 %v2361_v0, %v594_v47  ;;  %v1617_v3 = vadd.f32 %v2364_v2, %v1103_v54  ;;  %v614_v49 = vld [vmem:[%s2359_s22 + $0xd88] sm:$0xff]  ;;  %v615_v50 = vld [vmem:[%s2359_s22 + $0xd90] sm:$0xff] }
 0x108   : > { %2127 = vst [vmem:[%s2377_s25 + $0xcb0] sm:$0xff] %v1615_v53  ;;  %v1618_v4 = vadd.f32 %v2364_v2, %v1104_v55  ;;  %v1619_v5 = vadd.f32 %v2364_v2, %v1105_v56  ;;  %v1109_v6 = vmul.f32 %v2361_v0, %v595_v52  ;;  %2128 = vst [vmem:[%s2377_s25 + $0xcb8] sm:$0xff] %v1616_v58  ;;  %v616_v55 = vld [vmem:[%s2359_s22 + $0xd98] sm:$0xff]  ;;  %v617_v56 = vld [vmem:[%s2359_s22 + $0xda0] sm:$0xff] }
 0x109   : > { %v1620_v10 = vadd.f32 %v2364_v2, %v1106_v59  ;;  %v1621_v11 = vadd.f32 %v2364_v2, %v1107_v60  ;;  %v1622_v12 = vadd.f32 %v2364_v2, %v1108_v61  ;;  %v1110_v13 = vmul.f32 %v2361_v0, %v596_v57  ;;  %2129 = vst [vmem:[%s2377_s25 + $0xcc0] sm:$0xff] %v1617_v3  ;;  %v618_v57 = vld [vmem:[%s2359_s22 + $0xda8] sm:$0xff] }
 0x10a   : > { %2130 = vst [vmem:[%s2377_s25 + $0xcc8] sm:$0xff] %v1618_v4  ;;  %2131 = vst [vmem:[%s2377_s25 + $0xcd0] sm:$0xff] %v1619_v5  ;;  %v1623_v15 = vadd.f32 %v2364_v2, %v1109_v6  ;;  %v1111_v16 = vmul.f32 %v2361_v0, %v597_v62  ;;  %v1112_v17 = vmul.f32 %v2361_v0, %v598_v63  ;;  %v619_v62 = vld [vmem:[%s2359_s22 + $0xdb0] sm:$0xff]  ;;  %v620_v5 = vld [vmem:[%s2359_s22 + $0xdb8] sm:$0xff] }
 0x10b   : > { %v1113_v18 = vmul.f32 %v2361_v0, %v599_v1  ;;  %2132 = vst [vmem:[%s2377_s25 + $0xcd8] sm:$0xff] %v1620_v10  ;;  %2133 = vst [vmem:[%s2377_s25 + $0xce0] sm:$0xff] %v1621_v11  ;;  %v1624_v20 = vadd.f32 %v2364_v2, %v1110_v13  ;;  %v1114_v21 = vmul.f32 %v2361_v0, %v600_v7  ;;  %v621_v10 = vld [vmem:[%s2359_s22 + $0xdc0] sm:$0xff]  ;;  %v622_v11 = vld [vmem:[%s2359_s22 + $0xdc8] sm:$0xff] }
 0x10c   : > { %2134 = vst [vmem:[%s2377_s25 + $0xce8] sm:$0xff] %v1622_v12  ;;  %v1115_v22 = vmul.f32 %v2361_v0, %v601_v8  ;;  %v1116_v23 = vmul.f32 %v2361_v0, %v602_v9  ;;  %2135 = vst [vmem:[%s2377_s25 + $0xcf0] sm:$0xff] %v1623_v15  ;;  %v1625_v27 = vadd.f32 %v2364_v2, %v1111_v16  ;;  %v623_v12 = vld [vmem:[%s2359_s22 + $0xdd0] sm:$0xff] }
 0x10d   : > { %v1626_v28 = vadd.f32 %v2364_v2, %v1112_v17  ;;  %v1627_v29 = vadd.f32 %v2364_v2, %v1113_v18  ;;  %v1117_v30 = vmul.f32 %v2361_v0, %v603_v14  ;;  %2136 = vst [vmem:[%s2377_s25 + $0xcf8] sm:$0xff] %v1624_v20  ;;  %v1628_v34 = vadd.f32 %v2364_v2, %v1114_v21  ;;  %v624_v17 = vld [vmem:[%s2359_s22 + $0xdd8] sm:$0xff]  ;;  %v625_v18 = vld [vmem:[%s2359_s22 + $0xde0] sm:$0xff] }
 0x10e   : > { %v1629_v35 = vadd.f32 %v2364_v2, %v1115_v22  ;;  %v1630_v36 = vadd.f32 %v2364_v2, %v1116_v23  ;;  %v1118_v37 = vmul.f32 %v2361_v0, %v604_v19  ;;  %2137 = vst [vmem:[%s2377_s25 + $0xd00] sm:$0xff] %v1625_v27  ;;  %v1119_v40 = vmul.f32 %v2361_v0, %v605_v24  ;;  %v626_v19 = vld [vmem:[%s2359_s22 + $0xde8] sm:$0xff]  ;;  %v627_v24 = vld [vmem:[%s2359_s22 + $0xdf0] sm:$0xff] }
 0x10f   : > { %2138 = vst [vmem:[%s2377_s25 + $0xd08] sm:$0xff] %v1626_v28  ;;  %2139 = vst [vmem:[%s2377_s25 + $0xd10] sm:$0xff] %v1627_v29  ;;  %v1631_v39 = vadd.f32 %v2364_v2, %v1117_v30  ;;  %v1120_v41 = vmul.f32 %v2361_v0, %v606_v25  ;;  %v1121_v42 = vmul.f32 %v2361_v0, %v607_v26  ;;  %v628_v29 = vld [vmem:[%s2359_s22 + $0xdf8] sm:$0xff] }
 0x110   : > { %2140 = vst [vmem:[%s2377_s25 + $0xd18] sm:$0xff] %v1628_v34  ;;  %2141 = vst [vmem:[%s2377_s25 + $0xd20] sm:$0xff] %v1629_v35  ;;  %v1632_v44 = vadd.f32 %v2364_v2, %v1118_v37  ;;  %v1122_v45 = vmul.f32 %v2361_v0, %v608_v31  ;;  %v1123_v46 = vmul.f32 %v2361_v0, %v609_v32  ;;  %v629_v34 = vld [vmem:[%s2359_s22 + $0xe00] sm:$0xff]  ;;  %v630_v35 = vld [vmem:[%s2359_s22 + $0xe08] sm:$0xff] }
 0x111   : > { %2142 = vst [vmem:[%s2377_s25 + $0xd28] sm:$0xff] %v1630_v36  ;;  %v1124_v47 = vmul.f32 %v2361_v0, %v610_v33  ;;  %2143 = vst [vmem:[%s2377_s25 + $0xd30] sm:$0xff] %v1631_v39  ;;  %v1633_v51 = vadd.f32 %v2364_v2, %v1119_v40  ;;  %v1634_v52 = vadd.f32 %v2364_v2, %v1120_v41  ;;  %v631_v36 = vld [vmem:[%s2359_s22 + $0xe10] sm:$0xff]  ;;  %v632_v41 = vld [vmem:[%s2359_s22 + $0xe18] sm:$0xff] }
 0x112   : > { %v1635_v53 = vadd.f32 %v2364_v2, %v1121_v42  ;;  %v1125_v54 = vmul.f32 %v2361_v0, %v611_v38  ;;  %2144 = vst [vmem:[%s2377_s25 + $0xd38] sm:$0xff] %v1632_v44  ;;  %v1636_v58 = vadd.f32 %v2364_v2, %v1122_v45  ;;  %v1637_v59 = vadd.f32 %v2364_v2, %v1123_v46  ;;  %v633_v42 = vld [vmem:[%s2359_s22 + $0xe20] sm:$0xff] }
 0x113   : > { %v1638_v60 = vadd.f32 %v2364_v2, %v1124_v47  ;;  %v1126_v61 = vmul.f32 %v2361_v0, %v612_v43  ;;  %2145 = vst [vmem:[%s2377_s25 + $0xd40] sm:$0xff] %v1633_v51  ;;  %2146 = vst [vmem:[%s2377_s25 + $0xd48] sm:$0xff] %v1634_v52  ;;  %v1127_v1 = vmul.f32 %v2361_v0, %v613_v48  ;;  %v634_v43 = vld [vmem:[%s2359_s22 + $0xe28] sm:$0xff]  ;;  %v635_v48 = vld [vmem:[%s2359_s22 + $0xe30] sm:$0xff] }
 0x114   : > { %2147 = vst [vmem:[%s2377_s25 + $0xd50] sm:$0xff] %v1635_v53  ;;  %v1639_v63 = vadd.f32 %v2364_v2, %v1125_v54  ;;  %v1128_v3 = vmul.f32 %v2361_v0, %v614_v49  ;;  %v1129_v4 = vmul.f32 %v2361_v0, %v615_v50  ;;  %2148 = vst [vmem:[%s2377_s25 + $0xd58] sm:$0xff] %v1636_v58  ;;  %v636_v53 = vld [vmem:[%s2359_s22 + $0xe38] sm:$0xff]  ;;  %v637_v58 = vld [vmem:[%s2359_s22 + $0xe40] sm:$0xff] }
 0x115   : > { %2149 = vst [vmem:[%s2377_s25 + $0xd60] sm:$0xff] %v1637_v59  ;;  %2150 = vst [vmem:[%s2377_s25 + $0xd68] sm:$0xff] %v1638_v60  ;;  %v1640_v6 = vadd.f32 %v2364_v2, %v1126_v61  ;;  %v1130_v7 = vmul.f32 %v2361_v0, %v616_v55  ;;  %v1131_v8 = vmul.f32 %v2361_v0, %v617_v56  ;;  %v638_v59 = vld [vmem:[%s2359_s22 + $0xe48] sm:$0xff]  ;;  %v639_v60 = vld [vmem:[%s2359_s22 + $0xe50] sm:$0xff] }
 0x116   : > { %v1132_v9 = vmul.f32 %v2361_v0, %v618_v57  ;;  %2151 = vst [vmem:[%s2377_s25 + $0xd70] sm:$0xff] %v1639_v63  ;;  %v1641_v13 = vadd.f32 %v2364_v2, %v1127_v1  ;;  %v1642_v14 = vadd.f32 %v2364_v2, %v1128_v3  ;;  %v1643_v15 = vadd.f32 %v2364_v2, %v1129_v4  ;;  %v640_v3 = vld [vmem:[%s2359_s22 + $0xe58] sm:$0xff]  ;;  %v641_v4 = vld [vmem:[%s2359_s22 + $0xe60] sm:$0xff] }
 0x117   : > { %v1133_v16 = vmul.f32 %v2361_v0, %v619_v62  ;;  %2152 = vst [vmem:[%s2377_s25 + $0xd78] sm:$0xff] %v1640_v6  ;;  %v1644_v20 = vadd.f32 %v2364_v2, %v1130_v7  ;;  %v1645_v21 = vadd.f32 %v2364_v2, %v1131_v8  ;;  %v1134_v23 = vmul.f32 %v2361_v0, %v620_v5  ;;  %v642_v5 = vld [vmem:[%s2359_s22 + $0xe68] sm:$0xff] }
 0x118   : > { %v1646_v22 = vadd.f32 %v2364_v2, %v1132_v9  ;;  %2153 = vst [vmem:[%s2377_s25 + $0xd80] sm:$0xff] %v1641_v13  ;;  %2154 = vst [vmem:[%s2377_s25 + $0xd88] sm:$0xff] %v1642_v14  ;;  %v1135_v26 = vmul.f32 %v2361_v0, %v621_v10  ;;  %v1136_v27 = vmul.f32 %v2361_v0, %v622_v11  ;;  %v643_v10 = vld [vmem:[%s2359_s22 + $0xe70] sm:$0xff] }
 0x119   : > { %2155 = vst [vmem:[%s2377_s25 + $0xd90] sm:$0xff] %v1643_v15  ;;  %v1647_v25 = vadd.f32 %v2364_v2, %v1133_v16  ;;  %v1137_v28 = vmul.f32 %v2361_v0, %v623_v12  ;;  %2156 = vst [vmem:[%s2377_s25 + $0xd98] sm:$0xff] %v1644_v20  ;;  %v1648_v30 = vadd.f32 %v2364_v2, %v1134_v23  ;;  %v644_v15 = vld [vmem:[%s2359_s22 + $0xe78] sm:$0xff]  ;;  %v645_v20 = vld [vmem:[%s2359_s22 + $0xe80] sm:$0xff] }
 0x11a   : > { %2157 = vst [vmem:[%s2377_s25 + $0xda0] sm:$0xff] %v1645_v21  ;;  %2158 = vst [vmem:[%s2377_s25 + $0xda8] sm:$0xff] %v1646_v22  ;;  %v1138_v31 = vmul.f32 %v2361_v0, %v624_v17  ;;  %v1139_v32 = vmul.f32 %v2361_v0, %v625_v18  ;;  %v1140_v33 = vmul.f32 %v2361_v0, %v626_v19  ;;  %v646_v21 = vld [vmem:[%s2359_s22 + $0xe88] sm:$0xff]  ;;  %v647_v22 = vld [vmem:[%s2359_s22 + $0xe90] sm:$0xff] }
 0x11b   : > { %2159 = vst [vmem:[%s2377_s25 + $0xdb0] sm:$0xff] %v1647_v25  ;;  %v1649_v37 = vadd.f32 %v2364_v2, %v1135_v26  ;;  %v1650_v38 = vadd.f32 %v2364_v2, %v1136_v27  ;;  %v1651_v39 = vadd.f32 %v2364_v2, %v1137_v28  ;;  %v1141_v40 = vmul.f32 %v2361_v0, %v627_v24  ;;  %v648_v27 = vld [vmem:[%s2359_s22 + $0xe98] sm:$0xff]  ;;  %v649_v28 = vld [vmem:[%s2359_s22 + $0xea0] sm:$0xff] }
 0x11c   : > { %2160 = vst [vmem:[%s2377_s25 + $0xdb8] sm:$0xff] %v1648_v30  ;;  %v1652_v44 = vadd.f32 %v2364_v2, %v1138_v31  ;;  %v1653_v45 = vadd.f32 %v2364_v2, %v1139_v32  ;;  %v1654_v46 = vadd.f32 %v2364_v2, %v1140_v33  ;;  %v1142_v47 = vmul.f32 %v2361_v0, %v628_v29  ;;  %v650_v29 = vld [vmem:[%s2359_s22 + $0xea8] sm:$0xff] }
 0x11d   : > { %2161 = vst [vmem:[%s2377_s25 + $0xdc0] sm:$0xff] %v1649_v37  ;;  %2162 = vst [vmem:[%s2377_s25 + $0xdc8] sm:$0xff] %v1650_v38  ;;  %v1655_v49 = vadd.f32 %v2364_v2, %v1141_v40  ;;  %v1143_v50 = vmul.f32 %v2361_v0, %v629_v34  ;;  %v1144_v51 = vmul.f32 %v2361_v0, %v630_v35  ;;  %v651_v34 = vld [vmem:[%s2359_s22 + $0xeb0] sm:$0xff] }
 0x11e   : > { %2163 = vst [vmem:[%s2377_s25 + $0xdd0] sm:$0xff] %v1651_v39  ;;  %v1145_v52 = vmul.f32 %v2361_v0, %v631_v36  ;;  %2164 = vst [vmem:[%s2377_s25 + $0xdd8] sm:$0xff] %v1652_v44  ;;  %v1656_v54 = vadd.f32 %v2364_v2, %v1142_v47  ;;  %v1146_v55 = vmul.f32 %v2361_v0, %v632_v41  ;;  %v652_v39 = vld [vmem:[%s2359_s22 + $0xeb8] sm:$0xff]  ;;  %v653_v44 = vld [vmem:[%s2359_s22 + $0xec0] sm:$0xff] }
 0x11f   : > { %2165 = vst [vmem:[%s2377_s25 + $0xde0] sm:$0xff] %v1653_v45  ;;  %2166 = vst [vmem:[%s2377_s25 + $0xde8] sm:$0xff] %v1654_v46  ;;  %v1147_v56 = vmul.f32 %v2361_v0, %v633_v42  ;;  %v1148_v57 = vmul.f32 %v2361_v0, %v634_v43  ;;  %v1657_v61 = vadd.f32 %v2364_v2, %v1143_v50  ;;  %v654_v45 = vld [vmem:[%s2359_s22 + $0xec8] sm:$0xff]  ;;  %v655_v46 = vld [vmem:[%s2359_s22 + $0xed0] sm:$0xff] }
 0x120   : > { %2167 = vst [vmem:[%s2377_s25 + $0xdf0] sm:$0xff] %v1655_v49  ;;  %v1658_v62 = vadd.f32 %v2364_v2, %v1144_v51  ;;  %v1659_v63 = vadd.f32 %v2364_v2, %v1145_v52  ;;  %v1149_v1 = vmul.f32 %v2361_v0, %v635_v48  ;;  %2168 = vst [vmem:[%s2377_s25 + $0xdf8] sm:$0xff] %v1656_v54  ;;  %v656_v51 = vld [vmem:[%s2359_s22 + $0xed8] sm:$0xff]  ;;  %v657_v52 = vld [vmem:[%s2359_s22 + $0xee0] sm:$0xff] }
 0x121   : > { %v1660_v6 = vadd.f32 %v2364_v2, %v1146_v55  ;;  %v1661_v7 = vadd.f32 %v2364_v2, %v1147_v56  ;;  %v1662_v8 = vadd.f32 %v2364_v2, %v1148_v57  ;;  %v1150_v9 = vmul.f32 %v2361_v0, %v636_v53  ;;  %2169 = vst [vmem:[%s2377_s25 + $0xe00] sm:$0xff] %v1657_v61  ;;  %v658_v53 = vld [vmem:[%s2359_s22 + $0xee8] sm:$0xff] }
 0x122   : > { %2170 = vst [vmem:[%s2377_s25 + $0xe08] sm:$0xff] %v1658_v62  ;;  %2171 = vst [vmem:[%s2377_s25 + $0xe10] sm:$0xff] %v1659_v63  ;;  %v1663_v11 = vadd.f32 %v2364_v2, %v1149_v1  ;;  %v1151_v12 = vmul.f32 %v2361_v0, %v637_v58  ;;  %v1152_v13 = vmul.f32 %v2361_v0, %v638_v59  ;;  %v659_v58 = vld [vmem:[%s2359_s22 + $0xef0] sm:$0xff]  ;;  %v660_v63 = vld [vmem:[%s2359_s22 + $0xef8] sm:$0xff] }
 0x123   : > { %v1153_v14 = vmul.f32 %v2361_v0, %v639_v60  ;;  %2172 = vst [vmem:[%s2377_s25 + $0xe18] sm:$0xff] %v1660_v6  ;;  %2173 = vst [vmem:[%s2377_s25 + $0xe20] sm:$0xff] %v1661_v7  ;;  %v1664_v16 = vadd.f32 %v2364_v2, %v1150_v9  ;;  %v1154_v17 = vmul.f32 %v2361_v0, %v640_v3  ;;  %v661_v6 = vld [vmem:[%s2359_s22 + $0xf00] sm:$0xff]  ;;  %v662_v7 = vld [vmem:[%s2359_s22 + $0xf08] sm:$0xff] }
 0x124   : > { %2174 = vst [vmem:[%s2377_s25 + $0xe28] sm:$0xff] %v1662_v8  ;;  %v1155_v18 = vmul.f32 %v2361_v0, %v641_v4  ;;  %v1156_v19 = vmul.f32 %v2361_v0, %v642_v5  ;;  %2175 = vst [vmem:[%s2377_s25 + $0xe30] sm:$0xff] %v1663_v11  ;;  %v1665_v23 = vadd.f32 %v2364_v2, %v1151_v12  ;;  %v663_v8 = vld [vmem:[%s2359_s22 + $0xf10] sm:$0xff] }
 0x125   : > { %v1666_v24 = vadd.f32 %v2364_v2, %v1152_v13  ;;  %v1667_v25 = vadd.f32 %v2364_v2, %v1153_v14  ;;  %v1157_v26 = vmul.f32 %v2361_v0, %v643_v10  ;;  %2176 = vst [vmem:[%s2377_s25 + $0xe38] sm:$0xff] %v1664_v16  ;;  %v1668_v30 = vadd.f32 %v2364_v2, %v1154_v17  ;;  %v664_v13 = vld [vmem:[%s2359_s22 + $0xf18] sm:$0xff]  ;;  %v665_v14 = vld [vmem:[%s2359_s22 + $0xf20] sm:$0xff] }
 0x126   : > { %v1669_v31 = vadd.f32 %v2364_v2, %v1155_v18  ;;  %v1670_v32 = vadd.f32 %v2364_v2, %v1156_v19  ;;  %v1158_v33 = vmul.f32 %v2361_v0, %v644_v15  ;;  %2177 = vst [vmem:[%s2377_s25 + $0xe40] sm:$0xff] %v1665_v23  ;;  %v1159_v36 = vmul.f32 %v2361_v0, %v645_v20  ;;  %v666_v15 = vld [vmem:[%s2359_s22 + $0xf28] sm:$0xff]  ;;  %v667_v20 = vld [vmem:[%s2359_s22 + $0xf30] sm:$0xff] }
 0x127   : > { %2178 = vst [vmem:[%s2377_s25 + $0xe48] sm:$0xff] %v1666_v24  ;;  %2179 = vst [vmem:[%s2377_s25 + $0xe50] sm:$0xff] %v1667_v25  ;;  %v1671_v35 = vadd.f32 %v2364_v2, %v1157_v26  ;;  %v1160_v37 = vmul.f32 %v2361_v0, %v646_v21  ;;  %v1161_v38 = vmul.f32 %v2361_v0, %v647_v22  ;;  %v668_v25 = vld [vmem:[%s2359_s22 + $0xf38] sm:$0xff] }
 0x128   : > { %2180 = vst [vmem:[%s2377_s25 + $0xe58] sm:$0xff] %v1668_v30  ;;  %2181 = vst [vmem:[%s2377_s25 + $0xe60] sm:$0xff] %v1669_v31  ;;  %v1672_v40 = vadd.f32 %v2364_v2, %v1158_v33  ;;  %v1162_v41 = vmul.f32 %v2361_v0, %v648_v27  ;;  %v1163_v42 = vmul.f32 %v2361_v0, %v649_v28  ;;  %v669_v30 = vld [vmem:[%s2359_s22 + $0xf40] sm:$0xff]  ;;  %v670_v31 = vld [vmem:[%s2359_s22 + $0xf48] sm:$0xff] }
 0x129   : > { %2182 = vst [vmem:[%s2377_s25 + $0xe68] sm:$0xff] %v1670_v32  ;;  %v1164_v43 = vmul.f32 %v2361_v0, %v650_v29  ;;  %2183 = vst [vmem:[%s2377_s25 + $0xe70] sm:$0xff] %v1671_v35  ;;  %v1673_v47 = vadd.f32 %v2364_v2, %v1159_v36  ;;  %v1674_v48 = vadd.f32 %v2364_v2, %v1160_v37  ;;  %v671_v32 = vld [vmem:[%s2359_s22 + $0xf50] sm:$0xff]  ;;  %v672_v37 = vld [vmem:[%s2359_s22 + $0xf58] sm:$0xff] }
 0x12a   : > { %v1675_v49 = vadd.f32 %v2364_v2, %v1161_v38  ;;  %v1165_v50 = vmul.f32 %v2361_v0, %v651_v34  ;;  %2184 = vst [vmem:[%s2377_s25 + $0xe78] sm:$0xff] %v1672_v40  ;;  %v1676_v54 = vadd.f32 %v2364_v2, %v1162_v41  ;;  %v1677_v55 = vadd.f32 %v2364_v2, %v1163_v42  ;;  %v673_v38 = vld [vmem:[%s2359_s22 + $0xf60] sm:$0xff] }
 0x12b   : > { %v1678_v56 = vadd.f32 %v2364_v2, %v1164_v43  ;;  %v1166_v57 = vmul.f32 %v2361_v0, %v652_v39  ;;  %2185 = vst [vmem:[%s2377_s25 + $0xe80] sm:$0xff] %v1673_v47  ;;  %2186 = vst [vmem:[%s2377_s25 + $0xe88] sm:$0xff] %v1674_v48  ;;  %v1167_v60 = vmul.f32 %v2361_v0, %v653_v44  ;;  %v674_v39 = vld [vmem:[%s2359_s22 + $0xf68] sm:$0xff]  ;;  %v675_v44 = vld [vmem:[%s2359_s22 + $0xf70] sm:$0xff] }
 0x12c   : > { %2187 = vst [vmem:[%s2377_s25 + $0xe90] sm:$0xff] %v1675_v49  ;;  %v1679_v59 = vadd.f32 %v2364_v2, %v1165_v50  ;;  %v1168_v61 = vmul.f32 %v2361_v0, %v654_v45  ;;  %v1169_v62 = vmul.f32 %v2361_v0, %v655_v46  ;;  %2188 = vst [vmem:[%s2377_s25 + $0xe98] sm:$0xff] %v1676_v54  ;;  %v676_v49 = vld [vmem:[%s2359_s22 + $0xf78] sm:$0xff]  ;;  %v677_v54 = vld [vmem:[%s2359_s22 + $0xf80] sm:$0xff] }
 0x12d   : > { %2189 = vst [vmem:[%s2377_s25 + $0xea0] sm:$0xff] %v1677_v55  ;;  %2190 = vst [vmem:[%s2377_s25 + $0xea8] sm:$0xff] %v1678_v56  ;;  %v1680_v1 = vadd.f32 %v2364_v2, %v1166_v57  ;;  %v1170_v3 = vmul.f32 %v2361_v0, %v656_v51  ;;  %v1171_v4 = vmul.f32 %v2361_v0, %v657_v52  ;;  %v678_v55 = vld [vmem:[%s2359_s22 + $0xf88] sm:$0xff]  ;;  %v679_v56 = vld [vmem:[%s2359_s22 + $0xf90] sm:$0xff] }
 0x12e   : > { %v1172_v5 = vmul.f32 %v2361_v0, %v658_v53  ;;  %2191 = vst [vmem:[%s2377_s25 + $0xeb0] sm:$0xff] %v1679_v59  ;;  %v1681_v9 = vadd.f32 %v2364_v2, %v1167_v60  ;;  %v1682_v10 = vadd.f32 %v2364_v2, %v1168_v61  ;;  %v1683_v11 = vadd.f32 %v2364_v2, %v1169_v62  ;;  %v680_v61 = vld [vmem:[%s2359_s22 + $0xf98] sm:$0xff]  ;;  %v681_v62 = vld [vmem:[%s2359_s22 + $0xfa0] sm:$0xff] }
 0x12f   : > { %v1173_v12 = vmul.f32 %v2361_v0, %v659_v58  ;;  %2192 = vst [vmem:[%s2377_s25 + $0xeb8] sm:$0xff] %v1680_v1  ;;  %v1684_v16 = vadd.f32 %v2364_v2, %v1170_v3  ;;  %v1685_v17 = vadd.f32 %v2364_v2, %v1171_v4  ;;  %v1174_v19 = vmul.f32 %v2361_v0, %v660_v63  ;;  %v682_v63 = vld [vmem:[%s2359_s22 + $0xfa8] sm:$0xff] }
 0x130   : > { %v1686_v18 = vadd.f32 %v2364_v2, %v1172_v5  ;;  %2193 = vst [vmem:[%s2377_s25 + $0xec0] sm:$0xff] %v1681_v9  ;;  %2194 = vst [vmem:[%s2377_s25 + $0xec8] sm:$0xff] %v1682_v10  ;;  %v1175_v22 = vmul.f32 %v2361_v0, %v661_v6  ;;  %v1176_v23 = vmul.f32 %v2361_v0, %v662_v7  ;;  %v683_v6 = vld [vmem:[%s2359_s22 + $0xfb0] sm:$0xff] }
 0x131   : > { %2195 = vst [vmem:[%s2377_s25 + $0xed0] sm:$0xff] %v1683_v11  ;;  %v1687_v21 = vadd.f32 %v2364_v2, %v1173_v12  ;;  %v1177_v24 = vmul.f32 %v2361_v0, %v663_v8  ;;  %2196 = vst [vmem:[%s2377_s25 + $0xed8] sm:$0xff] %v1684_v16  ;;  %v1688_v26 = vadd.f32 %v2364_v2, %v1174_v19  ;;  %v684_v11 = vld [vmem:[%s2359_s22 + $0xfb8] sm:$0xff]  ;;  %v685_v16 = vld [vmem:[%s2359_s22 + $0xfc0] sm:$0xff] }
 0x132   : > { %2197 = vst [vmem:[%s2377_s25 + $0xee0] sm:$0xff] %v1685_v17  ;;  %2198 = vst [vmem:[%s2377_s25 + $0xee8] sm:$0xff] %v1686_v18  ;;  %v1178_v27 = vmul.f32 %v2361_v0, %v664_v13  ;;  %v1179_v28 = vmul.f32 %v2361_v0, %v665_v14  ;;  %v1180_v29 = vmul.f32 %v2361_v0, %v666_v15  ;;  %v686_v17 = vld [vmem:[%s2359_s22 + $0xfc8] sm:$0xff]  ;;  %v687_v18 = vld [vmem:[%s2359_s22 + $0xfd0] sm:$0xff] }
 0x133   : > { %2199 = vst [vmem:[%s2377_s25 + $0xef0] sm:$0xff] %v1687_v21  ;;  %v1689_v33 = vadd.f32 %v2364_v2, %v1175_v22  ;;  %v1690_v34 = vadd.f32 %v2364_v2, %v1176_v23  ;;  %v1691_v35 = vadd.f32 %v2364_v2, %v1177_v24  ;;  %v1181_v36 = vmul.f32 %v2361_v0, %v667_v20  ;;  %v688_v23 = vld [vmem:[%s2359_s22 + $0xfd8] sm:$0xff]  ;;  %v689_v24 = vld [vmem:[%s2359_s22 + $0xfe0] sm:$0xff] }
 0x134   : > { %2200 = vst [vmem:[%s2377_s25 + $0xef8] sm:$0xff] %v1688_v26  ;;  %v1692_v40 = vadd.f32 %v2364_v2, %v1178_v27  ;;  %v1693_v41 = vadd.f32 %v2364_v2, %v1179_v28  ;;  %v1694_v42 = vadd.f32 %v2364_v2, %v1180_v29  ;;  %v1182_v43 = vmul.f32 %v2361_v0, %v668_v25  ;;  %v690_v25 = vld [vmem:[%s2359_s22 + $0xfe8] sm:$0xff] }
 0x135   : > { %2201 = vst [vmem:[%s2377_s25 + $0xf00] sm:$0xff] %v1689_v33  ;;  %2202 = vst [vmem:[%s2377_s25 + $0xf08] sm:$0xff] %v1690_v34  ;;  %v1695_v45 = vadd.f32 %v2364_v2, %v1181_v36  ;;  %v1183_v46 = vmul.f32 %v2361_v0, %v669_v30  ;;  %v1184_v47 = vmul.f32 %v2361_v0, %v670_v31  ;;  %v691_v30 = vld [vmem:[%s2359_s22 + $0xff0] sm:$0xff] }
 0x136   : > { %2203 = vst [vmem:[%s2377_s25 + $0xf10] sm:$0xff] %v1691_v35  ;;  %v1185_v48 = vmul.f32 %v2361_v0, %v671_v32  ;;  %2204 = vst [vmem:[%s2377_s25 + $0xf18] sm:$0xff] %v1692_v40  ;;  %v1696_v50 = vadd.f32 %v2364_v2, %v1182_v43  ;;  %v1186_v51 = vmul.f32 %v2361_v0, %v672_v37  ;;  %v692_v35 = vld [vmem:[%s2359_s22 + $0xff8] sm:$0xff] }
 0x137   : > { %2205 = vst [vmem:[%s2377_s25 + $0xf20] sm:$0xff] %v1693_v41  ;;  %2206 = vst [vmem:[%s2377_s25 + $0xf28] sm:$0xff] %v1694_v42  ;;  %v1187_v52 = vmul.f32 %v2361_v0, %v673_v38  ;;  %v1188_v53 = vmul.f32 %v2361_v0, %v674_v39  ;;  %v1697_v57 = vadd.f32 %v2364_v2, %v1183_v46 }
 0x138   : > { %2207 = vst [vmem:[%s2377_s25 + $0xf30] sm:$0xff] %v1695_v45  ;;  %v1698_v58 = vadd.f32 %v2364_v2, %v1184_v47  ;;  %v1699_v59 = vadd.f32 %v2364_v2, %v1185_v48  ;;  %v1189_v60 = vmul.f32 %v2361_v0, %v675_v44  ;;  %2208 = vst [vmem:[%s2377_s25 + $0xf38] sm:$0xff] %v1696_v50 }
 0x139   : > { %v1700_v1 = vadd.f32 %v2364_v2, %v1186_v51  ;;  %v1701_v3 = vadd.f32 %v2364_v2, %v1187_v52  ;;  %v1702_v4 = vadd.f32 %v2364_v2, %v1188_v53  ;;  %v1190_v5 = vmul.f32 %v2361_v0, %v676_v49  ;;  %2209 = vst [vmem:[%s2377_s25 + $0xf40] sm:$0xff] %v1697_v57 }
 0x13a   : > { %2210 = vst [vmem:[%s2377_s25 + $0xf48] sm:$0xff] %v1698_v58  ;;  %2211 = vst [vmem:[%s2377_s25 + $0xf50] sm:$0xff] %v1699_v59  ;;  %v1703_v7 = vadd.f32 %v2364_v2, %v1189_v60  ;;  %v1191_v8 = vmul.f32 %v2361_v0, %v677_v54  ;;  %v1192_v9 = vmul.f32 %v2361_v0, %v678_v55 }
 0x13b   : > { %v1193_v10 = vmul.f32 %v2361_v0, %v679_v56  ;;  %2212 = vst [vmem:[%s2377_s25 + $0xf58] sm:$0xff] %v1700_v1  ;;  %2213 = vst [vmem:[%s2377_s25 + $0xf60] sm:$0xff] %v1701_v3  ;;  %v1704_v12 = vadd.f32 %v2364_v2, %v1190_v5  ;;  %v1194_v13 = vmul.f32 %v2361_v0, %v680_v61 }
 0x13c   : > { %2214 = vst [vmem:[%s2377_s25 + $0xf68] sm:$0xff] %v1702_v4  ;;  %v1195_v14 = vmul.f32 %v2361_v0, %v681_v62  ;;  %v1196_v15 = vmul.f32 %v2361_v0, %v682_v63  ;;  %2215 = vst [vmem:[%s2377_s25 + $0xf70] sm:$0xff] %v1703_v7  ;;  %v1705_v19 = vadd.f32 %v2364_v2, %v1191_v8 }
 0x13d   : > { %v1706_v20 = vadd.f32 %v2364_v2, %v1192_v9  ;;  %v1707_v21 = vadd.f32 %v2364_v2, %v1193_v10  ;;  %v1197_v22 = vmul.f32 %v2361_v0, %v683_v6  ;;  %2216 = vst [vmem:[%s2377_s25 + $0xf78] sm:$0xff] %v1704_v12  ;;  %v1708_v26 = vadd.f32 %v2364_v2, %v1194_v13 }
 0x13e   : > { %v1709_v27 = vadd.f32 %v2364_v2, %v1195_v14  ;;  %v1710_v28 = vadd.f32 %v2364_v2, %v1196_v15  ;;  %v1198_v29 = vmul.f32 %v2361_v0, %v684_v11  ;;  %2217 = vst [vmem:[%s2377_s25 + $0xf80] sm:$0xff] %v1705_v19  ;;  %v1199_v32 = vmul.f32 %v2361_v0, %v685_v16 }
 0x13f   : > { %2218 = vst [vmem:[%s2377_s25 + $0xf88] sm:$0xff] %v1706_v20  ;;  %2219 = vst [vmem:[%s2377_s25 + $0xf90] sm:$0xff] %v1707_v21  ;;  %v1711_v31 = vadd.f32 %v2364_v2, %v1197_v22  ;;  %v1200_v33 = vmul.f32 %v2361_v0, %v686_v17  ;;  %v1201_v34 = vmul.f32 %v2361_v0, %v687_v18 }
 0x140   : > { %2220 = vst [vmem:[%s2377_s25 + $0xf98] sm:$0xff] %v1708_v26  ;;  %2221 = vst [vmem:[%s2377_s25 + $0xfa0] sm:$0xff] %v1709_v27  ;;  %v1712_v36 = vadd.f32 %v2364_v2, %v1198_v29  ;;  %v1202_v37 = vmul.f32 %v2361_v0, %v688_v23  ;;  %v1203_v38 = vmul.f32 %v2361_v0, %v689_v24 }
 0x141   : > { %2222 = vst [vmem:[%s2377_s25 + $0xfa8] sm:$0xff] %v1710_v28  ;;  %v1204_v39 = vmul.f32 %v2361_v0, %v690_v25  ;;  %2223 = vst [vmem:[%s2377_s25 + $0xfb0] sm:$0xff] %v1711_v31  ;;  %v1713_v40 = vadd.f32 %v2364_v2, %v1199_v32  ;;  %v1714_v41 = vadd.f32 %v2364_v2, %v1200_v33 }
 0x142   : > { %v1715_v42 = vadd.f32 %v2364_v2, %v1201_v34  ;;  %v1205_v43 = vmul.f32 %v2361_v0, %v691_v30  ;;  %2224 = vst [vmem:[%s2377_s25 + $0xfb8] sm:$0xff] %v1712_v36  ;;  %v1716_v44 = vadd.f32 %v2364_v2, %v1202_v37  ;;  %v1717_v45 = vadd.f32 %v2364_v2, %v1203_v38 }
 0x143   : > { %v1718_v46 = vadd.f32 %v2364_v2, %v1204_v39  ;;  %v1206_v47 = vmul.f32 %v2361_v0, %v692_v35  ;;  %2225 = vst [vmem:[%s2377_s25 + $0xfc0] sm:$0xff] %v1713_v40  ;;  %2226 = vst [vmem:[%s2377_s25 + $0xfc8] sm:$0xff] %v1714_v41 }
 0x144   : > { %2227 = vst [vmem:[%s2377_s25 + $0xfd0] sm:$0xff] %v1715_v42  ;;  %v1719_v48 = vadd.f32 %v2364_v2, %v1205_v43  ;;  %2228 = vst [vmem:[%s2377_s25 + $0xfd8] sm:$0xff] %v1716_v44 }
 0x145   : > { %2229 = vst [vmem:[%s2377_s25 + $0xfe0] sm:$0xff] %v1717_v45  ;;  %2230 = vst [vmem:[%s2377_s25 + $0xfe8] sm:$0xff] %v1718_v46  ;;  %v1720_v49 = vadd.f32 %v2364_v2, %v1206_v47 }
 0x146   : > { %2231 = vst [vmem:[%s2377_s25 + $0xff0] sm:$0xff] %v1719_v48 }
 0x147   : > { %2232 = vst [vmem:[%s2377_s25 + $0xff8] sm:$0xff] %v1720_v49 }
 0x148 PF: > { %s15_s16 = sadd.s32 1, %s2320_s16  }
 0x149   : > { %p12_p4 = scmp.ge.s32.totalorder %s15_s16, 4  }
 0x14b   :  { %14 = sbr.rel (!%p12_p4) target bundleno = 3 (0x3), region = 62 }

</bundles_post_ra>
